<compile_context>
chip_gen: v5e
topology: v5e:2x2
jax: 0.10.0
libtpu: 0.0.40
codegen_flags: <defaults>
</compile_context>

<pallas_src>
import functools
import math

import jax
import jax.numpy as jnp
from jax.experimental import pallas as pl
from jax.experimental.pallas import tpu as pltpu


# ----------------------------------------------------------------------------
# Fused encoder-block kernel (one grid step = Bt batch elements)
# ----------------------------------------------------------------------------
def _encoder_block_kernel(
        x_ref, mask_ref, pe_ref,
        cg_ref, cb_ref, cdw_ref, cdb_ref, cpw_ref, cpb_ref,
        ag_ref, ab_ref, wq_ref, bq_ref, wk_ref, bk_ref, wv_ref, bv_ref,
        wo_ref, bo_ref,
        fg_ref, fb_ref, w1_ref, b1_ref, w2_ref, b2_ref,
        o_ref, *, num_conv, kernel_size, num_heads, mm_dtype):
    Bt, L, D = x_ref.shape
    H = num_heads
    Dh = D // H
    K = kernel_size
    pad = K // 2
    BL = Bt * L
    scale = 1.0 / math.sqrt(Dh)

    def mm(a, w):
        # bf16 (or f32) operands, f32 accumulation on the MXU.
        return jnp.dot(a.astype(mm_dtype), w, preferred_element_type=jnp.float32)

    def ln(x3, g, b, eps=1e-5):
        mu = jnp.mean(x3, axis=-1, keepdims=True)
        var = jnp.mean((x3 - mu) * (x3 - mu), axis=-1, keepdims=True)
        return (x3 - mu) * jax.lax.rsqrt(var + eps) * g[None] + b[None]

    # --- positional-encoding add ---------------------------------------------
    h = x_ref[...].astype(jnp.float32) + pe_ref[...][None]          # (Bt, L, D)

    # per-row position-within-sequence, for the conv edge masks
    lpos = jax.lax.broadcasted_iota(jnp.int32, (Bt, L, 1), 1).reshape(BL, 1)

    # --- conv layers: LN -> depthwise -> pointwise -> ReLU -> residual -------
    for li in range(num_conv):
        res = h
        y = ln(h, cg_ref[li], cb_ref[li]).reshape(BL, D)            # (BL, D)
        dw = cdw_ref[li]                                            # (K, D) f32
        acc = jnp.zeros((BL, D), jnp.float32)
        for kk in range(K):                                         # static taps
            sh = pad - kk                                           # want y[l - sh]
            if sh % BL == 0:
                tap = y
            else:
                shifted = pltpu.roll(y, shift=sh % BL, axis=0)      # XLU rotate
                valid = (lpos >= sh) & (lpos < L + sh)              # 'same' zero pad
                tap = jnp.where(valid, shifted, 0.0)
            acc = acc + tap * dw[kk:kk + 1, :]
        acc = acc + cdb_ref[li]                                     # depthwise bias
        # pointwise 1x1 conv + bias + ReLU  (M = Bt*L rows on the MXU)
        out = jnp.maximum(mm(acc, cpw_ref[li]) + cpb_ref[li], 0.0)
        h = out.reshape(Bt, L, D) + res

    # --- multi-head self attention: LN -> MHA(mask) -> residual --------------
    res = h
    y2 = ln(h, ag_ref[...], ab_ref[...]).reshape(BL, D)
    q = (mm(y2, wq_ref[...]) + bq_ref[...]).reshape(Bt, L, D)
    k = (mm(y2, wk_ref[...]) + bk_ref[...]).reshape(Bt, L, D)
    v = (mm(y2, wv_ref[...]) + bv_ref[...]).reshape(Bt, L, D)

    def split_heads(t):        # (Bt, L, D) -> (H*Bt, L, Dh), head-major batch
        return jnp.concatenate(
            [t[:, :, hi * Dh:(hi + 1) * Dh] for hi in range(H)], axis=0)

    qh, kh, vh = split_heads(q), split_heads(k), split_heads(v)

    s = jnp.einsum('bld,bmd->blm', qh.astype(mm_dtype), kh.astype(mm_dtype),
                   preferred_element_type=jnp.float32) * scale      # (H*Bt, L, L)
    bias = (1.0 - mask_ref[...]) * (-1e30)                          # (Bt, 1, L)
    s = (s.reshape(H, Bt, L, L) + bias[None]).reshape(H * Bt, L, L)

    m = jnp.max(s, axis=-1, keepdims=True)
    e = jnp.exp(s - m)
    p = e * pl.reciprocal(jnp.sum(e, axis=-1, keepdims=True), approx=True)
    ctx = jnp.einsum('blm,bmd->bld', p.astype(mm_dtype), vh.astype(mm_dtype),
                     preferred_element_type=jnp.float32)            # (H*Bt, L, Dh)
    ctx = jnp.concatenate([ctx[hi * Bt:(hi + 1) * Bt] for hi in range(H)],
                          axis=-1)                                  # (Bt, L, D)
    out = mm(ctx.reshape(BL, D), wo_ref[...]) + bo_ref[...]
    h = out.reshape(Bt, L, D) + res

    # --- FFN: LN -> W1 -> ReLU -> W2 -> residual ------------------------------
    res = h
    y2 = ln(h, fg_ref[...], fb_ref[...]).reshape(BL, D)
    hh = jnp.maximum(mm(y2, w1_ref[...]) + b1_ref[...], 0.0)
    out = mm(hh, w2_ref[...]) + b2_ref[...]
    h = out.reshape(Bt, L, D) + res

    o_ref[...] = h.astype(o_ref.dtype)


# ----------------------------------------------------------------------------
# pallas_call wrapper
# ----------------------------------------------------------------------------
def _rep_spec(shape):
    zeros = (0,) * len(shape)
    return pl.BlockSpec(shape, lambda b, _z=zeros: _z)


def _tpu_caps():
    """(vmem_limit_bytes, num_tensorcores_per_chip) — generation aware."""
    vmem_capacity = 128 * 1024 * 1024
    try:
        info = pltpu.get_tpu_info()
        vmem_capacity = int(getattr(info, "vmem_capacity_bytes", vmem_capacity))
    except Exception:
        pass
    kind = ""
    try:
        kind = jax.devices()[0].device_kind.lower()
    except Exception:
        pass
    num_tc = 2 if ("v7" in kind or "v5p" in kind or "v4" in kind) else 1
    # ~3/4 of physical VMEM: 96 MiB on 128 MiB parts (v5e/v6e), 48 MiB on v7x.
    vmem_limit = min(int(vmem_capacity * 3 // 4), 100 * 1024 * 1024)
    return vmem_limit, num_tc


def _choose_bt(B, L, D, H, num_conv, K, vmem_limit_bytes, num_tc):
    """Largest batch tile that fits the VMEM budget; only cap to B // num_tc on
    multi-TensorCore chips (so both cores get grid work).  On 1-TC v5e/v6e the
    grid is a sequential loop, so bigger Bt = bigger M = Bt*L for the MXU and
    fewer per-step overheads."""
    per_b = 4 * (2 * L * D            # input block (double-buffered)
                 + 2 * L * D          # output block (double-buffered)
                 + 8 * L * D          # h / res / LN / conv temporaries
                 + 4 * L * D          # q, k, v, ctx
                 + 3 * H * L * L      # scores / exp / prob buffers
                 + 4 * L)             # mask block, iota, misc
    weights = 4 * (num_conv * (K * D + 2 * D * D + 4 * D) + 6 * D * D + 14 * D)
    budget = max(vmem_limit_bytes - 2 * weights, per_b)
    bt = max(1, min(B, budget // per_b))
    if num_tc >= 2 and B >= 2:
        bt = min(bt, max(1, B // num_tc))
    while B % bt:                      # keep the grid exact
        bt -= 1
    return bt


def encoder_block_forward(x, mask, params, *, num_conv, kernel_size, num_heads,
                          matmul_dtype=jnp.bfloat16):
    if kernel_size % 2 != 1:
        raise ValueError("kernel_size must be odd for 'same' depthwise conv")
    if num_conv < 1:
        raise ValueError("num_conv must be >= 1")
    B, L, D = x.shape
    if D % num_heads != 0:
        raise ValueError("dim must be divisible by num_heads")

    pe = positional_encoding(L, D)                       # (L, D) f32
    mask_f = mask.astype(jnp.float32).reshape(B, 1, L)   # 1.0 valid, 0.0 pad

    vmem_limit, num_tc = _tpu_caps()
    bt = _choose_bt(B, L, D, num_heads, num_conv, kernel_size, vmem_limit, num_tc)
    grid = (B // bt,)

    def w(a):   # MXU weights as bf16 operands (f32 accumulate in-kernel)
        return a.astype(matmul_dtype)

    convs = params["convs"]

    def stack(key_):
        return jnp.stack([cp[key_] for cp in convs], axis=0)

    c_ln_g, c_ln_b = stack("ln_g"), stack("ln_b")            # (num_conv, 1, D)
    c_dw, c_db = stack("dw_w"), stack("dw_b")                # (num_conv, K|1, D)
    c_pw, c_pb = w(stack("pw_w")), stack("pw_b")             # (num_conv, D, D)

    ap, fp = params["attn"], params["ffn"]

    inputs = [x, mask_f, pe,
              c_ln_g, c_ln_b, c_dw, c_db, c_pw, c_pb,
              ap["ln_g"], ap["ln_b"],
              w(ap["wq"]), ap["bq"], w(ap["wk"]), ap["bk"],
              w(ap["wv"]), ap["bv"], w(ap["wo"]), ap["bo"],
              fp["ln_g"], fp["ln_b"],
              w(fp["w1"]), fp["b1"], w(fp["w2"]), fp["b2"]]

    in_specs = [pl.BlockSpec((bt, L, D), lambda b: (b, 0, 0)),
                pl.BlockSpec((bt, 1, L), lambda b: (b, 0, 0)),
                _rep_spec((L, D))]
    in_specs += [_rep_spec(a.shape) for a in inputs[3:]]

    kern = functools.partial(_encoder_block_kernel, num_conv=num_conv,
                             kernel_size=kernel_size, num_heads=num_heads,
                             mm_dtype=matmul_dtype)
    return pl.pallas_call(
        kern,
        out_shape=jax.ShapeDtypeStruct((B, L, D), x.dtype),
        grid=grid,
        in_specs=in_specs,
        out_specs=pl.BlockSpec((bt, L, D), lambda b: (b, 0, 0)),
        compiler_params=pltpu.CompilerParams(
            dimension_semantics=("parallel",),
            vmem_limit_bytes=vmem_limit),
    )(*inputs)


# ----------------------------------------------------------------------------
# Positional encoding / parameters / module forward
# ----------------------------------------------------------------------------
def positional_encoding(length, dim):
    if dim % 2 != 0:
        raise ValueError("positional encoding requires even dim")
    pos = jnp.arange(length, dtype=jnp.float32)[:, None]
    i = jnp.arange(dim // 2, dtype=jnp.float32)[None, :]
    angle = pos / jnp.power(10000.0, (2.0 * i) / dim)
    pe = jnp.zeros((length, dim), jnp.float32)
    pe = pe.at[:, 0::2].set(jnp.sin(angle))
    pe = pe.at[:, 1::2].set(jnp.cos(angle))
    return pe


def init_params(key, dim, num_conv, kernel_size):
    keys = iter(jax.random.split(key, 8 * num_conv + 32))

    def dense(shape, scale=0.02):
        return scale * jax.random.normal(next(keys), shape, jnp.float32)

    ones = jnp.ones((1, dim), jnp.float32)
    zeros = jnp.zeros((1, dim), jnp.float32)

    convs = []
    for _ in range(num_conv):
        convs.append(dict(
            ln_g=ones, ln_b=zeros,
            dw_w=dense((kernel_size, dim), 0.1),
            dw_b=zeros,                         # depthwise bias (Conv1d default)
            pw_w=dense((dim, dim)),
            pw_b=zeros,
        ))
    attn = dict(
        ln_g=ones, ln_b=zeros,
        wq=dense((dim, dim)), bq=zeros,
        wk=dense((dim, dim)), bk=zeros,
        wv=dense((dim, dim)), bv=zeros,
        wo=dense((dim, dim)), bo=zeros,
    )
    ffn = dict(
        ln_g=ones, ln_b=zeros,
        w1=dense((dim, dim)), b1=zeros,
        w2=dense((dim, dim)), b2=zeros,
    )
    return dict(convs=convs, attn=attn, ffn=ffn)


def embedding_encoder_forward(x_c, x_q, c_mask, q_mask, params, *,
                              maximum_context_length, num_conv, kernel_size,
                              num_heads, matmul_dtype=jnp.bfloat16):
    if x_c.shape[1] > maximum_context_length:
        raise ValueError("con_len > maximum_context_length")
    # TODO(synk): dropout / stochastic layer-dropout from the training-mode
    # Encoder_Block are intentionally omitted (inference forward pass).
    x_c_out = encoder_block_forward(
        x_c, c_mask, params, num_conv=num_conv, kernel_size=kernel_size,
        num_heads=num_heads, matmul_dtype=matmul_dtype)
    x_q_out = encoder_block_forward(
        x_q, q_mask, params, num_conv=num_conv, kernel_size=kernel_size,
        num_heads=num_heads, matmul_dtype=matmul_dtype)
    return x_c_out, x_q_out


# ----------------------------------------------------------------------------
if __name__ == "__main__":
    B, Lc, Lq, D = 2, 16, 8, 32
    num_conv, kernel_size, num_heads = 2, 5, 4
    maximum_context_length = 32

    key = jax.random.PRNGKey(0)
    k_xc, k_xq, k_p = jax.random.split(key, 3)

    x_c = jax.random.normal(k_xc, (B, Lc, D), jnp.float32)
    x_q = jax.random.normal(k_xq, (B, Lq, D), jnp.float32)
    c_lens = jnp.array([[Lc], [12]])
    q_lens = jnp.array([[Lq], [5]])
    c_mask = (jnp.arange(Lc)[None, :] < c_lens).astype(jnp.float32)  # (B, Lc)
    q_mask = (jnp.arange(Lq)[None, :] < q_lens).astype(jnp.float32)  # (B, Lq)

    params = init_params(k_p, D, num_conv, kernel_size)

    out_c, out_q = embedding_encoder_forward(
        x_c, x_q, c_mask, q_mask, params,
        maximum_context_length=maximum_context_length,
        num_conv=num_conv, kernel_size=kernel_size, num_heads=num_heads)

    jax.block_until_ready((out_c, out_q))
    assert out_c.shape == (B, Lc, D) and out_q.shape == (B, Lq, D)
    assert jnp.all(jnp.isfinite(out_c)) and jnp.all(jnp.isfinite(out_q))
    print("KERNEL_OK")
</pallas_src>

<mosaic_0001>
module attributes {stable_mosaic.version = 11 : i64} {
  func.func @_encoder_block_kernel(%arg0: i32, %arg1: memref<2x16x32xf32, #tpu.memory_space<vmem>>, %arg2: memref<2x1x16xf32, #tpu.memory_space<vmem>>, %arg3: memref<16x32xf32, #tpu.memory_space<vmem>>, %arg4: memref<2x1x32xf32, #tpu.memory_space<vmem>>, %arg5: memref<2x1x32xf32, #tpu.memory_space<vmem>>, %arg6: memref<2x5x32xf32, #tpu.memory_space<vmem>>, %arg7: memref<2x1x32xf32, #tpu.memory_space<vmem>>, %arg8: memref<2x32x32xbf16, #tpu.memory_space<vmem>>, %arg9: memref<2x1x32xf32, #tpu.memory_space<vmem>>, %arg10: memref<1x32xf32, #tpu.memory_space<vmem>>, %arg11: memref<1x32xf32, #tpu.memory_space<vmem>>, %arg12: memref<32x32xbf16, #tpu.memory_space<vmem>>, %arg13: memref<1x32xf32, #tpu.memory_space<vmem>>, %arg14: memref<32x32xbf16, #tpu.memory_space<vmem>>, %arg15: memref<1x32xf32, #tpu.memory_space<vmem>>, %arg16: memref<32x32xbf16, #tpu.memory_space<vmem>>, %arg17: memref<1x32xf32, #tpu.memory_space<vmem>>, %arg18: memref<32x32xbf16, #tpu.memory_space<vmem>>, %arg19: memref<1x32xf32, #tpu.memory_space<vmem>>, %arg20: memref<1x32xf32, #tpu.memory_space<vmem>>, %arg21: memref<1x32xf32, #tpu.memory_space<vmem>>, %arg22: memref<32x32xbf16, #tpu.memory_space<vmem>>, %arg23: memref<1x32xf32, #tpu.memory_space<vmem>>, %arg24: memref<32x32xbf16, #tpu.memory_space<vmem>>, %arg25: memref<1x32xf32, #tpu.memory_space<vmem>>, %arg26: memref<2x16x32xf32, #tpu.memory_space<vmem>>) attributes {dimension_semantics = [#tpu.dimension_semantics<parallel>], iteration_bounds = array<i64: 1>, scalar_prefetch = 0 : i64, scratch_operands = 0 : i64, tpu.core_type = #tpu.core_type<tc>, window_params = [{transform_indices = @transform_0, window_bounds = array<i64: 2, 16, 32>}, {transform_indices = @transform_1, window_bounds = array<i64: 2, 1, 16>}, {pipeline_mode = #tpu.pipeline_mode<synchronous>, transform_indices = @transform_2, window_bounds = array<i64: 16, 32>}, {pipeline_mode = #tpu.pipeline_mode<synchronous>, transform_indices = @transform_3, window_bounds = array<i64: 2, 1, 32>}, {pipeline_mode = #tpu.pipeline_mode<synchronous>, transform_indices = @transform_4, window_bounds = array<i64: 2, 1, 32>}, {pipeline_mode = #tpu.pipeline_mode<synchronous>, transform_indices = @transform_5, window_bounds = array<i64: 2, 5, 32>}, {pipeline_mode = #tpu.pipeline_mode<synchronous>, transform_indices = @transform_6, window_bounds = array<i64: 2, 1, 32>}, {pipeline_mode = #tpu.pipeline_mode<synchronous>, transform_indices = @transform_7, window_bounds = array<i64: 2, 32, 32>}, {pipeline_mode = #tpu.pipeline_mode<synchronous>, transform_indices = @transform_8, window_bounds = array<i64: 2, 1, 32>}, {pipeline_mode = #tpu.pipeline_mode<synchronous>, transform_indices = @transform_9, window_bounds = array<i64: 1, 32>}, {pipeline_mode = #tpu.pipeline_mode<synchronous>, transform_indices = @transform_10, window_bounds = array<i64: 1, 32>}, {pipeline_mode = #tpu.pipeline_mode<synchronous>, transform_indices = @transform_11, window_bounds = array<i64: 32, 32>}, {pipeline_mode = #tpu.pipeline_mode<synchronous>, transform_indices = @transform_12, window_bounds = array<i64: 1, 32>}, {pipeline_mode = #tpu.pipeline_mode<synchronous>, transform_indices = @transform_13, window_bounds = array<i64: 32, 32>}, {pipeline_mode = #tpu.pipeline_mode<synchronous>, transform_indices = @transform_14, window_bounds = array<i64: 1, 32>}, {pipeline_mode = #tpu.pipeline_mode<synchronous>, transform_indices = @transform_15, window_bounds = array<i64: 32, 32>}, {pipeline_mode = #tpu.pipeline_mode<synchronous>, transform_indices = @transform_16, window_bounds = array<i64: 1, 32>}, {pipeline_mode = #tpu.pipeline_mode<synchronous>, transform_indices = @transform_17, window_bounds = array<i64: 32, 32>}, {pipeline_mode = #tpu.pipeline_mode<synchronous>, transform_indices = @transform_18, window_bounds = array<i64: 1, 32>}, {pipeline_mode = #tpu.pipeline_mode<synchronous>, transform_indices = @transform_19, window_bounds = array<i64: 1, 32>}, {pipeline_mode = #tpu.pipeline_mode<synchronous>, transform_indices = @transform_20, window_bounds = array<i64: 1, 32>}, {pipeline_mode = #tpu.pipeline_mode<synchronous>, transform_indices = @transform_21, window_bounds = array<i64: 32, 32>}, {pipeline_mode = #tpu.pipeline_mode<synchronous>, transform_indices = @transform_22, window_bounds = array<i64: 1, 32>}, {pipeline_mode = #tpu.pipeline_mode<synchronous>, transform_indices = @transform_23, window_bounds = array<i64: 32, 32>}, {pipeline_mode = #tpu.pipeline_mode<synchronous>, transform_indices = @transform_24, window_bounds = array<i64: 1, 32>}, {transform_indices = @transform_25, window_bounds = array<i64: 2, 16, 32>}]} {
    %c0 = arith.constant 0 : index
    %c0_0 = arith.constant 0 : index
    %c0_1 = arith.constant 0 : index
    %0 = vector.load %arg1[%c0, %c0_0, %c0_1] : memref<2x16x32xf32, #tpu.memory_space<vmem>>, vector<2x16x32xf32>
    %c0_2 = arith.constant 0 : index
    %c0_3 = arith.constant 0 : index
    %1 = vector.load %arg3[%c0_2, %c0_3] : memref<16x32xf32, #tpu.memory_space<vmem>>, vector<16x32xf32>
    %2 = vector.shape_cast %1 : vector<16x32xf32> to vector<1x16x32xf32>
    %3 = vector.broadcast %2 : vector<1x16x32xf32> to vector<2x16x32xf32>
    %4 = arith.addf %0, %3 : vector<2x16x32xf32>
    %5 = tpu.iota {dimensions = array<i32: 1>} : vector<2x16x1xi32>
    %6 = vector.shape_cast %5 : vector<2x16x1xi32> to vector<32x1xi32>
    %c0_4 = arith.constant 0 : index
    %c0_5 = arith.constant 0 : index
    %c0_6 = arith.constant 0 : index
    %7 = vector.load %arg4[%c0_4, %c0_5, %c0_6] : memref<2x1x32xf32, #tpu.memory_space<vmem>>, vector<1x1x32xf32>
    %8 = vector.shape_cast %7 : vector<1x1x32xf32> to vector<1x32xf32>
    %c0_7 = arith.constant 0 : index
    %c0_8 = arith.constant 0 : index
    %c0_9 = arith.constant 0 : index
    %9 = vector.load %arg5[%c0_7, %c0_8, %c0_9] : memref<2x1x32xf32, #tpu.memory_space<vmem>>, vector<1x1x32xf32>
    %10 = vector.shape_cast %9 : vector<1x1x32xf32> to vector<1x32xf32>
    %cst = arith.constant dense<0.000000e+00> : vector<2x16xf32>
    %11 = vector.multi_reduction <add>, %4, %cst [2] : vector<2x16x32xf32> to vector<2x16xf32>
    %12 = vector.shape_cast %11 : vector<2x16xf32> to vector<2x16x1xf32>
    %cst_10 = arith.constant 3.200000e+01 : f32
    %13 = vector.broadcast %cst_10 : f32 to vector<2x16x1xf32>
    %14 = arith.divf %12, %13 : vector<2x16x1xf32>
    %15 = vector.broadcast %14 : vector<2x16x1xf32> to vector<2x16x32xf32>
    %16 = arith.subf %4, %15 : vector<2x16x32xf32>
    %17 = vector.broadcast %14 : vector<2x16x1xf32> to vector<2x16x32xf32>
    %18 = arith.subf %4, %17 : vector<2x16x32xf32>
    %19 = arith.mulf %16, %18 : vector<2x16x32xf32>
    %cst_11 = arith.constant dense<0.000000e+00> : vector<2x16xf32>
    %20 = vector.multi_reduction <add>, %19, %cst_11 [2] : vector<2x16x32xf32> to vector<2x16xf32>
    %21 = vector.shape_cast %20 : vector<2x16xf32> to vector<2x16x1xf32>
    %cst_12 = arith.constant 3.200000e+01 : f32
    %22 = vector.broadcast %cst_12 : f32 to vector<2x16x1xf32>
    %23 = arith.divf %21, %22 : vector<2x16x1xf32>
    %24 = vector.broadcast %14 : vector<2x16x1xf32> to vector<2x16x32xf32>
    %25 = arith.subf %4, %24 : vector<2x16x32xf32>
    %cst_13 = arith.constant 9.99999974E-6 : f32
    %26 = vector.broadcast %cst_13 : f32 to vector<2x16x1xf32>
    %27 = arith.addf %23, %26 : vector<2x16x1xf32>
    %28 = math.rsqrt %27 : vector<2x16x1xf32>
    %29 = vector.broadcast %28 : vector<2x16x1xf32> to vector<2x16x32xf32>
    %30 = arith.mulf %25, %29 : vector<2x16x32xf32>
    %31 = vector.shape_cast %8 : vector<1x32xf32> to vector<1x1x32xf32>
    %32 = vector.broadcast %31 : vector<1x1x32xf32> to vector<2x16x32xf32>
    %33 = arith.mulf %30, %32 : vector<2x16x32xf32>
    %34 = vector.shape_cast %10 : vector<1x32xf32> to vector<1x1x32xf32>
    %35 = vector.broadcast %34 : vector<1x1x32xf32> to vector<2x16x32xf32>
    %36 = arith.addf %33, %35 : vector<2x16x32xf32>
    %37 = vector.shape_cast %36 : vector<2x16x32xf32> to vector<32x32xf32>
    %c0_14 = arith.constant 0 : index
    %c0_15 = arith.constant 0 : index
    %c0_16 = arith.constant 0 : index
    %38 = vector.load %arg6[%c0_14, %c0_15, %c0_16] : memref<2x5x32xf32, #tpu.memory_space<vmem>>, vector<1x5x32xf32>
    %39 = vector.shape_cast %38 : vector<1x5x32xf32> to vector<5x32xf32>
    %cst_17 = arith.constant 0.000000e+00 : f32
    %40 = vector.broadcast %cst_17 : f32 to vector<32x32xf32>
    %c2_i32 = arith.constant 2 : i32
    %41 = tpu.dynamic_rotate %37 by %c2_i32 dim 0 : vector<32x32xf32>, i32 -> vector<32x32xf32>
    %c2_i32_18 = arith.constant 2 : i32
    %42 = vector.broadcast %c2_i32_18 : i32 to vector<32x1xi32>
    %43 = arith.cmpi sge, %6, %42 : vector<32x1xi32>
    %c18_i32 = arith.constant 18 : i32
    %44 = vector.broadcast %c18_i32 : i32 to vector<32x1xi32>
    %45 = arith.cmpi slt, %6, %44 : vector<32x1xi32>
    %46 = arith.andi %43, %45 : vector<32x1xi1>
    %cst_19 = arith.constant 0.000000e+00 : f32
    %47 = vector.shape_cast %46 : vector<32x1xi1> to vector<32x1xi1>
    %48 = vector.broadcast %47 : vector<32x1xi1> to vector<32x32xi1>
    %49 = vector.broadcast %cst_19 : f32 to vector<32x32xf32>
    %50 = arith.select %48, %41, %49 : vector<32x32xi1>, vector<32x32xf32>
    %51 = vector.extract_strided_slice %39 {offsets = [0, 0], sizes = [1, 32], strides = [1, 1]} : vector<5x32xf32> to vector<1x32xf32>
    %52 = vector.broadcast %51 : vector<1x32xf32> to vector<32x32xf32>
    %53 = arith.mulf %50, %52 : vector<32x32xf32>
    %54 = arith.addf %40, %53 : vector<32x32xf32>
    %c1_i32 = arith.constant 1 : i32
    %55 = tpu.dynamic_rotate %37 by %c1_i32 dim 0 : vector<32x32xf32>, i32 -> vector<32x32xf32>
    %c1_i32_20 = arith.constant 1 : i32
    %56 = vector.broadcast %c1_i32_20 : i32 to vector<32x1xi32>
    %57 = arith.cmpi sge, %6, %56 : vector<32x1xi32>
    %c17_i32 = arith.constant 17 : i32
    %58 = vector.broadcast %c17_i32 : i32 to vector<32x1xi32>
    %59 = arith.cmpi slt, %6, %58 : vector<32x1xi32>
    %60 = arith.andi %57, %59 : vector<32x1xi1>
    %cst_21 = arith.constant 0.000000e+00 : f32
    %61 = vector.shape_cast %60 : vector<32x1xi1> to vector<32x1xi1>
    %62 = vector.broadcast %61 : vector<32x1xi1> to vector<32x32xi1>
    %63 = vector.broadcast %cst_21 : f32 to vector<32x32xf32>
    %64 = arith.select %62, %55, %63 : vector<32x32xi1>, vector<32x32xf32>
    %65 = vector.extract_strided_slice %39 {offsets = [1, 0], sizes = [1, 32], strides = [1, 1]} : vector<5x32xf32> to vector<1x32xf32>
    %66 = vector.broadcast %65 : vector<1x32xf32> to vector<32x32xf32>
    %67 = arith.mulf %64, %66 : vector<32x32xf32>
    %68 = arith.addf %54, %67 : vector<32x32xf32>
    %69 = vector.extract_strided_slice %39 {offsets = [2, 0], sizes = [1, 32], strides = [1, 1]} : vector<5x32xf32> to vector<1x32xf32>
    %70 = vector.broadcast %69 : vector<1x32xf32> to vector<32x32xf32>
    %71 = arith.mulf %37, %70 : vector<32x32xf32>
    %72 = arith.addf %68, %71 : vector<32x32xf32>
    %c31_i32 = arith.constant 31 : i32
    %73 = tpu.dynamic_rotate %37 by %c31_i32 dim 0 : vector<32x32xf32>, i32 -> vector<32x32xf32>
    %c-1_i32 = arith.constant -1 : i32
    %74 = vector.broadcast %c-1_i32 : i32 to vector<32x1xi32>
    %75 = arith.cmpi sge, %6, %74 : vector<32x1xi32>
    %c15_i32 = arith.constant 15 : i32
    %76 = vector.broadcast %c15_i32 : i32 to vector<32x1xi32>
    %77 = arith.cmpi slt, %6, %76 : vector<32x1xi32>
    %78 = arith.andi %75, %77 : vector<32x1xi1>
    %cst_22 = arith.constant 0.000000e+00 : f32
    %79 = vector.shape_cast %78 : vector<32x1xi1> to vector<32x1xi1>
    %80 = vector.broadcast %79 : vector<32x1xi1> to vector<32x32xi1>
    %81 = vector.broadcast %cst_22 : f32 to vector<32x32xf32>
    %82 = arith.select %80, %73, %81 : vector<32x32xi1>, vector<32x32xf32>
    %83 = vector.extract_strided_slice %39 {offsets = [3, 0], sizes = [1, 32], strides = [1, 1]} : vector<5x32xf32> to vector<1x32xf32>
    %84 = vector.broadcast %83 : vector<1x32xf32> to vector<32x32xf32>
    %85 = arith.mulf %82, %84 : vector<32x32xf32>
    %86 = arith.addf %72, %85 : vector<32x32xf32>
    %c30_i32 = arith.constant 30 : i32
    %87 = tpu.dynamic_rotate %37 by %c30_i32 dim 0 : vector<32x32xf32>, i32 -> vector<32x32xf32>
    %c-2_i32 = arith.constant -2 : i32
    %88 = vector.broadcast %c-2_i32 : i32 to vector<32x1xi32>
    %89 = arith.cmpi sge, %6, %88 : vector<32x1xi32>
    %c14_i32 = arith.constant 14 : i32
    %90 = vector.broadcast %c14_i32 : i32 to vector<32x1xi32>
    %91 = arith.cmpi slt, %6, %90 : vector<32x1xi32>
    %92 = arith.andi %89, %91 : vector<32x1xi1>
    %cst_23 = arith.constant 0.000000e+00 : f32
    %93 = vector.shape_cast %92 : vector<32x1xi1> to vector<32x1xi1>
    %94 = vector.broadcast %93 : vector<32x1xi1> to vector<32x32xi1>
    %95 = vector.broadcast %cst_23 : f32 to vector<32x32xf32>
    %96 = arith.select %94, %87, %95 : vector<32x32xi1>, vector<32x32xf32>
    %97 = vector.extract_strided_slice %39 {offsets = [4, 0], sizes = [1, 32], strides = [1, 1]} : vector<5x32xf32> to vector<1x32xf32>
    %98 = vector.broadcast %97 : vector<1x32xf32> to vector<32x32xf32>
    %99 = arith.mulf %96, %98 : vector<32x32xf32>
    %100 = arith.addf %86, %99 : vector<32x32xf32>
    %c0_24 = arith.constant 0 : index
    %c0_25 = arith.constant 0 : index
    %c0_26 = arith.constant 0 : index
    %101 = vector.load %arg7[%c0_24, %c0_25, %c0_26] : memref<2x1x32xf32, #tpu.memory_space<vmem>>, vector<1x1x32xf32>
    %102 = vector.shape_cast %101 : vector<1x1x32xf32> to vector<1x32xf32>
    %103 = vector.broadcast %102 : vector<1x32xf32> to vector<32x32xf32>
    %104 = arith.addf %100, %103 : vector<32x32xf32>
    %c0_27 = arith.constant 0 : index
    %c0_28 = arith.constant 0 : index
    %c0_29 = arith.constant 0 : index
    %105 = vector.load %arg8[%c0_27, %c0_28, %c0_29] : memref<2x32x32xbf16, #tpu.memory_space<vmem>>, vector<1x32x32xbf16>
    %106 = vector.shape_cast %105 : vector<1x32x32xbf16> to vector<32x32xbf16>
    %107 = arith.truncf %104 : vector<32x32xf32> to vector<32x32xbf16>
    %cst_30 = arith.constant dense<0.000000e+00> : vector<32x32xf32>
    %108 = tpu.matmul %107, %106, %cst_30 {dimension_numbers = #tpu.dot_dimension_numbers<[1], [0], [0], [1], [0, 0, 1, 1], [], []>} : vector<32x32xbf16>, vector<32x32xbf16>, vector<32x32xf32> -> vector<32x32xf32>
    %c0_31 = arith.constant 0 : index
    %c0_32 = arith.constant 0 : index
    %c0_33 = arith.constant 0 : index
    %109 = vector.load %arg9[%c0_31, %c0_32, %c0_33] : memref<2x1x32xf32, #tpu.memory_space<vmem>>, vector<1x1x32xf32>
    %110 = vector.shape_cast %109 : vector<1x1x32xf32> to vector<1x32xf32>
    %111 = vector.broadcast %110 : vector<1x32xf32> to vector<32x32xf32>
    %112 = arith.addf %108, %111 : vector<32x32xf32>
    %cst_34 = arith.constant 0.000000e+00 : f32
    %113 = vector.broadcast %cst_34 : f32 to vector<32x32xf32>
    %114 = arith.maximumf %112, %113 : vector<32x32xf32>
    %115 = vector.shape_cast %114 : vector<32x32xf32> to vector<2x16x32xf32>
    %116 = arith.addf %115, %4 : vector<2x16x32xf32>
    %c1 = arith.constant 1 : index
    %c0_35 = arith.constant 0 : index
    %c0_36 = arith.constant 0 : index
    %117 = vector.load %arg4[%c1, %c0_35, %c0_36] : memref<2x1x32xf32, #tpu.memory_space<vmem>>, vector<1x1x32xf32>
    %118 = vector.shape_cast %117 : vector<1x1x32xf32> to vector<1x32xf32>
    %c1_37 = arith.constant 1 : index
    %c0_38 = arith.constant 0 : index
    %c0_39 = arith.constant 0 : index
    %119 = vector.load %arg5[%c1_37, %c0_38, %c0_39] : memref<2x1x32xf32, #tpu.memory_space<vmem>>, vector<1x1x32xf32>
    %120 = vector.shape_cast %119 : vector<1x1x32xf32> to vector<1x32xf32>
    %cst_40 = arith.constant dense<0.000000e+00> : vector<2x16xf32>
    %121 = vector.multi_reduction <add>, %116, %cst_40 [2] : vector<2x16x32xf32> to vector<2x16xf32>
    %122 = vector.shape_cast %121 : vector<2x16xf32> to vector<2x16x1xf32>
    %cst_41 = arith.constant 3.200000e+01 : f32
    %123 = vector.broadcast %cst_41 : f32 to vector<2x16x1xf32>
    %124 = arith.divf %122, %123 : vector<2x16x1xf32>
    %125 = vector.broadcast %124 : vector<2x16x1xf32> to vector<2x16x32xf32>
    %126 = arith.subf %116, %125 : vector<2x16x32xf32>
    %127 = vector.broadcast %124 : vector<2x16x1xf32> to vector<2x16x32xf32>
    %128 = arith.subf %116, %127 : vector<2x16x32xf32>
    %129 = arith.mulf %126, %128 : vector<2x16x32xf32>
    %cst_42 = arith.constant dense<0.000000e+00> : vector<2x16xf32>
    %130 = vector.multi_reduction <add>, %129, %cst_42 [2] : vector<2x16x32xf32> to vector<2x16xf32>
    %131 = vector.shape_cast %130 : vector<2x16xf32> to vector<2x16x1xf32>
    %cst_43 = arith.constant 3.200000e+01 : f32
    %132 = vector.broadcast %cst_43 : f32 to vector<2x16x1xf32>
    %133 = arith.divf %131, %132 : vector<2x16x1xf32>
    %134 = vector.broadcast %124 : vector<2x16x1xf32> to vector<2x16x32xf32>
    %135 = arith.subf %116, %134 : vector<2x16x32xf32>
    %cst_44 = arith.constant 9.99999974E-6 : f32
    %136 = vector.broadcast %cst_44 : f32 to vector<2x16x1xf32>
    %137 = arith.addf %133, %136 : vector<2x16x1xf32>
    %138 = math.rsqrt %137 : vector<2x16x1xf32>
    %139 = vector.broadcast %138 : vector<2x16x1xf32> to vector<2x16x32xf32>
    %140 = arith.mulf %135, %139 : vector<2x16x32xf32>
    %141 = vector.shape_cast %118 : vector<1x32xf32> to vector<1x1x32xf32>
    %142 = vector.broadcast %141 : vector<1x1x32xf32> to vector<2x16x32xf32>
    %143 = arith.mulf %140, %142 : vector<2x16x32xf32>
    %144 = vector.shape_cast %120 : vector<1x32xf32> to vector<1x1x32xf32>
    %145 = vector.broadcast %144 : vector<1x1x32xf32> to vector<2x16x32xf32>
    %146 = arith.addf %143, %145 : vector<2x16x32xf32>
    %147 = vector.shape_cast %146 : vector<2x16x32xf32> to vector<32x32xf32>
    %c1_45 = arith.constant 1 : index
    %c0_46 = arith.constant 0 : index
    %c0_47 = arith.constant 0 : index
    %148 = vector.load %arg6[%c1_45, %c0_46, %c0_47] : memref<2x5x32xf32, #tpu.memory_space<vmem>>, vector<1x5x32xf32>
    %149 = vector.shape_cast %148 : vector<1x5x32xf32> to vector<5x32xf32>
    %cst_48 = arith.constant 0.000000e+00 : f32
    %150 = vector.broadcast %cst_48 : f32 to vector<32x32xf32>
    %c2_i32_49 = arith.constant 2 : i32
    %151 = tpu.dynamic_rotate %147 by %c2_i32_49 dim 0 : vector<32x32xf32>, i32 -> vector<32x32xf32>
    %c2_i32_50 = arith.constant 2 : i32
    %152 = vector.broadcast %c2_i32_50 : i32 to vector<32x1xi32>
    %153 = arith.cmpi sge, %6, %152 : vector<32x1xi32>
    %c18_i32_51 = arith.constant 18 : i32
    %154 = vector.broadcast %c18_i32_51 : i32 to vector<32x1xi32>
    %155 = arith.cmpi slt, %6, %154 : vector<32x1xi32>
    %156 = arith.andi %153, %155 : vector<32x1xi1>
    %cst_52 = arith.constant 0.000000e+00 : f32
    %157 = vector.shape_cast %156 : vector<32x1xi1> to vector<32x1xi1>
    %158 = vector.broadcast %157 : vector<32x1xi1> to vector<32x32xi1>
    %159 = vector.broadcast %cst_52 : f32 to vector<32x32xf32>
    %160 = arith.select %158, %151, %159 : vector<32x32xi1>, vector<32x32xf32>
    %161 = vector.extract_strided_slice %149 {offsets = [0, 0], sizes = [1, 32], strides = [1, 1]} : vector<5x32xf32> to vector<1x32xf32>
    %162 = vector.broadcast %161 : vector<1x32xf32> to vector<32x32xf32>
    %163 = arith.mulf %160, %162 : vector<32x32xf32>
    %164 = arith.addf %150, %163 : vector<32x32xf32>
    %c1_i32_53 = arith.constant 1 : i32
    %165 = tpu.dynamic_rotate %147 by %c1_i32_53 dim 0 : vector<32x32xf32>, i32 -> vector<32x32xf32>
    %c1_i32_54 = arith.constant 1 : i32
    %166 = vector.broadcast %c1_i32_54 : i32 to vector<32x1xi32>
    %167 = arith.cmpi sge, %6, %166 : vector<32x1xi32>
    %c17_i32_55 = arith.constant 17 : i32
    %168 = vector.broadcast %c17_i32_55 : i32 to vector<32x1xi32>
    %169 = arith.cmpi slt, %6, %168 : vector<32x1xi32>
    %170 = arith.andi %167, %169 : vector<32x1xi1>
    %cst_56 = arith.constant 0.000000e+00 : f32
    %171 = vector.shape_cast %170 : vector<32x1xi1> to vector<32x1xi1>
    %172 = vector.broadcast %171 : vector<32x1xi1> to vector<32x32xi1>
    %173 = vector.broadcast %cst_56 : f32 to vector<32x32xf32>
    %174 = arith.select %172, %165, %173 : vector<32x32xi1>, vector<32x32xf32>
    %175 = vector.extract_strided_slice %149 {offsets = [1, 0], sizes = [1, 32], strides = [1, 1]} : vector<5x32xf32> to vector<1x32xf32>
    %176 = vector.broadcast %175 : vector<1x32xf32> to vector<32x32xf32>
    %177 = arith.mulf %174, %176 : vector<32x32xf32>
    %178 = arith.addf %164, %177 : vector<32x32xf32>
    %179 = vector.extract_strided_slice %149 {offsets = [2, 0], sizes = [1, 32], strides = [1, 1]} : vector<5x32xf32> to vector<1x32xf32>
    %180 = vector.broadcast %179 : vector<1x32xf32> to vector<32x32xf32>
    %181 = arith.mulf %147, %180 : vector<32x32xf32>
    %182 = arith.addf %178, %181 : vector<32x32xf32>
    %c31_i32_57 = arith.constant 31 : i32
    %183 = tpu.dynamic_rotate %147 by %c31_i32_57 dim 0 : vector<32x32xf32>, i32 -> vector<32x32xf32>
    %c-1_i32_58 = arith.constant -1 : i32
    %184 = vector.broadcast %c-1_i32_58 : i32 to vector<32x1xi32>
    %185 = arith.cmpi sge, %6, %184 : vector<32x1xi32>
    %c15_i32_59 = arith.constant 15 : i32
    %186 = vector.broadcast %c15_i32_59 : i32 to vector<32x1xi32>
    %187 = arith.cmpi slt, %6, %186 : vector<32x1xi32>
    %188 = arith.andi %185, %187 : vector<32x1xi1>
    %cst_60 = arith.constant 0.000000e+00 : f32
    %189 = vector.shape_cast %188 : vector<32x1xi1> to vector<32x1xi1>
    %190 = vector.broadcast %189 : vector<32x1xi1> to vector<32x32xi1>
    %191 = vector.broadcast %cst_60 : f32 to vector<32x32xf32>
    %192 = arith.select %190, %183, %191 : vector<32x32xi1>, vector<32x32xf32>
    %193 = vector.extract_strided_slice %149 {offsets = [3, 0], sizes = [1, 32], strides = [1, 1]} : vector<5x32xf32> to vector<1x32xf32>
    %194 = vector.broadcast %193 : vector<1x32xf32> to vector<32x32xf32>
    %195 = arith.mulf %192, %194 : vector<32x32xf32>
    %196 = arith.addf %182, %195 : vector<32x32xf32>
    %c30_i32_61 = arith.constant 30 : i32
    %197 = tpu.dynamic_rotate %147 by %c30_i32_61 dim 0 : vector<32x32xf32>, i32 -> vector<32x32xf32>
    %c-2_i32_62 = arith.constant -2 : i32
    %198 = vector.broadcast %c-2_i32_62 : i32 to vector<32x1xi32>
    %199 = arith.cmpi sge, %6, %198 : vector<32x1xi32>
    %c14_i32_63 = arith.constant 14 : i32
    %200 = vector.broadcast %c14_i32_63 : i32 to vector<32x1xi32>
    %201 = arith.cmpi slt, %6, %200 : vector<32x1xi32>
    %202 = arith.andi %199, %201 : vector<32x1xi1>
    %cst_64 = arith.constant 0.000000e+00 : f32
    %203 = vector.shape_cast %202 : vector<32x1xi1> to vector<32x1xi1>
    %204 = vector.broadcast %203 : vector<32x1xi1> to vector<32x32xi1>
    %205 = vector.broadcast %cst_64 : f32 to vector<32x32xf32>
    %206 = arith.select %204, %197, %205 : vector<32x32xi1>, vector<32x32xf32>
    %207 = vector.extract_strided_slice %149 {offsets = [4, 0], sizes = [1, 32], strides = [1, 1]} : vector<5x32xf32> to vector<1x32xf32>
    %208 = vector.broadcast %207 : vector<1x32xf32> to vector<32x32xf32>
    %209 = arith.mulf %206, %208 : vector<32x32xf32>
    %210 = arith.addf %196, %209 : vector<32x32xf32>
    %c1_65 = arith.constant 1 : index
    %c0_66 = arith.constant 0 : index
    %c0_67 = arith.constant 0 : index
    %211 = vector.load %arg7[%c1_65, %c0_66, %c0_67] : memref<2x1x32xf32, #tpu.memory_space<vmem>>, vector<1x1x32xf32>
    %212 = vector.shape_cast %211 : vector<1x1x32xf32> to vector<1x32xf32>
    %213 = vector.broadcast %212 : vector<1x32xf32> to vector<32x32xf32>
    %214 = arith.addf %210, %213 : vector<32x32xf32>
    %c1_68 = arith.constant 1 : index
    %c0_69 = arith.constant 0 : index
    %c0_70 = arith.constant 0 : index
    %215 = vector.load %arg8[%c1_68, %c0_69, %c0_70] : memref<2x32x32xbf16, #tpu.memory_space<vmem>>, vector<1x32x32xbf16>
    %216 = vector.shape_cast %215 : vector<1x32x32xbf16> to vector<32x32xbf16>
    %217 = arith.truncf %214 : vector<32x32xf32> to vector<32x32xbf16>
    %cst_71 = arith.constant dense<0.000000e+00> : vector<32x32xf32>
    %218 = tpu.matmul %217, %216, %cst_71 {dimension_numbers = #tpu.dot_dimension_numbers<[1], [0], [0], [1], [0, 0, 1, 1], [], []>} : vector<32x32xbf16>, vector<32x32xbf16>, vector<32x32xf32> -> vector<32x32xf32>
    %c1_72 = arith.constant 1 : index
    %c0_73 = arith.constant 0 : index
    %c0_74 = arith.constant 0 : index
    %219 = vector.load %arg9[%c1_72, %c0_73, %c0_74] : memref<2x1x32xf32, #tpu.memory_space<vmem>>, vector<1x1x32xf32>
    %220 = vector.shape_cast %219 : vector<1x1x32xf32> to vector<1x32xf32>
    %221 = vector.broadcast %220 : vector<1x32xf32> to vector<32x32xf32>
    %222 = arith.addf %218, %221 : vector<32x32xf32>
    %cst_75 = arith.constant 0.000000e+00 : f32
    %223 = vector.broadcast %cst_75 : f32 to vector<32x32xf32>
    %224 = arith.maximumf %222, %223 : vector<32x32xf32>
    %225 = vector.shape_cast %224 : vector<32x32xf32> to vector<2x16x32xf32>
    %226 = arith.addf %225, %116 : vector<2x16x32xf32>
    %c0_76 = arith.constant 0 : index
    %c0_77 = arith.constant 0 : index
    %227 = vector.load %arg10[%c0_76, %c0_77] : memref<1x32xf32, #tpu.memory_space<vmem>>, vector<1x32xf32>
    %c0_78 = arith.constant 0 : index
    %c0_79 = arith.constant 0 : index
    %228 = vector.load %arg11[%c0_78, %c0_79] : memref<1x32xf32, #tpu.memory_space<vmem>>, vector<1x32xf32>
    %cst_80 = arith.constant dense<0.000000e+00> : vector<2x16xf32>
    %229 = vector.multi_reduction <add>, %226, %cst_80 [2] : vector<2x16x32xf32> to vector<2x16xf32>
    %230 = vector.shape_cast %229 : vector<2x16xf32> to vector<2x16x1xf32>
    %cst_81 = arith.constant 3.200000e+01 : f32
    %231 = vector.broadcast %cst_81 : f32 to vector<2x16x1xf32>
    %232 = arith.divf %230, %231 : vector<2x16x1xf32>
    %233 = vector.broadcast %232 : vector<2x16x1xf32> to vector<2x16x32xf32>
    %234 = arith.subf %226, %233 : vector<2x16x32xf32>
    %235 = vector.broadcast %232 : vector<2x16x1xf32> to vector<2x16x32xf32>
    %236 = arith.subf %226, %235 : vector<2x16x32xf32>
    %237 = arith.mulf %234, %236 : vector<2x16x32xf32>
    %cst_82 = arith.constant dense<0.000000e+00> : vector<2x16xf32>
    %238 = vector.multi_reduction <add>, %237, %cst_82 [2] : vector<2x16x32xf32> to vector<2x16xf32>
    %239 = vector.shape_cast %238 : vector<2x16xf32> to vector<2x16x1xf32>
    %cst_83 = arith.constant 3.200000e+01 : f32
    %240 = vector.broadcast %cst_83 : f32 to vector<2x16x1xf32>
    %241 = arith.divf %239, %240 : vector<2x16x1xf32>
    %242 = vector.broadcast %232 : vector<2x16x1xf32> to vector<2x16x32xf32>
    %243 = arith.subf %226, %242 : vector<2x16x32xf32>
    %cst_84 = arith.constant 9.99999974E-6 : f32
    %244 = vector.broadcast %cst_84 : f32 to vector<2x16x1xf32>
    %245 = arith.addf %241, %244 : vector<2x16x1xf32>
    %246 = math.rsqrt %245 : vector<2x16x1xf32>
    %247 = vector.broadcast %246 : vector<2x16x1xf32> to vector<2x16x32xf32>
    %248 = arith.mulf %243, %247 : vector<2x16x32xf32>
    %249 = vector.shape_cast %227 : vector<1x32xf32> to vector<1x1x32xf32>
    %250 = vector.broadcast %249 : vector<1x1x32xf32> to vector<2x16x32xf32>
    %251 = arith.mulf %248, %250 : vector<2x16x32xf32>
    %252 = vector.shape_cast %228 : vector<1x32xf32> to vector<1x1x32xf32>
    %253 = vector.broadcast %252 : vector<1x1x32xf32> to vector<2x16x32xf32>
    %254 = arith.addf %251, %253 : vector<2x16x32xf32>
    %255 = vector.shape_cast %254 : vector<2x16x32xf32> to vector<32x32xf32>
    %c0_85 = arith.constant 0 : index
    %c0_86 = arith.constant 0 : index
    %256 = vector.load %arg12[%c0_85, %c0_86] : memref<32x32xbf16, #tpu.memory_space<vmem>>, vector<32x32xbf16>
    %257 = arith.truncf %255 : vector<32x32xf32> to vector<32x32xbf16>
    %cst_87 = arith.constant dense<0.000000e+00> : vector<32x32xf32>
    %258 = tpu.matmul %257, %256, %cst_87 {dimension_numbers = #tpu.dot_dimension_numbers<[1], [0], [0], [1], [0, 0, 1, 1], [], []>} : vector<32x32xbf16>, vector<32x32xbf16>, vector<32x32xf32> -> vector<32x32xf32>
    %c0_88 = arith.constant 0 : index
    %c0_89 = arith.constant 0 : index
    %259 = vector.load %arg13[%c0_88, %c0_89] : memref<1x32xf32, #tpu.memory_space<vmem>>, vector<1x32xf32>
    %260 = vector.broadcast %259 : vector<1x32xf32> to vector<32x32xf32>
    %261 = arith.addf %258, %260 : vector<32x32xf32>
    %262 = vector.shape_cast %261 : vector<32x32xf32> to vector<2x16x32xf32>
    %c0_90 = arith.constant 0 : index
    %c0_91 = arith.constant 0 : index
    %263 = vector.load %arg14[%c0_90, %c0_91] : memref<32x32xbf16, #tpu.memory_space<vmem>>, vector<32x32xbf16>
    %264 = arith.truncf %255 : vector<32x32xf32> to vector<32x32xbf16>
    %cst_92 = arith.constant dense<0.000000e+00> : vector<32x32xf32>
    %265 = tpu.matmul %264, %263, %cst_92 {dimension_numbers = #tpu.dot_dimension_numbers<[1], [0], [0], [1], [0, 0, 1, 1], [], []>} : vector<32x32xbf16>, vector<32x32xbf16>, vector<32x32xf32> -> vector<32x32xf32>
    %c0_93 = arith.constant 0 : index
    %c0_94 = arith.constant 0 : index
    %266 = vector.load %arg15[%c0_93, %c0_94] : memref<1x32xf32, #tpu.memory_space<vmem>>, vector<1x32xf32>
    %267 = vector.broadcast %266 : vector<1x32xf32> to vector<32x32xf32>
    %268 = arith.addf %265, %267 : vector<32x32xf32>
    %269 = vector.shape_cast %268 : vector<32x32xf32> to vector<2x16x32xf32>
    %c0_95 = arith.constant 0 : index
    %c0_96 = arith.constant 0 : index
    %270 = vector.load %arg16[%c0_95, %c0_96] : memref<32x32xbf16, #tpu.memory_space<vmem>>, vector<32x32xbf16>
    %271 = arith.truncf %255 : vector<32x32xf32> to vector<32x32xbf16>
    %cst_97 = arith.constant dense<0.000000e+00> : vector<32x32xf32>
    %272 = tpu.matmul %271, %270, %cst_97 {dimension_numbers = #tpu.dot_dimension_numbers<[1], [0], [0], [1], [0, 0, 1, 1], [], []>} : vector<32x32xbf16>, vector<32x32xbf16>, vector<32x32xf32> -> vector<32x32xf32>
    %c0_98 = arith.constant 0 : index
    %c0_99 = arith.constant 0 : index
    %273 = vector.load %arg17[%c0_98, %c0_99] : memref<1x32xf32, #tpu.memory_space<vmem>>, vector<1x32xf32>
    %274 = vector.broadcast %273 : vector<1x32xf32> to vector<32x32xf32>
    %275 = arith.addf %272, %274 : vector<32x32xf32>
    %276 = vector.shape_cast %275 : vector<32x32xf32> to vector<2x16x32xf32>
    %277 = vector.extract_strided_slice %262 {offsets = [0, 0, 0], sizes = [2, 16, 8], strides = [1, 1, 1]} : vector<2x16x32xf32> to vector<2x16x8xf32>
    %278 = vector.extract_strided_slice %262 {offsets = [0, 0, 8], sizes = [2, 16, 8], strides = [1, 1, 1]} : vector<2x16x32xf32> to vector<2x16x8xf32>
    %279 = vector.extract_strided_slice %262 {offsets = [0, 0, 16], sizes = [2, 16, 8], strides = [1, 1, 1]} : vector<2x16x32xf32> to vector<2x16x8xf32>
    %280 = vector.extract_strided_slice %262 {offsets = [0, 0, 24], sizes = [2, 16, 8], strides = [1, 1, 1]} : vector<2x16x32xf32> to vector<2x16x8xf32>
    %281 = tpu.concatenate %277, %278, %279, %280 in 0 : vector<2x16x8xf32>, vector<2x16x8xf32>, vector<2x16x8xf32>, vector<2x16x8xf32> -> vector<8x16x8xf32>
    %282 = vector.extract_strided_slice %269 {offsets = [0, 0, 0], sizes = [2, 16, 8], strides = [1, 1, 1]} : vector<2x16x32xf32> to vector<2x16x8xf32>
    %283 = vector.extract_strided_slice %269 {offsets = [0, 0, 8], sizes = [2, 16, 8], strides = [1, 1, 1]} : vector<2x16x32xf32> to vector<2x16x8xf32>
    %284 = vector.extract_strided_slice %269 {offsets = [0, 0, 16], sizes = [2, 16, 8], strides = [1, 1, 1]} : vector<2x16x32xf32> to vector<2x16x8xf32>
    %285 = vector.extract_strided_slice %269 {offsets = [0, 0, 24], sizes = [2, 16, 8], strides = [1, 1, 1]} : vector<2x16x32xf32> to vector<2x16x8xf32>
    %286 = tpu.concatenate %282, %283, %284, %285 in 0 : vector<2x16x8xf32>, vector<2x16x8xf32>, vector<2x16x8xf32>, vector<2x16x8xf32> -> vector<8x16x8xf32>
    %287 = vector.extract_strided_slice %276 {offsets = [0, 0, 0], sizes = [2, 16, 8], strides = [1, 1, 1]} : vector<2x16x32xf32> to vector<2x16x8xf32>
    %288 = vector.extract_strided_slice %276 {offsets = [0, 0, 8], sizes = [2, 16, 8], strides = [1, 1, 1]} : vector<2x16x32xf32> to vector<2x16x8xf32>
    %289 = vector.extract_strided_slice %276 {offsets = [0, 0, 16], sizes = [2, 16, 8], strides = [1, 1, 1]} : vector<2x16x32xf32> to vector<2x16x8xf32>
    %290 = vector.extract_strided_slice %276 {offsets = [0, 0, 24], sizes = [2, 16, 8], strides = [1, 1, 1]} : vector<2x16x32xf32> to vector<2x16x8xf32>
    %291 = tpu.concatenate %287, %288, %289, %290 in 0 : vector<2x16x8xf32>, vector<2x16x8xf32>, vector<2x16x8xf32>, vector<2x16x8xf32> -> vector<8x16x8xf32>
    %292 = arith.truncf %281 : vector<8x16x8xf32> to vector<8x16x8xbf16>
    %293 = arith.truncf %286 : vector<8x16x8xf32> to vector<8x16x8xbf16>
    "tpu.trace_start"() <{level = 10 : i32, message = "bld,bmd->blm"}> : () -> ()
    %cst_100 = arith.constant dense<0.000000e+00> : vector<8x16x16xf32>
    %294 = tpu.matmul %292, %293, %cst_100 {dimension_numbers = #tpu.dot_dimension_numbers<[2], [2], [1], [1], [0, 0, 0, 1, 1, 1], [0], [0]>} : vector<8x16x8xbf16>, vector<8x16x8xbf16>, vector<8x16x16xf32> -> vector<8x16x16xf32>
    "tpu.trace_stop"() : () -> ()
    %cst_101 = arith.constant 0.353553385 : f32
    %295 = vector.broadcast %cst_101 : f32 to vector<8x16x16xf32>
    %296 = arith.mulf %294, %295 : vector<8x16x16xf32>
    %c0_102 = arith.constant 0 : index
    %c0_103 = arith.constant 0 : index
    %c0_104 = arith.constant 0 : index
    %297 = vector.load %arg2[%c0_102, %c0_103, %c0_104] : memref<2x1x16xf32, #tpu.memory_space<vmem>>, vector<2x1x16xf32>
    %cst_105 = arith.constant 1.000000e+00 : f32
    %298 = vector.broadcast %cst_105 : f32 to vector<2x1x16xf32>
    %299 = arith.subf %298, %297 : vector<2x1x16xf32>
    %cst_106 = arith.constant -1.000000e+30 : f32
    %300 = vector.broadcast %cst_106 : f32 to vector<2x1x16xf32>
    %301 = arith.mulf %299, %300 : vector<2x1x16xf32>
    %302 = vector.shape_cast %296 : vector<8x16x16xf32> to vector<4x2x16x16xf32>
    %303 = vector.shape_cast %301 : vector<2x1x16xf32> to vector<1x2x1x16xf32>
    %304 = vector.broadcast %303 : vector<1x2x1x16xf32> to vector<4x2x16x16xf32>
    %305 = arith.addf %302, %304 : vector<4x2x16x16xf32>
    %306 = vector.shape_cast %305 : vector<4x2x16x16xf32> to vector<8x16x16xf32>
    %cst_107 = arith.constant dense<0xFF800000> : vector<8x16xf32>
    %307 = vector.multi_reduction <maximumf>, %306, %cst_107 [2] : vector<8x16x16xf32> to vector<8x16xf32>
    %308 = vector.shape_cast %307 : vector<8x16xf32> to vector<8x16x1xf32>
    %309 = vector.broadcast %308 : vector<8x16x1xf32> to vector<8x16x16xf32>
    %310 = arith.subf %306, %309 : vector<8x16x16xf32>
    %311 = math.exp %310 : vector<8x16x16xf32>
    %cst_108 = arith.constant dense<0.000000e+00> : vector<8x16xf32>
    %312 = vector.multi_reduction <add>, %311, %cst_108 [2] : vector<8x16x16xf32> to vector<8x16xf32>
    %313 = vector.shape_cast %312 : vector<8x16xf32> to vector<8x16x1xf32>
    %314 = tpu.reciprocal %313 {approx = true} : vector<8x16x1xf32> -> vector<8x16x1xf32>
    %315 = vector.broadcast %314 : vector<8x16x1xf32> to vector<8x16x16xf32>
    %316 = arith.mulf %311, %315 : vector<8x16x16xf32>
    %317 = arith.truncf %316 : vector<8x16x16xf32> to vector<8x16x16xbf16>
    %318 = arith.truncf %291 : vector<8x16x8xf32> to vector<8x16x8xbf16>
    "tpu.trace_start"() <{level = 10 : i32, message = "blm,bmd->bld"}> : () -> ()
    %cst_109 = arith.constant dense<0.000000e+00> : vector<8x16x8xf32>
    %319 = tpu.matmul %317, %318, %cst_109 {dimension_numbers = #tpu.dot_dimension_numbers<[2], [1], [1], [2], [0, 0, 0, 1, 1, 2], [0], [0]>} : vector<8x16x16xbf16>, vector<8x16x8xbf16>, vector<8x16x8xf32> -> vector<8x16x8xf32>
    "tpu.trace_stop"() : () -> ()
    %320 = vector.extract_strided_slice %319 {offsets = [0, 0, 0], sizes = [2, 16, 8], strides = [1, 1, 1]} : vector<8x16x8xf32> to vector<2x16x8xf32>
    %321 = vector.extract_strided_slice %319 {offsets = [2, 0, 0], sizes = [2, 16, 8], strides = [1, 1, 1]} : vector<8x16x8xf32> to vector<2x16x8xf32>
    %322 = vector.extract_strided_slice %319 {offsets = [4, 0, 0], sizes = [2, 16, 8], strides = [1, 1, 1]} : vector<8x16x8xf32> to vector<2x16x8xf32>
    %323 = vector.extract_strided_slice %319 {offsets = [6, 0, 0], sizes = [2, 16, 8], strides = [1, 1, 1]} : vector<8x16x8xf32> to vector<2x16x8xf32>
    %324 = tpu.concatenate %320, %321, %322, %323 in 2 : vector<2x16x8xf32>, vector<2x16x8xf32>, vector<2x16x8xf32>, vector<2x16x8xf32> -> vector<2x16x32xf32>
    %325 = vector.shape_cast %324 : vector<2x16x32xf32> to vector<32x32xf32>
    %c0_110 = arith.constant 0 : index
    %c0_111 = arith.constant 0 : index
    %326 = vector.load %arg18[%c0_110, %c0_111] : memref<32x32xbf16, #tpu.memory_space<vmem>>, vector<32x32xbf16>
    %327 = arith.truncf %325 : vector<32x32xf32> to vector<32x32xbf16>
    %cst_112 = arith.constant dense<0.000000e+00> : vector<32x32xf32>
    %328 = tpu.matmul %327, %326, %cst_112 {dimension_numbers = #tpu.dot_dimension_numbers<[1], [0], [0], [1], [0, 0, 1, 1], [], []>} : vector<32x32xbf16>, vector<32x32xbf16>, vector<32x32xf32> -> vector<32x32xf32>
    %c0_113 = arith.constant 0 : index
    %c0_114 = arith.constant 0 : index
    %329 = vector.load %arg19[%c0_113, %c0_114] : memref<1x32xf32, #tpu.memory_space<vmem>>, vector<1x32xf32>
    %330 = vector.broadcast %329 : vector<1x32xf32> to vector<32x32xf32>
    %331 = arith.addf %328, %330 : vector<32x32xf32>
    %332 = vector.shape_cast %331 : vector<32x32xf32> to vector<2x16x32xf32>
    %333 = arith.addf %332, %226 : vector<2x16x32xf32>
    %c0_115 = arith.constant 0 : index
    %c0_116 = arith.constant 0 : index
    %334 = vector.load %arg20[%c0_115, %c0_116] : memref<1x32xf32, #tpu.memory_space<vmem>>, vector<1x32xf32>
    %c0_117 = arith.constant 0 : index
    %c0_118 = arith.constant 0 : index
    %335 = vector.load %arg21[%c0_117, %c0_118] : memref<1x32xf32, #tpu.memory_space<vmem>>, vector<1x32xf32>
    %cst_119 = arith.constant dense<0.000000e+00> : vector<2x16xf32>
    %336 = vector.multi_reduction <add>, %333, %cst_119 [2] : vector<2x16x32xf32> to vector<2x16xf32>
    %337 = vector.shape_cast %336 : vector<2x16xf32> to vector<2x16x1xf32>
    %cst_120 = arith.constant 3.200000e+01 : f32
    %338 = vector.broadcast %cst_120 : f32 to vector<2x16x1xf32>
    %339 = arith.divf %337, %338 : vector<2x16x1xf32>
    %340 = vector.broadcast %339 : vector<2x16x1xf32> to vector<2x16x32xf32>
    %341 = arith.subf %333, %340 : vector<2x16x32xf32>
    %342 = vector.broadcast %339 : vector<2x16x1xf32> to vector<2x16x32xf32>
    %343 = arith.subf %333, %342 : vector<2x16x32xf32>
    %344 = arith.mulf %341, %343 : vector<2x16x32xf32>
    %cst_121 = arith.constant dense<0.000000e+00> : vector<2x16xf32>
    %345 = vector.multi_reduction <add>, %344, %cst_121 [2] : vector<2x16x32xf32> to vector<2x16xf32>
    %346 = vector.shape_cast %345 : vector<2x16xf32> to vector<2x16x1xf32>
    %cst_122 = arith.constant 3.200000e+01 : f32
    %347 = vector.broadcast %cst_122 : f32 to vector<2x16x1xf32>
    %348 = arith.divf %346, %347 : vector<2x16x1xf32>
    %349 = vector.broadcast %339 : vector<2x16x1xf32> to vector<2x16x32xf32>
    %350 = arith.subf %333, %349 : vector<2x16x32xf32>
    %cst_123 = arith.constant 9.99999974E-6 : f32
    %351 = vector.broadcast %cst_123 : f32 to vector<2x16x1xf32>
    %352 = arith.addf %348, %351 : vector<2x16x1xf32>
    %353 = math.rsqrt %352 : vector<2x16x1xf32>
    %354 = vector.broadcast %353 : vector<2x16x1xf32> to vector<2x16x32xf32>
    %355 = arith.mulf %350, %354 : vector<2x16x32xf32>
    %356 = vector.shape_cast %334 : vector<1x32xf32> to vector<1x1x32xf32>
    %357 = vector.broadcast %356 : vector<1x1x32xf32> to vector<2x16x32xf32>
    %358 = arith.mulf %355, %357 : vector<2x16x32xf32>
    %359 = vector.shape_cast %335 : vector<1x32xf32> to vector<1x1x32xf32>
    %360 = vector.broadcast %359 : vector<1x1x32xf32> to vector<2x16x32xf32>
    %361 = arith.addf %358, %360 : vector<2x16x32xf32>
    %362 = vector.shape_cast %361 : vector<2x16x32xf32> to vector<32x32xf32>
    %c0_124 = arith.constant 0 : index
    %c0_125 = arith.constant 0 : index
    %363 = vector.load %arg22[%c0_124, %c0_125] : memref<32x32xbf16, #tpu.memory_space<vmem>>, vector<32x32xbf16>
    %364 = arith.truncf %362 : vector<32x32xf32> to vector<32x32xbf16>
    %cst_126 = arith.constant dense<0.000000e+00> : vector<32x32xf32>
    %365 = tpu.matmul %364, %363, %cst_126 {dimension_numbers = #tpu.dot_dimension_numbers<[1], [0], [0], [1], [0, 0, 1, 1], [], []>} : vector<32x32xbf16>, vector<32x32xbf16>, vector<32x32xf32> -> vector<32x32xf32>
    %c0_127 = arith.constant 0 : index
    %c0_128 = arith.constant 0 : index
    %366 = vector.load %arg23[%c0_127, %c0_128] : memref<1x32xf32, #tpu.memory_space<vmem>>, vector<1x32xf32>
    %367 = vector.broadcast %366 : vector<1x32xf32> to vector<32x32xf32>
    %368 = arith.addf %365, %367 : vector<32x32xf32>
    %cst_129 = arith.constant 0.000000e+00 : f32
    %369 = vector.broadcast %cst_129 : f32 to vector<32x32xf32>
    %370 = arith.maximumf %368, %369 : vector<32x32xf32>
    %c0_130 = arith.constant 0 : index
    %c0_131 = arith.constant 0 : index
    %371 = vector.load %arg24[%c0_130, %c0_131] : memref<32x32xbf16, #tpu.memory_space<vmem>>, vector<32x32xbf16>
    %372 = arith.truncf %370 : vector<32x32xf32> to vector<32x32xbf16>
    %cst_132 = arith.constant dense<0.000000e+00> : vector<32x32xf32>
    %373 = tpu.matmul %372, %371, %cst_132 {dimension_numbers = #tpu.dot_dimension_numbers<[1], [0], [0], [1], [0, 0, 1, 1], [], []>} : vector<32x32xbf16>, vector<32x32xbf16>, vector<32x32xf32> -> vector<32x32xf32>
    %c0_133 = arith.constant 0 : index
    %c0_134 = arith.constant 0 : index
    %374 = vector.load %arg25[%c0_133, %c0_134] : memref<1x32xf32, #tpu.memory_space<vmem>>, vector<1x32xf32>
    %375 = vector.broadcast %374 : vector<1x32xf32> to vector<32x32xf32>
    %376 = arith.addf %373, %375 : vector<32x32xf32>
    %377 = vector.shape_cast %376 : vector<32x32xf32> to vector<2x16x32xf32>
    %378 = arith.addf %377, %333 : vector<2x16x32xf32>
    %c0_135 = arith.constant 0 : index
    %c0_136 = arith.constant 0 : index
    %c0_137 = arith.constant 0 : index
    %379 = vector.load %arg26[%c0_135, %c0_136, %c0_137] : memref<2x16x32xf32, #tpu.memory_space<vmem>>, vector<2x16x32xf32>
    tpu.vector_store %arg26[%c0_135, %c0_136, %c0_137], %378 {strides = array<i32>} : memref<2x16x32xf32, #tpu.memory_space<vmem>>, vector<2x16x32xf32>,
    return
  }
  func.func @transform_0(%arg0: i32) -> (i32, i32, i32) {
    %c0_i32 = arith.constant 0 : i32
    %c0_i32_0 = arith.constant 0 : i32
    %c0_i32_1 = arith.constant 0 : i32
    return %arg0, %c0_i32, %c0_i32_0 : i32, i32, i32
  }
  func.func @transform_1(%arg0: i32) -> (i32, i32, i32) {
    %c0_i32 = arith.constant 0 : i32
    %c0_i32_0 = arith.constant 0 : i32
    %c0_i32_1 = arith.constant 0 : i32
    return %arg0, %c0_i32, %c0_i32_0 : i32, i32, i32
  }
  func.func @transform_2(%arg0: i32) -> (i32, i32) {
    %c0_i32 = arith.constant 0 : i32
    %c0_i32_0 = arith.constant 0 : i32
    %c0_i32_1 = arith.constant 0 : i32
    return %c0_i32, %c0_i32_0 : i32, i32
  }
  func.func @transform_3(%arg0: i32) -> (i32, i32, i32) {
    %c0_i32 = arith.constant 0 : i32
    %c0_i32_0 = arith.constant 0 : i32
    %c0_i32_1 = arith.constant 0 : i32
    %c0_i32_2 = arith.constant 0 : i32
    return %c0_i32, %c0_i32_0, %c0_i32_1 : i32, i32, i32
  }
  func.func @transform_4(%arg0: i32) -> (i32, i32, i32) {
    %c0_i32 = arith.constant 0 : i32
    %c0_i32_0 = arith.constant 0 : i32
    %c0_i32_1 = arith.constant 0 : i32
    %c0_i32_2 = arith.constant 0 : i32
    return %c0_i32, %c0_i32_0, %c0_i32_1 : i32, i32, i32
  }
  func.func @transform_5(%arg0: i32) -> (i32, i32, i32) {
    %c0_i32 = arith.constant 0 : i32
    %c0_i32_0 = arith.constant 0 : i32
    %c0_i32_1 = arith.constant 0 : i32
    %c0_i32_2 = arith.constant 0 : i32
    return %c0_i32, %c0_i32_0, %c0_i32_1 : i32, i32, i32
  }
  func.func @transform_6(%arg0: i32) -> (i32, i32, i32) {
    %c0_i32 = arith.constant 0 : i32
    %c0_i32_0 = arith.constant 0 : i32
    %c0_i32_1 = arith.constant 0 : i32
    %c0_i32_2 = arith.constant 0 : i32
    return %c0_i32, %c0_i32_0, %c0_i32_1 : i32, i32, i32
  }
  func.func @transform_7(%arg0: i32) -> (i32, i32, i32) {
    %c0_i32 = arith.constant 0 : i32
    %c0_i32_0 = arith.constant 0 : i32
    %c0_i32_1 = arith.constant 0 : i32
    %c0_i32_2 = arith.constant 0 : i32
    return %c0_i32, %c0_i32_0, %c0_i32_1 : i32, i32, i32
  }
  func.func @transform_8(%arg0: i32) -> (i32, i32, i32) {
    %c0_i32 = arith.constant 0 : i32
    %c0_i32_0 = arith.constant 0 : i32
    %c0_i32_1 = arith.constant 0 : i32
    %c0_i32_2 = arith.constant 0 : i32
    return %c0_i32, %c0_i32_0, %c0_i32_1 : i32, i32, i32
  }
  func.func @transform_9(%arg0: i32) -> (i32, i32) {
    %c0_i32 = arith.constant 0 : i32
    %c0_i32_0 = arith.constant 0 : i32
    %c0_i32_1 = arith.constant 0 : i32
    return %c0_i32, %c0_i32_0 : i32, i32
  }
  func.func @transform_10(%arg0: i32) -> (i32, i32) {
    %c0_i32 = arith.constant 0 : i32
    %c0_i32_0 = arith.constant 0 : i32
    %c0_i32_1 = arith.constant 0 : i32
    return %c0_i32, %c0_i32_0 : i32, i32
  }
  func.func @transform_11(%arg0: i32) -> (i32, i32) {
    %c0_i32 = arith.constant 0 : i32
    %c0_i32_0 = arith.constant 0 : i32
    %c0_i32_1 = arith.constant 0 : i32
    return %c0_i32, %c0_i32_0 : i32, i32
  }
  func.func @transform_12(%arg0: i32) -> (i32, i32) {
    %c0_i32 = arith.constant 0 : i32
    %c0_i32_0 = arith.constant 0 : i32
    %c0_i32_1 = arith.constant 0 : i32
    return %c0_i32, %c0_i32_0 : i32, i32
  }
  func.func @transform_13(%arg0: i32) -> (i32, i32) {
    %c0_i32 = arith.constant 0 : i32
    %c0_i32_0 = arith.constant 0 : i32
    %c0_i32_1 = arith.constant 0 : i32
    return %c0_i32, %c0_i32_0 : i32, i32
  }
  func.func @transform_14(%arg0: i32) -> (i32, i32) {
    %c0_i32 = arith.constant 0 : i32
    %c0_i32_0 = arith.constant 0 : i32
    %c0_i32_1 = arith.constant 0 : i32
    return %c0_i32, %c0_i32_0 : i32, i32
  }
  func.func @transform_15(%arg0: i32) -> (i32, i32) {
    %c0_i32 = arith.constant 0 : i32
    %c0_i32_0 = arith.constant 0 : i32
    %c0_i32_1 = arith.constant 0 : i32
    return %c0_i32, %c0_i32_0 : i32, i32
  }
  func.func @transform_16(%arg0: i32) -> (i32, i32) {
    %c0_i32 = arith.constant 0 : i32
    %c0_i32_0 = arith.constant 0 : i32
    %c0_i32_1 = arith.constant 0 : i32
    return %c0_i32, %c0_i32_0 : i32, i32
  }
  func.func @transform_17(%arg0: i32) -> (i32, i32) {
    %c0_i32 = arith.constant 0 : i32
    %c0_i32_0 = arith.constant 0 : i32
    %c0_i32_1 = arith.constant 0 : i32
    return %c0_i32, %c0_i32_0 : i32, i32
  }
  func.func @transform_18(%arg0: i32) -> (i32, i32) {
    %c0_i32 = arith.constant 0 : i32
    %c0_i32_0 = arith.constant 0 : i32
    %c0_i32_1 = arith.constant 0 : i32
    return %c0_i32, %c0_i32_0 : i32, i32
  }
  func.func @transform_19(%arg0: i32) -> (i32, i32) {
    %c0_i32 = arith.constant 0 : i32
    %c0_i32_0 = arith.constant 0 : i32
    %c0_i32_1 = arith.constant 0 : i32
    return %c0_i32, %c0_i32_0 : i32, i32
  }
  func.func @transform_20(%arg0: i32) -> (i32, i32) {
    %c0_i32 = arith.constant 0 : i32
    %c0_i32_0 = arith.constant 0 : i32
    %c0_i32_1 = arith.constant 0 : i32
    return %c0_i32, %c0_i32_0 : i32, i32
  }
  func.func @transform_21(%arg0: i32) -> (i32, i32) {
    %c0_i32 = arith.constant 0 : i32
    %c0_i32_0 = arith.constant 0 : i32
    %c0_i32_1 = arith.constant 0 : i32
    return %c0_i32, %c0_i32_0 : i32, i32
  }
  func.func @transform_22(%arg0: i32) -> (i32, i32) {
    %c0_i32 = arith.constant 0 : i32
    %c0_i32_0 = arith.constant 0 : i32
    %c0_i32_1 = arith.constant 0 : i32
    return %c0_i32, %c0_i32_0 : i32, i32
  }
  func.func @transform_23(%arg0: i32) -> (i32, i32) {
    %c0_i32 = arith.constant 0 : i32
    %c0_i32_0 = arith.constant 0 : i32
    %c0_i32_1 = arith.constant 0 : i32
    return %c0_i32, %c0_i32_0 : i32, i32
  }
  func.func @transform_24(%arg0: i32) -> (i32, i32) {
    %c0_i32 = arith.constant 0 : i32
    %c0_i32_0 = arith.constant 0 : i32
    %c0_i32_1 = arith.constant 0 : i32
    return %c0_i32, %c0_i32_0 : i32, i32
  }
  func.func @transform_25(%arg0: i32) -> (i32, i32, i32) {
    %c0_i32 = arith.constant 0 : i32
    %c0_i32_0 = arith.constant 0 : i32
    %c0_i32_1 = arith.constant 0 : i32
    return %arg0, %c0_i32, %c0_i32_0 : i32, i32, i32
  }
}

</mosaic_0001>

<bundles_post_ra>
// kernel: tpu_custom_call.1
= control target key start
LH: loop header
LB: loop body
LE: loop exit
PB: predicated region body
PF: predicated region fallthrough
CT: control target
= control target key end

     0   :  { %s4373_s0 = inlined_call_operand.hbm [shape: f32[2,16,32], index: 0, kind: input, shape index: {}]   ;;  %s4374_s1 = inlined_call_operand.hbm [shape: f32[2,1,16], index: 1, kind: input, shape index: {}]   ;;  %s4375_s2 = inlined_call_operand.hbm [shape: f32[16,32], index: 2, kind: input, shape index: {}]   ;;  %s4376_s3 = inlined_call_operand.hbm [shape: f32[2,1,32], index: 3, kind: input, shape index: {}]   ;;  %s4377_s4 = inlined_call_operand.hbm [shape: f32[2,1,32], index: 4, kind: input, shape index: {}]   ;;  %s4378_s5 = inlined_call_operand.vmem [shape: f32[2,5,32], index: 5, kind: input, shape index: {}]   ;;  %s4379_s6 = inlined_call_operand.hbm [shape: f32[2,1,32], index: 6, kind: input, shape index: {}]   ;;  %s4380_s7 = inlined_call_operand.vmem [shape: bf16[2,32,32], index: 7, kind: input, shape index: {}]   ;;  %s4381_s8 = inlined_call_operand.hbm [shape: f32[2,1,32], index: 8, kind: input, shape index: {}]   ;;  %s4382_s9 = inlined_call_operand.hbm [shape: f32[1,32], index: 9, kind: input, shape index: {}]   ;;  %s4383_s10 = inlined_call_operand.hbm [shape: f32[1,32], index: 10, kind: input, shape index: {}]   ;;  %s4384_s11 = inlined_call_operand.hbm [shape: bf16[32,32], index: 11, kind: input, shape index: {}]   ;;  %s4385_s12 = inlined_call_operand.hbm [shape: f32[1,32], index: 12, kind: input, shape index: {}]   ;;  %s4386_s13 = inlined_call_operand.hbm [shape: bf16[32,32], index: 13, kind: input, shape index: {}]   ;;  %s4387_s14 = inlined_call_operand.hbm [shape: f32[1,32], index: 14, kind: input, shape index: {}]   ;;  %s4388_s15 = inlined_call_operand.hbm [shape: bf16[32,32], index: 15, kind: input, shape index: {}]   ;;  %s4389_s16 = inlined_call_operand.hbm [shape: f32[1,32], index: 16, kind: input, shape index: {}]   ;;  %s4390_s17 = inlined_call_operand.hbm [shape: bf16[32,32], index: 17, kind: input, shape index: {}]   ;;  %s4391_s18 = inlined_call_operand.hbm [shape: f32[1,32], index: 18, kind: input, shape index: {}]   ;;  %s4392_s19 = inlined_call_operand.hbm [shape: f32[1,32], index: 19, kind: input, shape index: {}]   ;;  %s4393_s20 = inlined_call_operand.hbm [shape: f32[1,32], index: 20, kind: input, shape index: {}]   ;;  %s4394_s21 = inlined_call_operand.hbm [shape: bf16[32,32], index: 21, kind: input, shape index: {}]   ;;  %s4395_s22 = inlined_call_operand.hbm [shape: f32[1,32], index: 22, kind: input, shape index: {}]   ;;  %s4396_s23 = inlined_call_operand.vmem [shape: bf16[32,32], index: 23, kind: input, shape index: {}]   ;;  %s4397_s24 = inlined_call_operand.vmem [shape: f32[1,32], index: 24, kind: input, shape index: {}]   ;;  %s4398_s25 = inlined_call_operand.hbm [shape: f32[2,16,32], index: 25, kind: output, shape index: {}]  }
   0x1   :  { %4402 = sst [smem:[#allocation48_spill]] %s4373_s0 }
   0x2   :  { %4403 = sst [smem:[#allocation49_spill]] %s4374_s1 }
   0x3   :  { %4404 = sst [smem:[#allocation50_spill]] %s4375_s2 }
   0x4   :  { %4405 = sst [smem:[#allocation51_spill]] %s4376_s3 }
   0x5   :  { %4406 = sst [smem:[#allocation52_spill]] %s4377_s4 }
   0x6   :  { %4407 = sst [smem:[#allocation53_spill]] %s4378_s5 }
   0x7   :  { %4408 = sst [smem:[#allocation54_spill]] %s4379_s6 }
   0x8   :  { %4409 = sst [smem:[#allocation55_spill]] %s4380_s7 }
   0x9   :  { %4410 = sst [smem:[#allocation56_spill]] %s4381_s8 }
   0xa   :  { %4411 = sst [smem:[#allocation57_spill]] %s4382_s9 }
   0xb   :  { %4412 = sst [smem:[#allocation58_spill]] %s4397_s24 }
   0xc   :  { %4413 = sst [smem:[#allocation59_spill]] %s4398_s25 }
   0xd   :  { %30 = vsyncpa [#allocation3], 0 }
   0xe   :  { %31 = vsyncpa [#allocation6], 0 }
   0xf   :  { %32 = vsyncpa [#allocation9], 0 }
  0x10   :  { %33 = vsyncpa [#allocation12], 0 }
  0x11   :  { %34 = vsyncpa [#allocation15], 0 }
  0x12   :  { %35 = vsyncpa [#allocation18], 0 }
  0x13   :  { %36 = vsyncpa [#allocation21], 0 }
  0x14   :  { %37 = vsyncpa [#allocation24], 0 }
  0x15   :  { %38 = vsyncpa [#allocation27], 0 }
  0x16   :  { %39 = vsyncpa [#allocation30], 0 }
  0x17   :  { %40 = vsyncpa [#allocation33], 0  ;;  %s4414_s6 = sld [smem:[#allocation49_spill]] }
  0x1d   :  { %s59_s30 = sshll.u32 %s4414_s6, 4  ;;  %s60_s30 = int_to_ptr.hbm [resolvable:$true] %s59_s30 }
  0x1e   :  { %41 = vsyncpa [#allocation4], 0  ;;  %s3373_s7 = smov [#allocation5]   ;;  %s4415_s8 = sld [smem:[#allocation51_spill]] }
  0x1f   :  { %s61_s3 = sshll.u32 %s3373_s7, 4  ;;  %s3374_s4 = smov 16   ;;  %s62_s3 = int_to_ptr.vmem [resolvable:$true] %s61_s3 }
  0x20   :  { %s3375_s28 = smov 1   ;;  %s3376_s9 = smov [#allocation8]  }
  0x21   :  { %67 = dma.hbm_to_vmem [thread:$0]  %s60_s30, 32, %s62_s3, [#allocation6], %s3374_s4, %s3374_s4, %s3375_s28  }
  0x22   :  { %s87_s5 = sshll.u32 %s3376_s9, 4  ;;  %s4416_s2 = sld [smem:[#allocation54_spill]]  ;;  %s88_s5 = int_to_ptr.vmem [resolvable:$true] %s87_s5 }
  0x23   :  { %s4417_s1 = sld [smem:[#allocation57_spill]]  ;;  %s3377_s25 = smov [#allocation11]  }
  0x24   :  { %s85_s27 = sshll.u32 %s4415_s8, 4  ;;  %s115_s24 = sshll.u32 %s3377_s25, 4  ;;  %s86_s27 = int_to_ptr.hbm [resolvable:$true] %s85_s27  ;;  %s116_s24 = int_to_ptr.vmem [resolvable:$true] %s115_s24 }
  0x25   :  { %93 = dma.hbm_to_vmem [thread:$0]  %s86_s27, 32, %s88_s5, [#allocation9], %s3374_s4, %s3374_s4, %s3375_s28  }
  0x26   :  { %s3378_s30 = smov [#allocation14]   ;;  %s163_s29 = sshll.u32 %s4384_s11, 4  ;;  %s164_s29 = int_to_ptr.hbm [resolvable:$true] %s163_s29 }
  0x27   :  { %s144_s3 = sshll.u32 %s3378_s30, 4  ;;  %s3379_s27 = smov [#allocation17]   ;;  %s145_s3 = int_to_ptr.vmem [resolvable:$true] %s144_s3 }
  0x28   :  { %s113_s6 = sshll.u32 %s4416_s2, 4  ;;  %s165_s5 = sshll.u32 %s3379_s27, 4  ;;  %s114_s6 = int_to_ptr.hbm [resolvable:$true] %s113_s6  ;;  %s166_s5 = int_to_ptr.vmem [resolvable:$true] %s165_s5 }
  0x29   :  { %s142_s8 = sshll.u32 %s4417_s1, 4  ;;  %s187_s7 = sshll.u32 %s4386_s13, 4  ;;  %s143_s8 = int_to_ptr.hbm [resolvable:$true] %s142_s8  ;;  %s188_s7 = int_to_ptr.hbm [resolvable:$true] %s187_s7 }
  0x2a   :  { %121 = dma.hbm_to_vmem [thread:$0]  %s114_s6, 32, %s116_s24, [#allocation12], %s3374_s4, %s3374_s4, %s3375_s28  }
  0x2b   :  { %147 = dma.hbm_to_vmem [thread:$0]  %s143_s8, 16, %s145_s3, [#allocation15]  }
  0x2c   :  { %s3380_s26 = smov 64   ;;  %s3381_s1 = smov 4  }
  0x2d   :  { %171 = dma.hbm_to_vmem [thread:$0]  %s164_s29, 256, %s166_s5, [#allocation18], %s3380_s26, %s3380_s26, %s3381_s1  }
  0x2e   :  { %s3382_s24 = smov [#allocation20]   ;;  %s211_s8 = sshll.u32 %s4388_s15, 4  ;;  %s212_s8 = int_to_ptr.hbm [resolvable:$true] %s211_s8 }
  0x2f   :  { %s189_s6 = sshll.u32 %s3382_s24, 4  ;;  %s235_s9 = sshll.u32 %s4390_s17, 4  ;;  %s190_s6 = int_to_ptr.vmem [resolvable:$true] %s189_s6  ;;  %s236_s9 = int_to_ptr.hbm [resolvable:$true] %s235_s9 }
  0x30   :  { %195 = dma.hbm_to_vmem [thread:$0]  %s188_s7, 256, %s190_s6, [#allocation21], %s3380_s26, %s3380_s26, %s3381_s1  }
  0x31   :  { %s3383_s0 = smov [#allocation23]   ;;  %s3384_s29 = smov [#allocation26]  }
  0x32   :  { %s213_s27 = sshll.u32 %s3383_s0, 4  ;;  %s237_s15 = sshll.u32 %s3384_s29, 4  ;;  %s214_s27 = int_to_ptr.vmem [resolvable:$true] %s213_s27  ;;  %s238_s15 = int_to_ptr.vmem [resolvable:$true] %s237_s15 }
  0x33   :  { %219 = dma.hbm_to_vmem [thread:$0]  %s212_s8, 256, %s214_s27, [#allocation24], %s3380_s26, %s3380_s26, %s3381_s1  }
  0x34   :  { %s260_s25 = sshll.u32 %s4392_s19, 4  ;;  %s281_s24 = sshll.u32 %s4394_s21, 4  ;;  %s261_s25 = int_to_ptr.hbm [resolvable:$true] %s260_s25  ;;  %s282_s24 = int_to_ptr.hbm [resolvable:$true] %s281_s24 }
  0x35   :  { %243 = dma.hbm_to_vmem [thread:$0]  %s236_s9, 256, %s238_s15, [#allocation27], %s3380_s26, %s3380_s26, %s3381_s1  }
  0x36   :  { %s3385_s6 = smov [#allocation29]   ;;  %s3386_s30 = smov [#allocation32]  }
  0x37   :  { %s262_s11 = sshll.u32 %s3385_s6, 4  ;;  %s283_s8 = sshll.u32 %s3386_s30, 4  ;;  %s263_s11 = int_to_ptr.vmem [resolvable:$true] %s262_s11  ;;  %s284_s8 = int_to_ptr.vmem [resolvable:$true] %s283_s8 }
  0x38   :  { %265 = dma.hbm_to_vmem [thread:$0]  %s261_s25, 16, %s263_s11, [#allocation30]  }
  0x39   :  { %s4418_s19 = sld [smem:[#allocation48_spill]]  ;;  %s3387_s9 = smov [#allocation2]  }
  0x3a   :  { %289 = dma.hbm_to_vmem [thread:$0]  %s282_s24, 256, %s284_s8, [#allocation33], %s3380_s26, %s3380_s26, %s3381_s1  }
  0x3b   :  { %s48_s27 = sshll.u32 %s3387_s9, 4  ;;  %s4419_s15 = sld [smem:[#allocation50_spill]]  ;;  %s49_s27 = int_to_ptr.vmem [resolvable:$true] %s48_s27 }
  0x3c   :  { %s3388_s2 = smov 128   ;;  %s3389_s25 = smov 8  }
  0x3d   :  { %s3390_s17 = smov [#allocation7]   ;;  %s4420_s30 = sld [smem:[#allocation52_spill]] }
  0x3e   :  { %s74_s7 = sshll.u32 %s3390_s17, 4  ;;  %s4421_s8 = sld [smem:[#allocation56_spill]]  ;;  %s75_s7 = int_to_ptr.vmem [resolvable:$true] %s74_s7 }
  0x3f   :  { %s46_s0 = sshll.u32 %s4418_s19, 4  ;;  %s3391_s3 = smov [#allocation10]   ;;  %s47_s0 = int_to_ptr.hbm [resolvable:$true] %s46_s0 }
  0x40   :  { %54 = dma.hbm_to_vmem [thread:$0]  %s47_s0, 512, %s49_s27, [#allocation3], %s3388_s2, %s3388_s2, %s3389_s25  }
  0x41   :  { %s72_s5 = sshll.u32 %s4419_s15, 4  ;;  %s100_s19 = sshll.u32 %s3391_s3, 4  ;;  %s73_s5 = int_to_ptr.hbm [resolvable:$true] %s72_s5  ;;  %s101_s19 = int_to_ptr.vmem [resolvable:$true] %s100_s19 }
  0x42   :  { %80 = dma.hbm_to_vmem [thread:$0]  %s73_s5, 256, %s75_s7, [#allocation6], %s3388_s2, %s3388_s2, %s3389_s25  }
  0x43   :  { %s98_s26 = sshll.u32 %s4420_s30, 4  ;;  %s3392_s0 = smov [#allocation13]   ;;  %s99_s26 = int_to_ptr.hbm [resolvable:$true] %s98_s26 }
  0x44   :  { %s128_s13 = sshll.u32 %s4421_s8, 4  ;;  %s130_s9 = sshll.u32 %s3392_s0, 4  ;;  %s129_s13 = int_to_ptr.hbm [resolvable:$true] %s128_s13  ;;  %s131_s9 = int_to_ptr.vmem [resolvable:$true] %s130_s9 }
  0x45   :  { %106 = dma.hbm_to_vmem [thread:$0]  %s99_s26, 32, %s101_s19, [#allocation9], %s3374_s4, %s3374_s4, %s3375_s28  }
  0x46   :  { %s153_s29 = sshll.u32 %s4383_s10, 4  ;;  %s177_s17 = sshll.u32 %s4385_s12, 4  ;;  %s154_s29 = int_to_ptr.hbm [resolvable:$true] %s153_s29  ;;  %s178_s17 = int_to_ptr.hbm [resolvable:$true] %s177_s17 }
  0x47   :  { %136 = dma.hbm_to_vmem [thread:$0]  %s129_s13, 32, %s131_s9, [#allocation12], %s3374_s4, %s3374_s4, %s3375_s28  }
  0x48   :  { %s3393_s7 = smov [#allocation16]   ;;  %s3394_s11 = smov [#allocation19]  }
  0x49   :  { %s155_s6 = sshll.u32 %s3393_s7, 4  ;;  %s179_s30 = sshll.u32 %s3394_s11, 4  ;;  %s156_s6 = int_to_ptr.vmem [resolvable:$true] %s155_s6  ;;  %s180_s30 = int_to_ptr.vmem [resolvable:$true] %s179_s30 }
  0x4a   :  { %158 = dma.hbm_to_vmem [thread:$0]  %s154_s29, 16, %s156_s6, [#allocation15]  }
  0x4b   :  { %s201_s10 = sshll.u32 %s4387_s14, 4  ;;  %s225_s8 = sshll.u32 %s4389_s16, 4  ;;  %s202_s10 = int_to_ptr.hbm [resolvable:$true] %s201_s10  ;;  %s226_s8 = int_to_ptr.hbm [resolvable:$true] %s225_s8 }
  0x4c   :  { %182 = dma.hbm_to_vmem [thread:$0]  %s178_s17, 16, %s180_s30, [#allocation18]  }
  0x4d   :  { %s3395_s13 = smov [#allocation22]   ;;  %s3396_s3 = smov [#allocation25]  }
  0x4e   :  { %s203_s12 = sshll.u32 %s3395_s13, 4  ;;  %s227_s19 = sshll.u32 %s3396_s3, 4  ;;  %s204_s12 = int_to_ptr.vmem [resolvable:$true] %s203_s12  ;;  %s228_s19 = int_to_ptr.vmem [resolvable:$true] %s227_s19 }
  0x4f   :  { %206 = dma.hbm_to_vmem [thread:$0]  %s202_s10, 16, %s204_s12, [#allocation21]  }
  0x50   :  { %s249_s27 = sshll.u32 %s4391_s18, 4  ;;  %s271_s29 = sshll.u32 %s4393_s20, 4  ;;  %s250_s27 = int_to_ptr.hbm [resolvable:$true] %s249_s27  ;;  %s272_s29 = int_to_ptr.hbm [resolvable:$true] %s271_s29 }
  0x51   :  { %230 = dma.hbm_to_vmem [thread:$0]  %s226_s8, 16, %s228_s19, [#allocation24]  }
  0x52   :  { %s3397_s15 = smov [#allocation28]   ;;  %s3398_s5 = smov [#allocation31]  }
  0x53   :  { %s251_s16 = sshll.u32 %s3397_s15, 4  ;;  %s273_s17 = sshll.u32 %s3398_s5, 4  ;;  %s252_s16 = int_to_ptr.vmem [resolvable:$true] %s251_s16  ;;  %s274_s17 = int_to_ptr.vmem [resolvable:$true] %s273_s17 }
  0x54   :  { %254 = dma.hbm_to_vmem [thread:$0]  %s250_s27, 16, %s252_s16, [#allocation27]  }
  0x55   :  { %s295_s11 = sshll.u32 %s4395_s22, 4  ;;  %s3399_s18 = smov [#allocation34]   ;;  %s296_s11 = int_to_ptr.hbm [resolvable:$true] %s295_s11 }
  0x56   :  { %276 = dma.hbm_to_vmem [thread:$0]  %s272_s29, 16, %s274_s17, [#allocation30]  }
  0x57   :  { %s297_s30 = sshll.u32 %s3399_s18, 4  ;;  %s298_s30 = int_to_ptr.vmem [resolvable:$true] %s297_s30 }
  0x58   :  { %300 = dma.hbm_to_vmem [thread:$0]  %s296_s11, 16, %s298_s30, [#allocation33]  }
  0x59   :  { %3349 = dma.done.wait [#allocation3], 512  }
  0x5a   :  { %3350 = vsyncadd [#allocation3], 4294966784 }
  0x5b   :  { %3351 = dma.done.wait [#allocation6], 288  }
  0x5c   :  { %3352 = vsyncadd [#allocation6], 4294967008 }
  0x5d   :  { %3353 = dma.done.wait [#allocation9], 64  }
  0x5e   :  { %3354 = vsyncadd [#allocation9], 4294967232 }
  0x5f   :  { %3355 = dma.done.wait [#allocation12], 64  }
  0x60   :  { %3356 = vsyncadd [#allocation12], 4294967232 }
  0x61   :  { %3357 = dma.done.wait [#allocation15], 32  }
  0x62   :  { %3358 = vsyncadd [#allocation15], 4294967264 }
  0x63   :  { %3359 = dma.done.wait [#allocation18], 272  }
  0x64   :  { %3360 = vsyncadd [#allocation18], 4294967024 }
  0x65   :  { %3361 = dma.done.wait [#allocation21], 272  }
  0x66   :  { %3362 = vsyncadd [#allocation21], 4294967024 }
  0x67   :  { %3363 = dma.done.wait [#allocation24], 272  }
  0x68   :  { %3364 = vsyncadd [#allocation24], 4294967024 }
  0x69   :  { %3365 = dma.done.wait [#allocation27], 272  }
  0x6a   :  { %3366 = vsyncadd [#allocation27], 4294967024 }
  0x6b   :  { %3367 = dma.done.wait [#allocation30], 32  }
  0x6c   :  { %3368 = vsyncadd [#allocation30], 4294967264 }
  0x6d   :  { %3369 = dma.done.wait [#allocation33], 272  }
  0x6e   :  { %3370 = vsyncadd [#allocation33], 4294967024  ;;  %v391_v0 = vld [vmem:[#allocation2 + $0x8] sm:$0xff]  ;;  %vm4401_vm0 = vcmask 261120   ;;  %v390_v2 = vld [vmem:[#allocation2] sm:$0xff]  ;;  %v3400_v14 = vmov 32.0   ;;  %v400_v62 = vlaneseq }
  0x6f   :  { %v395_v1 = vld [vmem:[#allocation7 + $0x8] sm:$0xff]  ;;  %v394_v4 = vld [vmem:[#allocation7] sm:$0xff]  ;;  %v393_v8 = vld [vmem:[#allocation2 + $0x18] sm:$0xff]  ;;  %2723 = vrcp.f32 %v3400_v14  ;;  %s4422_s26 = sld [smem:[#allocation55_spill]]  ;;  %s3401_s27 = smov 112  }
  0x70   :  { %v3635_v3 = vadd.f32 %v395_v1, %v391_v0  ;;  %v392_v5 = vld [vmem:[#allocation2 + $0x10] sm:$0xff]  ;;  %v3637_v6 = vadd.f32 %v394_v4, %v390_v2  ;;  %v3645_v11 = vadd.f32 %v395_v1, %v393_v8  ;;  %v3691_v8 = vshrl.u32 %v400_v62, 7  ;;  %s4423_s8 = sld [smem:[#allocation53_spill]]  ;;  %s3402_s14 = smov 120  }
  0x71   :  { %v3643_v10 = vadd.f32 %v394_v4, %v392_v5  ;;  %s3403_s21 = smov 104   ;;  %s3404_s29 = smov 24  }
  0x72   :  { %v409_v7 = vsel %vm4401_vm0, %v3635_v3, 0.0  ;;  %v406_v9 = vsel %vm4401_vm0, %v3637_v6, 0.0  ;;  %v415_v13 = vsel %vm4401_vm0, %v3645_v11, 0.0  ;;  %vm520_vm8 = vcmp.lt.s32.totalorder %v3691_v8, 2  ;;  %s4452_s7 = sld [smem:[#allocation58_spill]]  ;;  %s3405_s6 = smov [#allocation35]  }
  0x73   :  { %410 = vadd.xlane.f32.xlu0 %v409_v7  ;;  %407 = vadd.xlane.f32.xlu1 %v406_v9  ;;  %v412_v12 = vsel %vm4401_vm0, %v3643_v10, 0.0  ;;  %v2705_v9 = vld [vmem:[#allocation8] ss:$0 sm:$0xff]  ;;  %vm552_vm9 = vcmp.lt.s32.totalorder %v3691_v8, 1  ;;  %vm593_vm12 = vcmp.lt.s32.totalorder %v3691_v8, 7  ;;  %s2408_s11 = sshll.u32 %s3405_s6, 4  ;;  %s2409_s11 = int_to_ptr.vmem [resolvable:$true] %s2408_s11 }
  0x74   :  { %s4456_s20 = sld [smem:[#allocation59_spill]] }
  0x75   :  { %v2724_v15 = vpop.eup %2723  ;;  %v2535_v47 = vld [vmem:[%s4422_s26 + $0x8] sm:$0xff]  ;;  %v2534_v48 = vld [vmem:[%s4422_s26] sm:$0xff] }
  0x76   :  { %v419_v16 = vmul.f32 32.0, %v2724_v15  ;;  %vm423_vm1 = vweird.f32 %v2724_v15  ;;  %695 = vmatpush.bf16.msra.mxu0 %v2535_v47  ;;  %2550 = vmatpush.bf16.msra.mxu1 %v2535_v47  ;;  %v515_v14 = vld [vmem:[%s4423_s8] sm:$0x1f] }
  0x78   :  { %v420_v17 = vsub.f32 1.0, %v419_v16 }
  0x7a   :  { %v421_v18 = vmul.f32 %v2724_v15, %v420_v17  ;;  %696 = vmatpush.bf16.msra.mxu0 %v2534_v48  ;;  %2551 = vmatpush.bf16.msra.mxu1 %v2534_v48  ;;  %v2706_v17 = vld [vmem:[#allocation10] ss:$0 sm:$0xff]  ;;  %s2410_s22 = sshll.u32 %s4456_s20, 4  ;;  %s2411_s22 = int_to_ptr.hbm [resolvable:$true] %s2410_s22 }
  0x7b   :  { %413 = vadd.xlane.f32.xlu0 %v412_v12  ;;  %416 = vadd.xlane.f32.xlu1 %v415_v13 }
  0x7c   :  { %v422_v19 = vadd.f32 %v2724_v15, %v421_v18 }
  0x7e   :  { %v3651_v20 = vsel %vm423_vm1, %v2724_v15, %v422_v19 }
  0xe6   :  { %v411_v21 = vpop.xlane.xlu0 %410  ;;  %v408_v23 = vpop.xlane.xlu1 %407 }
  0xe7   :  { %v426_v22 = vmul.f32 %v3651_v20, %v411_v21  ;;  %v425_v24 = vmul.f32 %v3651_v20, %v408_v23 }
  0xe9   :  { %v3656_v25 = vsub.f32 %v3635_v3, %v426_v22  ;;  %v3659_v26 = vsub.f32 %v3637_v6, %v425_v24  ;;  %v3699_v24 = vperm.slane %v515_v14, 2 }
  0xeb   :  { %v434_v27 = vmul.f32 %v3656_v25, %v3656_v25  ;;  %v433_v28 = vmul.f32 %v3659_v26, %v3659_v26 }
  0xed   :  { %v440_v29 = vsel %vm4401_vm0, %v434_v27, 0.0  ;;  %v437_v31 = vsel %vm4401_vm0, %v433_v28, 0.0 }
  0xee   :  { %441 = vadd.xlane.f32.xlu2 %v440_v29  ;;  %v414_v30 = vpop.xlane.xlu0 %413  ;;  %438 = vadd.xlane.f32.xlu0 %v437_v31  ;;  %v417_v33 = vpop.xlane.xlu1 %416  ;;  %v3701_v29 = vperm.slane %v515_v14, 0 }
  0xef   :  { %v427_v32 = vmul.f32 %v3651_v20, %v414_v30  ;;  %v428_v34 = vmul.f32 %v3651_v20, %v417_v33 }
  0xf1   :  { %v3670_v35 = vsub.f32 %v3643_v10, %v427_v32  ;;  %v3673_v36 = vsub.f32 %v3645_v11, %v428_v34  ;;  %v3704_v32 = vperm.slane %v515_v14, 1 }
  0xf3   :  { %v435_v37 = vmul.f32 %v3670_v35, %v3670_v35  ;;  %v436_v38 = vmul.f32 %v3673_v36, %v3673_v36 }
  0xf5   :  { %v443_v39 = vsel %vm4401_vm0, %v435_v37, 0.0  ;;  %v446_v40 = vsel %vm4401_vm0, %v436_v38, 0.0  ;;  %v3711_v37 = vperm.slane %v515_v14, 3 }
  0xf6   :  { %444 = vadd.xlane.f32.xlu2 %v443_v39  ;;  %447 = vadd.xlane.f32.xlu1 %v446_v40 }
 0x161   :  { %v442_v41 = vpop.xlane.xlu2 %441  ;;  %v439_v43 = vpop.xlane.xlu0 %438 }
 0x162   :  { %v450_v42 = vmul.f32 %v442_v41, %v3651_v20  ;;  %v449_v44 = vmul.f32 %v439_v43, %v3651_v20 }
 0x164   :  { %v454_v45 = vadd.f32 1e-05, %v450_v42  ;;  %v453_v46 = vadd.f32 1e-05, %v449_v44 }
 0x166   :  { %2725 = vrsqrt.f32 %v454_v45  ;;  %vm473_vm4 = vweird.f32 %v454_v45  ;;  %vm463_vm6 = vweird.f32 %v453_v46 }
 0x167   :  { %2727 = vrsqrt.f32 %v453_v46 }
 0x169   :  { %v445_v49 = vpop.xlane.xlu2 %444  ;;  %v448_v51 = vpop.xlane.xlu1 %447 }
 0x16a   :  { %v451_v50 = vmul.f32 %v445_v49, %v3651_v20  ;;  %v452_v52 = vmul.f32 %v448_v51, %v3651_v20  ;;  %v3723_v49 = vadd.s32 8, %v3691_v8 }
 0x16c   :  { %v2726_v53 = vpop.eup %2725  ;;  %v455_v54 = vadd.f32 1e-05, %v451_v50  ;;  %v456_v57 = vadd.f32 1e-05, %v452_v52 }
 0x16d   :  { %v2728_v55 = vpop.eup %2727  ;;  %v468_v56 = vmul.f32 %v2726_v53, %v454_v45  ;;  %vm474_vm2 = vweird.f32 %v2726_v53 }
 0x16e   :  { %v458_v58 = vmul.f32 %v2728_v55, %v453_v46  ;;  %2729 = vrsqrt.f32 %v455_v54  ;;  %vm464_vm3 = vweird.f32 %v2728_v55  ;;  %vm475_vm5 = vmor %vm473_vm4, %vm474_vm2  ;;  %vm483_vm13 = vweird.f32 %v455_v54 }
 0x16f   :  { %v469_v59 = vmul.f32 %v2726_v53, %v468_v56  ;;  %2731 = vrsqrt.f32 %v456_v57  ;;  %vm465_vm7 = vmor %vm463_vm6, %vm464_vm3  ;;  %vm493_vm15 = vweird.f32 %v456_v57  ;;  %vm625_vm2 = vcmp.lt.s32.totalorder %v3691_v8, 6 }
 0x170   :  { %v459_v60 = vmul.f32 %v2728_v55, %v458_v58  ;;  %vm525_vm3 = vcmp.ge.s32.totalorder %v3691_v8, 2  ;;  %v3734_v56 = vperm.slane %v515_v14, 4  ;;  %vm557_vm4 = vcmp.ge.s32.totalorder %v3691_v8, 1 }
 0x171   :  { %v470_v61 = vmul.f32 0.5, %v469_v59  ;;  %vm633_vm6 = vcmp.lt.s32.totalorder %v3723_v49, 14 }
 0x172   :  { %v460_v63 = vmul.f32 0.5, %v459_v60 }
 0x173   :  { %v471_v0 = vsub.f32 1.5, %v470_v61 }
 0x174   :  { %v2730_v1 = vpop.eup %2729  ;;  %v461_v2 = vsub.f32 1.5, %v460_v63 }
 0x175   :  { %v2732_v4 = vpop.eup %2731  ;;  %v472_v5 = vmul.f32 %v2726_v53, %v471_v0  ;;  %v478_v7 = vmul.f32 %v2730_v1, %v455_v54  ;;  %vm484_vm10 = vweird.f32 %v2730_v1 }
 0x176   :  { %v462_v12 = vmul.f32 %v2728_v55, %v461_v2  ;;  %v488_v13 = vmul.f32 %v2732_v4, %v456_v57  ;;  %vm494_vm11 = vweird.f32 %v2732_v4  ;;  %vm485_vm14 = vmor %vm483_vm13, %vm484_vm10 }
 0x177   :  { %v476_v15 = vsel %vm475_vm5, %v2726_v53, %v472_v5  ;;  %v479_v16 = vmul.f32 %v2730_v1, %v478_v7  ;;  %vm495_vm1 = vmor %vm493_vm15, %vm494_vm11  ;;  %vm601_vm5 = vcmp.lt.s32.totalorder %v3723_v49, 15 }
 0x178   :  { %v498_v18 = vmul.f32 %v476_v15, %v3656_v25  ;;  %v466_v19 = vsel %vm465_vm7, %v2728_v55, %v462_v12  ;;  %v489_v21 = vmul.f32 %v2732_v4, %v488_v13 }
 0x179   :  { %v497_v22 = vmul.f32 %v466_v19, %v3659_v26  ;;  %v480_v23 = vmul.f32 0.5, %v479_v16 }
 0x17a   :  { %v505_v27 = vmul.f32 %v2705_v9, %v498_v18  ;;  %v490_v28 = vmul.f32 0.5, %v489_v21 }
 0x17b   :  { %v504_v30 = vmul.f32 %v2705_v9, %v497_v22  ;;  %v481_v31 = vsub.f32 1.5, %v480_v23 }
 0x17c   :  { %v3706_v25 = vadd.f32 %v2706_v17, %v505_v27  ;;  %v491_v33 = vsub.f32 1.5, %v490_v28 }
 0x17d   :  { %v3709_v26 = vadd.f32 %v2706_v17, %v504_v30  ;;  %v482_v34 = vmul.f32 %v2730_v1, %v481_v31 }
 0x17e   :  { %v492_v38 = vmul.f32 %v2732_v4, %v491_v33  ;;  %v517_v39 = vrot.slane %v3706_v25, 6  ;;  %v549_v40 = vrot.slane %v3706_v25, 7  ;;  %v590_v47 = vrot.slane %v3706_v25, 1 }
 0x17f   :  { %v486_v41 = vsel %vm485_vm14, %v2730_v1, %v482_v34  ;;  %v516_v42 = vrot.slane %v3709_v26, 6  ;;  %v548_v43 = vrot.slane %v3709_v26, 7  ;;  %v589_v46 = vrot.slane %v3709_v26, 1 }
 0x180   :  { %v499_v44 = vmul.f32 %v486_v41, %v3670_v35  ;;  %v496_v45 = vsel %vm495_vm1, %v2732_v4, %v492_v38  ;;  %v621_v54 = vrot.slane %v3709_v26, 2  ;;  %v582_v61 = vmul.f32 %v3699_v24, %v3706_v25 }
 0x181   :  { %v500_v48 = vmul.f32 %v496_v45, %v3673_v36  ;;  %v523_v50 = vsel %vm520_vm8, %v516_v42, %v517_v39  ;;  %v555_v51 = vsel %vm552_vm9, %v548_v43, %v549_v40  ;;  %v622_v36 = vrot.slane %v3706_v25, 2 }
 0x182   :  { %v506_v52 = vmul.f32 %v2705_v9, %v499_v44  ;;  %v541_v53 = vmul.f32 %v3701_v29, %v523_v50  ;;  %v573_v35 = vmul.f32 %v3704_v32, %v555_v51  ;;  %v596_v59 = vsel %vm593_vm12, %v589_v46, %v590_v47 }
 0x183   :  { %v507_v55 = vmul.f32 %v2705_v9, %v500_v48  ;;  %v581_v62 = vmul.f32 %v3699_v24, %v3709_v26  ;;  %v628_v1 = vsel %vm625_vm2, %v621_v54, %v622_v36  ;;  %v613_v5 = vmul.f32 %v3711_v37, %v596_v59 }
 0x184   :  { %v513_v57 = vadd.f32 %v2706_v17, %v506_v52  ;;  %v577_v58 = vadd.f32 %v573_v35, %v541_v53  ;;  %v645_v18 = vmul.f32 %v3734_v56, %v628_v1 }
 0x185   :  { %v514_v60 = vadd.f32 %v2706_v17, %v507_v55 }
 0x186   :  { %v591_v63 = vrot.slane %v513_v57, 1  ;;  %v623_v0 = vrot.slane %v513_v57, 2  ;;  %v518_v7 = vrot.slane %v513_v57, 6  ;;  %v586_v9 = vadd.f32 %v582_v61, %v577_v58  ;;  %v2707_v58 = vld [vmem:[#allocation11] ss:$0 sm:$0xff] }
 0x187   :  { %v519_v2 = vrot.slane %v514_v60, 6  ;;  %v551_v4 = vrot.slane %v514_v60, 7  ;;  %v550_v14 = vrot.slane %v513_v57, 7  ;;  %v624_v48 = vrot.slane %v514_v60, 2 }
 0x188   :  { %v595_v12 = vsel %vm593_vm12, %v590_v47, %v591_v63  ;;  %v627_v13 = vsel %vm625_vm2, %v622_v36, %v623_v0  ;;  %v522_v31 = vsel %vm520_vm8, %v517_v39, %v518_v7  ;;  %v592_v47 = vrot.slane %v514_v60, 1 }
 0x189   :  { %v524_v15 = vsel %vm520_vm8, %v519_v2, %v516_v42  ;;  %v556_v16 = vsel %vm552_vm9, %v551_v4, %v548_v43  ;;  %v609_v17 = vsel %vm601_vm5, %v595_v12, 0.0  ;;  %v641_v23 = vsel %vm633_vm6, %v627_v13, 0.0 }
 0x18a   :  { %v535_v19 = vsel %vm525_vm3, %v524_v15, 0.0  ;;  %v567_v21 = vsel %vm557_vm4, %v556_v16, 0.0  ;;  %v614_v22 = vmul.f32 %v3711_v37, %v609_v17  ;;  %v521_v30 = vsel %vm520_vm8, %v518_v7, %v519_v2 }
 0x18b   :  { %v540_v27 = vmul.f32 %v3701_v29, %v535_v19  ;;  %v572_v28 = vmul.f32 %v3704_v32, %v567_v21  ;;  %v537_v33 = vsel %vm525_vm3, %v522_v31, 0.0  ;;  %v543_v34 = vmul.f32 %v3701_v29, %v521_v30 }
 0x18c   :  { %v618_v25 = vadd.f32 %v614_v22, %v586_v9  ;;  %v553_v38 = vsel %vm552_vm9, %v550_v14, %v551_v4  ;;  %v542_v42 = vmul.f32 %v3701_v29, %v537_v33  ;;  %v554_v43 = vsel %vm552_vm9, %v549_v40, %v550_v14 }
 0x18d   :  { %v576_v41 = vadd.f32 %v572_v28, %v540_v27  ;;  %v575_v44 = vmul.f32 %v3704_v32, %v553_v38  ;;  %v646_v45 = vmul.f32 %v3734_v56, %v641_v23  ;;  %v569_v39 = vsel %vm557_vm4, %v554_v43, 0.0 }
 0x18e   :  { %v574_v51 = vmul.f32 %v3704_v32, %v569_v39  ;;  %v584_v53 = vmul.f32 %v3699_v24, %v514_v60  ;;  %v583_v29 = vmul.f32 %v3699_v24, %v513_v57  ;;  %v594_v40 = vsel %vm593_vm12, %v591_v63, %v592_v47 }
 0x18f   :  { %v585_v50 = vadd.f32 %v581_v62, %v576_v41  ;;  %v579_v52 = vadd.f32 %v575_v44, %v543_v34  ;;  %v650_v35 = vadd.f32 %v646_v45, %v618_v25  ;;  %v597_v55 = vsel %vm593_vm12, %v592_v47, %v589_v46 }
 0x190   :  { %v578_v59 = vadd.f32 %v574_v51, %v542_v42  ;;  %v611_v32 = vsel %vm601_vm5, %v597_v55, 0.0  ;;  %v626_v24 = vsel %vm625_vm2, %v623_v0, %v624_v48  ;;  %v629_v57 = vsel %vm625_vm2, %v624_v48, %v621_v54 }
 0x191   :  { %v617_v36 = vadd.f32 %v613_v5, %v585_v50  ;;  %v588_v61 = vadd.f32 %v584_v53, %v579_v52  ;;  %v616_v60 = vmul.f32 %v3711_v37, %v611_v32  ;;  %v615_v46 = vmul.f32 %v3711_v37, %v594_v40  ;;  %v2708_v37 = vld [vmem:[#allocation13] ss:$0 sm:$0xff] }
 0x192   :  { %v587_v63 = vadd.f32 %v583_v29, %v578_v59  ;;  %v643_v1 = vsel %vm633_vm6, %v629_v57, 0.0  ;;  %v658_v7 = vadd.f32 %v2707_v58, %v650_v35  ;;  %v647_v0 = vmul.f32 %v3734_v56, %v626_v24  ;;  %v2537_v57 = vld [vmem:[%s4422_s26 + $0x18] sm:$0xff] }
 0x193   :  { %v649_v62 = vadd.f32 %v645_v18, %v617_v36  ;;  %v620_v2 = vadd.f32 %v616_v60, %v588_v61  ;;  %v648_v4 = vmul.f32 %v3734_v56, %v643_v1  ;;  %962 = vmatpush.bf16.msrb.mxu1 %v2537_v57 }
 0x194   :  { %v619_v9 = vadd.f32 %v615_v46, %v587_v63 }
 0x195   :  { %v657_v5 = vadd.f32 %v2707_v58, %v649_v62  ;;  %v652_v12 = vadd.f32 %v648_v4, %v620_v2  ;;  %v2536_v2 = vld [vmem:[%s4422_s26 + $0x10] sm:$0xff] }
 0x196   :  { %v651_v13 = vadd.f32 %v647_v0, %v619_v9 }
 0x197   :  { %v665_v26 = vpack.c.bf16 %v658_v7, %v657_v5  ;;  %v660_v14 = vadd.f32 %v2707_v58, %v652_v12  ;;  %963 = vmatpush.bf16.msrb.mxu1 %v2536_v2 }
 0x198   :  { %v659_v54 = vadd.f32 %v2707_v58, %v651_v13 }
 0x199   :  { %2441 = vmatmul.msk.bf16.vlgmr.msra.gmra.mxu0 %vm4401_vm0, %v665_v26 }
 0x19a   :  { %v666_v15 = vpack.c.bf16 %v660_v14, %v659_v54 }
 0x19c   :  { %2442 = vmatmul.msk.bf16.vlgmr.msra.gmra.mxu1 %vm4401_vm0, %v666_v15 }
 0x216   :  { %v698_v16 = vpop.f32.mrf.mxu0 }
 0x217   :  { %v699_v17 = vadd.f32 %v2708_v37, %v698_v16 }
 0x219   :  { %v708_v18 = vmax.f32 %v699_v17, 0.0  ;;  %v703_v19 = vpop.f32.mrf.mxu1 }
 0x21a   :  { %v704_v22 = vadd.f32 %v2708_v37, %v703_v19 }
 0x21b   :  { %v3814_v21 = vadd.f32 %v708_v18, %v3637_v6 }
 0x21c   :  { %v710_v56 = vmax.f32 %v704_v22, 0.0 }
 0x21d   :  { %v720_v23 = vsel %vm4401_vm0, %v3814_v21, 0.0 }
 0x21e   :  { %v700_v27 = vpop.f32.mrf.mxu0  ;;  %721 = vadd.xlane.f32.xlu2 %v720_v23  ;;  %v3819_v30 = vadd.f32 %v710_v56, %v3643_v10 }
 0x21f   :  { %v701_v28 = vadd.f32 %v2708_v37, %v700_v27  ;;  %v2709_v27 = vld [vmem:[#allocation8 + $0x1] ss:$0 sm:$0xff] }
 0x220   :  { %v726_v41 = vsel %vm4401_vm0, %v3819_v30, 0.0 }
 0x221   :  { %v709_v31 = vmax.f32 %v701_v28, 0.0  ;;  %v705_v25 = vpop.f32.mrf.mxu1 }
 0x222   :  { %v706_v34 = vadd.f32 %v2708_v37, %v705_v25 }
 0x223   :  { %v3822_v33 = vadd.f32 %v709_v31, %v3635_v3 }
 0x224   :  { %v711_v38 = vmax.f32 %v706_v34, 0.0 }
 0x225   :  { %v723_v6 = vsel %vm4401_vm0, %v3822_v33, 0.0 }
 0x226   :  { %724 = vadd.xlane.f32.xlu1 %v723_v6  ;;  %727 = vadd.xlane.f32.xlu2 %v726_v41  ;;  %v3829_v42 = vadd.f32 %v711_v38, %v3645_v11 }
 0x228   :  { %v729_v10 = vsel %vm4401_vm0, %v3829_v42, 0.0 }
 0x229   :  { %730 = vadd.xlane.f32.xlu0 %v729_v10  ;;  %v2710_v10 = vld [vmem:[#allocation10 + $0x1] ss:$0 sm:$0xff] }
 0x291   :  { %v722_v43 = vpop.xlane.xlu2 %721 }
 0x292   :  { %v732_v3 = vmul.f32 %v722_v43, %v3651_v20 }
 0x294   :  { %v736_v44 = vsub.f32 %v3814_v21, %v732_v3 }
 0x296   :  { %v740_v45 = vmul.f32 %v736_v44, %v736_v44 }
 0x298   :  { %v744_v39 = vsel %vm4401_vm0, %v740_v45, 0.0 }
 0x299   :  { %v725_v47 = vpop.xlane.xlu1 %724  ;;  %745 = vadd.xlane.f32.xlu0 %v744_v39  ;;  %v728_v48 = vpop.xlane.xlu2 %727 }
 0x29a   :  { %v733_v50 = vmul.f32 %v725_v47, %v3651_v20  ;;  %v734_v11 = vmul.f32 %v728_v48, %v3651_v20 }
 0x29c   :  { %v3839_v51 = vsub.f32 %v3822_v33, %v733_v50  ;;  %v3842_v52 = vsub.f32 %v3819_v30, %v734_v11  ;;  %v731_v53 = vpop.xlane.xlu0 %730 }
 0x29d   :  { %v735_v35 = vmul.f32 %v731_v53, %v3651_v20 }
 0x29e   :  { %v741_v29 = vmul.f32 %v3839_v51, %v3839_v51  ;;  %v742_v40 = vmul.f32 %v3842_v52, %v3842_v52 }
 0x29f   :  { %v3850_v55 = vsub.f32 %v3829_v42, %v735_v35 }
 0x2a0   :  { %v747_v36 = vsel %vm4401_vm0, %v741_v29, 0.0  ;;  %v750_v58 = vsel %vm4401_vm0, %v742_v40, 0.0 }
 0x2a1   :  { %748 = vadd.xlane.f32.xlu2 %v747_v36  ;;  %751 = vadd.xlane.f32.xlu0 %v750_v58  ;;  %v743_v59 = vmul.f32 %v3850_v55, %v3850_v55 }
 0x2a3   :  { %v753_v61 = vsel %vm4401_vm0, %v743_v59, 0.0 }
 0x2a4   :  { %754 = vadd.xlane.f32.xlu1 %v753_v61 }
 0x30c   :  { %v746_v32 = vpop.xlane.xlu0 %745 }
 0x30d   :  { %v756_v60 = vmul.f32 %v746_v32, %v3651_v20 }
 0x30f   :  { %v760_v24 = vadd.f32 1e-05, %v756_v60 }
 0x311   :  { %2733 = vrsqrt.f32 %v760_v24  ;;  %vm770_vm10 = vweird.f32 %v760_v24 }
 0x314   :  { %v752_v62 = vpop.xlane.xlu0 %751  ;;  %v749_v63 = vpop.xlane.xlu2 %748 }
 0x315   :  { %v758_v46 = vmul.f32 %v752_v62, %v3651_v20  ;;  %v757_v1 = vmul.f32 %v749_v63, %v3651_v20 }
 0x317   :  { %v2734_v4 = vpop.eup %2733  ;;  %v762_v5 = vadd.f32 1e-05, %v758_v46  ;;  %v761_v7 = vadd.f32 1e-05, %v757_v1  ;;  %v755_v0 = vpop.xlane.xlu1 %754 }
 0x318   :  { %v765_v9 = vmul.f32 %v2734_v4, %v760_v24  ;;  %v759_v12 = vmul.f32 %v755_v0, %v3651_v20  ;;  %vm771_vm7 = vweird.f32 %v2734_v4 }
 0x319   :  { %2735 = vrsqrt.f32 %v762_v5  ;;  %vm772_vm11 = vmor %vm770_vm10, %vm771_vm7  ;;  %vm790_vm15 = vweird.f32 %v762_v5  ;;  %vm780_vm7 = vweird.f32 %v761_v7 }
 0x31a   :  { %v766_v26 = vmul.f32 %v2734_v4, %v765_v9  ;;  %2737 = vrsqrt.f32 %v761_v7  ;;  %v763_v13 = vadd.f32 1e-05, %v759_v12 }
 0x31c   :  { %v767_v14 = vmul.f32 0.5, %v766_v26  ;;  %2739 = vrsqrt.f32 %v763_v13  ;;  %vm800_vm0 = vweird.f32 %v763_v13 }
 0x31e   :  { %v768_v54 = vsub.f32 1.5, %v767_v14 }
 0x31f   :  { %v2736_v15 = vpop.eup %2735 }
 0x320   :  { %v2738_v37 = vpop.eup %2737  ;;  %v769_v16 = vmul.f32 %v2734_v4, %v768_v54  ;;  %v785_v17 = vmul.f32 %v2736_v15, %v762_v5  ;;  %vm791_vm13 = vweird.f32 %v2736_v15 }
 0x321   :  { %v775_v18 = vmul.f32 %v2738_v37, %v761_v7  ;;  %vm781_vm14 = vweird.f32 %v2738_v37  ;;  %vm792_vm1 = vmor %vm790_vm15, %vm791_vm13 }
 0x322   :  { %v773_v19 = vsel %vm772_vm11, %v2734_v4, %v769_v16  ;;  %v786_v22 = vmul.f32 %v2736_v15, %v785_v17  ;;  %v2740_v56 = vpop.eup %2739  ;;  %vm782_vm11 = vmor %vm780_vm7, %vm781_vm14 }
 0x323   :  { %v776_v23 = vmul.f32 %v2738_v37, %v775_v18  ;;  %v804_v28 = vmul.f32 %v773_v19, %v736_v44  ;;  %v795_v31 = vmul.f32 %v2740_v56, %v763_v13  ;;  %vm801_vm10 = vweird.f32 %v2740_v56  ;;  %v2443_v44 = vld [vmem:[%s4423_s8 + $0x8] sm:$0x1f] }
 0x324   :  { %v787_v25 = vmul.f32 0.5, %v786_v22  ;;  %vm802_vm13 = vmor %vm800_vm0, %vm801_vm10  ;;  %v3874_v36 = vperm.slane %v2443_v44, 2  ;;  %v836_v61 = vperm.slane %v2443_v44, 0  ;;  %v857_v24 = vperm.slane %v2443_v44, 1 }
 0x325   :  { %v777_v34 = vmul.f32 0.5, %v776_v23  ;;  %v796_v38 = vmul.f32 %v2740_v56, %v795_v31  ;;  %v811_v43 = vmul.f32 %v2709_v27, %v804_v28  ;;  %vm4424_vm0 = vcmask 261120  }
 0x326   :  { %v788_v6 = vsub.f32 1.5, %v787_v25  ;;  %vm4433_vm14 = vmmov %vm4424_vm0 }
 0x327   :  { %v778_v41 = vsub.f32 1.5, %v777_v34  ;;  %v797_v3 = vmul.f32 0.5, %v796_v38  ;;  %v3871_v53 = vadd.f32 %v2710_v10, %v811_v43 }
 0x328   :  { %v789_v45 = vmul.f32 %v2736_v15, %v788_v6 }
 0x329   :  { %v779_v39 = vmul.f32 %v2738_v37, %v778_v41  ;;  %v798_v47 = vsub.f32 1.5, %v797_v3  ;;  %v824_v62 = vrot.slane %v3871_v53, 6  ;;  %v845_v63 = vrot.slane %v3871_v53, 7 }
 0x32a   :  { %v793_v48 = vsel %vm792_vm1, %v2736_v15, %v789_v45  ;;  %v867_v1 = vmul.f32 %v3874_v36, %v3871_v53  ;;  %v875_v2 = vrot.slane %v3871_v53, 1  ;;  %v896_v12 = vrot.slane %v3871_v53, 2 }
 0x32b   :  { %v806_v50 = vmul.f32 %v793_v48, %v3842_v52  ;;  %v783_v11 = vsel %vm782_vm11, %v2738_v37, %v779_v39  ;;  %v799_v35 = vmul.f32 %v2740_v56, %v798_v47  ;;  %v3879_v52 = vperm.slane %v2443_v44, 3 }
 0x32c   :  { %v805_v29 = vmul.f32 %v783_v11, %v3839_v51  ;;  %v3883_v51 = vperm.slane %v2443_v44, 4 }
 0x32d   :  { %v813_v40 = vmul.f32 %v2709_v27, %v806_v50  ;;  %v803_v58 = vsel %vm802_vm13, %v2740_v56, %v799_v35 }
 0x32e   :  { %v812_v59 = vmul.f32 %v2709_v27, %v805_v29  ;;  %v807_v32 = vmul.f32 %v803_v58, %v3850_v55 }
 0x32f   :  { %v3877_v60 = vadd.f32 %v2710_v10, %v813_v40 }
 0x330   :  { %v819_v57 = vadd.f32 %v2710_v10, %v812_v59  ;;  %v814_v46 = vmul.f32 %v2709_v27, %v807_v32 }
 0x331   :  { %v877_v55 = vrot.slane %v3877_v60, 1  ;;  %v898_v9 = vrot.slane %v3877_v60, 2  ;;  %v826_v13 = vrot.slane %v3877_v60, 6  ;;  %v847_v27 = vrot.slane %v3877_v60, 7 }
 0x332   :  { %v825_v4 = vrot.slane %v819_v57, 6  ;;  %v846_v5 = vrot.slane %v819_v57, 7  ;;  %v876_v7 = vrot.slane %v819_v57, 1  ;;  %v3890_v0 = vadd.f32 %v2710_v10, %v814_v46 }
 0x333   :  { %v897_v26 = vrot.slane %v819_v57, 2  ;;  %v868_v22 = vmul.f32 %v3874_v36, %v819_v57 }
 0x334   :  { %v830_v14 = vsel %vm520_vm8, %v824_v62, %v825_v4  ;;  %v851_v54 = vsel %vm552_vm9, %v845_v63, %v846_v5  ;;  %v880_v15 = vsel %vm593_vm12, %v876_v7, %v877_v55  ;;  %v881_v37 = vsel %vm593_vm12, %v875_v2, %v876_v7 }
 0x335   :  { %v827_v16 = vrot.slane %v3890_v0, 6  ;;  %v838_v17 = vmul.f32 %v836_v61, %v830_v14  ;;  %v848_v18 = vrot.slane %v3890_v0, 7  ;;  %v859_v19 = vmul.f32 %v857_v24, %v851_v54 }
 0x336   :  { %v884_v56 = vsel %vm601_vm5, %v880_v15, 0.0  ;;  %v901_v23 = vsel %vm625_vm2, %v897_v26, %v898_v9  ;;  %v888_v34 = vmul.f32 %v3879_v52, %v881_v37  ;;  %v902_v41 = vsel %vm625_vm2, %v896_v12, %v897_v26 }
 0x337   :  { %v831_v28 = vsel %vm520_vm8, %v827_v16, %v824_v62  ;;  %v852_v31 = vsel %vm552_vm9, %v848_v18, %v845_v63  ;;  %v863_v25 = vadd.f32 %v859_v19, %v838_v17  ;;  %v905_v10 = vsel %vm633_vm6, %v901_v23, 0.0  ;;  %v2711_v63 = vld [vmem:[#allocation11 + $0x1] ss:$0 sm:$0xff] }
 0x338   :  { %v832_v38 = vsel %vm525_vm3, %v831_v28, 0.0  ;;  %v853_v6 = vsel %vm557_vm4, %v852_v31, 0.0  ;;  %v889_v39 = vmul.f32 %v3879_v52, %v884_v56  ;;  %v828_v47 = vsel %vm520_vm8, %v826_v13, %v827_v16 }
 0x339   :  { %v837_v43 = vmul.f32 %v836_v61, %v832_v38  ;;  %v858_v3 = vmul.f32 %v857_v24, %v853_v6  ;;  %v872_v45 = vadd.f32 %v868_v22, %v863_v25  ;;  %v829_v48 = vsel %vm520_vm8, %v825_v4, %v826_v13  ;;  %vm4425_vm8 = vmmov %vm4424_vm0 }
 0x33a   :  { %v849_v44 = vsel %vm552_vm9, %v847_v27, %v848_v18  ;;  %v850_v50 = vsel %vm552_vm9, %v846_v5, %v847_v27  ;;  %v910_v35 = vmul.f32 %v3883_v51, %v905_v10  ;;  %v834_v29 = vsel %vm525_vm3, %v829_v48, 0.0  ;;  %vm4426_vm9 = vmmov %vm4424_vm0 }
 0x33b   :  { %v862_v11 = vadd.f32 %v858_v3, %v837_v43  ;;  %v893_v53 = vadd.f32 %v889_v39, %v872_v45  ;;  %v839_v40 = vmul.f32 %v836_v61, %v834_v29  ;;  %v840_v58 = vmul.f32 %v836_v61, %v828_v47  ;;  %vm4429_vm3 = vmmov %vm4424_vm0 }
 0x33c   :  { %v855_v59 = vsel %vm557_vm4, %v850_v50, 0.0  ;;  %v861_v32 = vmul.f32 %v857_v24, %v849_v44  ;;  %v878_v4 = vrot.slane %v3890_v0, 1  ;;  %v909_v7 = vmul.f32 %v3883_v51, %v902_v41  ;;  %vm4430_vm4 = vmmov %vm4424_vm0 }
 0x33d   :  { %v871_v57 = vadd.f32 %v867_v1, %v862_v11  ;;  %v914_v62 = vadd.f32 %v910_v35, %v893_v53  ;;  %v860_v46 = vmul.f32 %v857_v24, %v855_v59  ;;  %v899_v13 = vrot.slane %v3890_v0, 2 }
 0x33e   :  { %v865_v26 = vadd.f32 %v861_v32, %v840_v58  ;;  %v882_v61 = vsel %vm593_vm12, %v878_v4, %v875_v2  ;;  %v869_v1 = vmul.f32 %v3874_v36, %v3877_v60  ;;  %v870_v24 = vmul.f32 %v3874_v36, %v3890_v0  ;;  %v2712_v60 = vld [vmem:[#allocation13 + $0x1] ss:$0 sm:$0xff] }
 0x33f   :  { %v892_v5 = vadd.f32 %v888_v34, %v871_v57  ;;  %v923_v54 = vadd.f32 %v2711_v63, %v914_v62  ;;  %v864_v15 = vadd.f32 %v860_v46, %v839_v40  ;;  %v879_v16 = vsel %vm593_vm12, %v877_v55, %v878_v4  ;;  %vm4427_vm12 = vmmov %vm4424_vm0 }
 0x340   :  { %v886_v17 = vsel %vm601_vm5, %v882_v61, 0.0  ;;  %v874_v22 = vadd.f32 %v870_v24, %v865_v26  ;;  %v903_v56 = vsel %vm625_vm2, %v899_v13, %v896_v12  ;;  %v890_v2 = vmul.f32 %v3879_v52, %v879_v16  ;;  %vm4431_vm5 = vmmov %vm4424_vm0 }
 0x341   :  { %v913_v14 = vadd.f32 %v909_v7, %v892_v5  ;;  %v873_v19 = vadd.f32 %v869_v1, %v864_v15  ;;  %v891_v23 = vmul.f32 %v3879_v52, %v886_v17  ;;  %v900_v36 = vsel %vm625_vm2, %v898_v9, %v899_v13  ;;  %vm4428_vm2 = vmmov %vm4424_vm0  ;;  %v2539_v17 = vld [vmem:[#allocation17 + $0x8] sm:$0xff] }
 0x342   :  { %v907_v55 = vsel %vm633_vm6, %v903_v56, 0.0  ;;  %v911_v28 = vmul.f32 %v3883_v51, %v900_v36  ;;  %vm4432_vm6 = vmmov %vm4424_vm0  ;;  %1121 = vmatpush.bf16.msra.mxu2 %v2539_v17  ;;  %v2538_v36 = vld [vmem:[#allocation17] sm:$0xff] }
 0x343   :  { %v922_v37 = vadd.f32 %v2711_v63, %v913_v14  ;;  %v894_v0 = vadd.f32 %v890_v2, %v873_v19  ;;  %v895_v27 = vadd.f32 %v891_v23, %v874_v22  ;;  %v912_v12 = vmul.f32 %v3883_v51, %v907_v55  ;;  %v2543_v19 = vld [vmem:[#allocation23 + $0x8] sm:$0xff] }
 0x344   :  { %1199 = vmatpush.bf16.msrb.mxu0 %v2543_v19  ;;  %v2540_v55 = vld [vmem:[#allocation20] sm:$0xff] }
 0x345   :  { %v931_v18 = vpack.c.bf16 %v923_v54, %v922_v37  ;;  %v915_v31 = vadd.f32 %v911_v28, %v894_v0  ;;  %v916_v25 = vadd.f32 %v912_v12, %v895_v27  ;;  %v2542_v0 = vld [vmem:[#allocation23] sm:$0xff]  ;;  %v2715_v19 = vld [vmem:[#allocation25] ss:$0 sm:$0xff] }
 0x346   :  { %1122 = vmatpush.bf16.msra.mxu2 %v2538_v36 }
 0x347   :  { %2456 = vmatmul.msk.bf16.vlgmr.msrb.gmra.mxu1 %vm4424_vm0, %v931_v18  ;;  %v924_v34 = vadd.f32 %v2711_v63, %v915_v31  ;;  %v925_v38 = vadd.f32 %v2711_v63, %v916_v25  ;;  %v2541_v18 = vld [vmem:[#allocation20 + $0x8] sm:$0xff] }
 0x348   :  { %1160 = vmatpush.bf16.msra.mxu3 %v2541_v18  ;;  %1200 = vmatpush.bf16.msrb.mxu0 %v2542_v0 }
 0x349   :  { %v932_v6 = vpack.c.bf16 %v925_v38, %v924_v34 }
 0x34c   :  { %1161 = vmatpush.bf16.msra.mxu3 %v2540_v55  ;;  %v2716_v55 = vld [vmem:[#allocation19] ss:$0 sm:$0xff] }
 0x357   :  { %2457 = vmatmul.msk.bf16.gmra.mxu1 %vm4425_vm8, %v932_v6 }
 0x3c4   :  { %v965_v52 = vpop.f32.mrf.mxu1 }
 0x3c5   :  { %v966_v8 = vadd.f32 %v2712_v60, %v965_v52 }
 0x3c7   :  { %v975_v9 = vmax.f32 %v966_v8, 0.0 }
 0x3c9   :  { %v3967_v49 = vadd.f32 %v975_v9, %v3814_v21 }
 0x3cb   :  { %v985_v41 = vsel %vm4426_vm9, %v3967_v49, 0.0 }
 0x3cc   :  { %v967_v10 = vpop.f32.mrf.mxu1  ;;  %986 = vadd.xlane.f32.xlu1 %v985_v41 }
 0x3cd   :  { %v968_v51 = vadd.f32 %v2712_v60, %v967_v10 }
 0x3cf   :  { %v976_v43 = vmax.f32 %v968_v51, 0.0 }
 0x3d1   :  { %v3972_v3 = vadd.f32 %v976_v43, %v3822_v33 }
 0x3d3   :  { %v988_v45 = vsel %vm4427_vm12, %v3972_v3, 0.0  ;;  %vm4434_vm12 = vmmov %vm4428_vm2 }
 0x3d4   :  { %989 = vadd.xlane.f32.xlu2 %v988_v45  ;;  %v970_v39 = vpop.f32.mrf.mxu1 }
 0x3d5   :  { %v971_v47 = vadd.f32 %v2712_v60, %v970_v39 }
 0x3d7   :  { %v977_v48 = vmax.f32 %v971_v47, 0.0  ;;  %v2713_v47 = vld [vmem:[#allocation14] ss:$0 sm:$0xff] }
 0x3d9   :  { %v3977_v21 = vadd.f32 %v977_v48, %v3819_v30 }
 0x3db   :  { %v991_v44 = vsel %vm4428_vm2, %v3977_v21, 0.0 }
 0x3dc   :  { %v972_v50 = vpop.f32.mrf.mxu1  ;;  %992 = vadd.xlane.f32.xlu0 %v991_v44 }
 0x3dd   :  { %v973_v11 = vadd.f32 %v2712_v60, %v972_v50 }
 0x3df   :  { %v978_v53 = vmax.f32 %v973_v11, 0.0 }
 0x3e1   :  { %v3982_v33 = vadd.f32 %v978_v53, %v3829_v42 }
 0x3e3   :  { %v994_v35 = vsel %vm4429_vm3, %v3982_v33, 0.0  ;;  %vm4435_vm3 = vmmov %vm4428_vm2 }
 0x3e4   :  { %995 = vadd.xlane.f32.xlu1 %v994_v35 }
 0x43f   :  { %v987_v29 = vpop.xlane.xlu1 %986 }
 0x440   :  { %v997_v40 = vmul.f32 %v987_v29, %v3651_v20  ;;  %v2714_v29 = vld [vmem:[#allocation16] ss:$0 sm:$0xff] }
 0x442   :  { %v3988_v30 = vsub.f32 %v3967_v49, %v997_v40 }
 0x444   :  { %v1005_v58 = vmul.f32 %v3988_v30, %v3988_v30 }
 0x446   :  { %v1009_v59 = vsel %vm4430_vm4, %v1005_v58, 0.0 }
 0x447   :  { %v990_v32 = vpop.xlane.xlu2 %989  ;;  %1010 = vadd.xlane.f32.xlu2 %v1009_v59 }
 0x448   :  { %v998_v42 = vmul.f32 %v990_v32, %v3651_v20 }
 0x44a   :  { %v3995_v57 = vsub.f32 %v3972_v3, %v998_v42 }
 0x44c   :  { %v1006_v62 = vmul.f32 %v3995_v57, %v3995_v57 }
 0x44e   :  { %v1012_v63 = vsel %vm4431_vm5, %v1006_v62, 0.0 }
 0x44f   :  { %1013 = vadd.xlane.f32.xlu0 %v1012_v63  ;;  %v993_v46 = vpop.xlane.xlu0 %992 }
 0x450   :  { %v999_v4 = vmul.f32 %v993_v46, %v3651_v20 }
 0x452   :  { %v4002_v5 = vsub.f32 %v3977_v21, %v999_v4 }
 0x454   :  { %v1007_v7 = vmul.f32 %v4002_v5, %v4002_v5 }
 0x456   :  { %v1015_v26 = vsel %vm4432_vm6, %v1007_v7, 0.0 }
 0x457   :  { %v996_v13 = vpop.xlane.xlu1 %995  ;;  %1016 = vadd.xlane.f32.xlu1 %v1015_v26 }
 0x458   :  { %v1000_v14 = vmul.f32 %v996_v13, %v3651_v20 }
 0x45a   :  { %v4009_v54 = vsub.f32 %v3982_v33, %v1000_v14 }
 0x45c   :  { %v1008_v15 = vmul.f32 %v4009_v54, %v4009_v54 }
 0x45e   :  { %v1018_v61 = vsel %vm4433_vm14, %v1008_v15, 0.0  ;;  %vm4436_vm14 = vmmov %vm4428_vm2 }
 0x45f   :  { %1019 = vadd.xlane.f32.xlu2 %v1018_v61 }
 0x4ba   :  { %v1011_v37 = vpop.xlane.xlu2 %1010 }
 0x4bb   :  { %v1021_v1 = vmul.f32 %v1011_v37, %v3651_v20 }
 0x4bd   :  { %v1025_v24 = vadd.f32 1e-05, %v1021_v1 }
 0x4bf   :  { %2741 = vrsqrt.f32 %v1025_v24  ;;  %vm1035_vm1 = vweird.f32 %v1025_v24 }
 0x4c2   :  { %v1014_v16 = vpop.xlane.xlu0 %1013 }
 0x4c3   :  { %v1022_v22 = vmul.f32 %v1014_v16, %v3651_v20 }
 0x4c5   :  { %v2742_v56 = vpop.eup %2741  ;;  %v1026_v2 = vadd.f32 1e-05, %v1022_v22 }
 0x4c6   :  { %v1030_v23 = vmul.f32 %v2742_v56, %v1025_v24  ;;  %vm1036_vm15 = vweird.f32 %v2742_v56 }
 0x4c7   :  { %2743 = vrsqrt.f32 %v1026_v2  ;;  %vm1037_vm7 = vmor %vm1035_vm1, %vm1036_vm15  ;;  %vm1045_vm11 = vweird.f32 %v1026_v2 }
 0x4c8   :  { %v1031_v27 = vmul.f32 %v2742_v56, %v1030_v23  ;;  %vm4437_vm15 = vmmov %vm4428_vm2 }
 0x4c9   :  { %vm4438_vm1 = vmmov %vm4428_vm2 }
 0x4ca   :  { %v1032_v28 = vmul.f32 0.5, %v1031_v27  ;;  %v1017_v12 = vpop.xlane.xlu1 %1016 }
 0x4cb   :  { %v1023_v31 = vmul.f32 %v1017_v12, %v3651_v20 }
 0x4cc   :  { %v1033_v25 = vsub.f32 1.5, %v1032_v28 }
 0x4cd   :  { %v2744_v34 = vpop.eup %2743  ;;  %v1027_v38 = vadd.f32 1e-05, %v1023_v31 }
 0x4ce   :  { %v1034_v6 = vmul.f32 %v2742_v56, %v1033_v25  ;;  %v1040_v60 = vmul.f32 %v2744_v34, %v1026_v2  ;;  %vm1046_vm10 = vweird.f32 %v2744_v34  ;;  %v2717_v2 = vld [vmem:[#allocation22] ss:$0 sm:$0xff] }
 0x4cf   :  { %2745 = vrsqrt.f32 %v1027_v38  ;;  %vm1047_vm13 = vmor %vm1045_vm11, %vm1046_vm10  ;;  %vm1055_vm8 = vweird.f32 %v1027_v38  ;;  %vm1649_vm10 = vcmask 130048   ;;  %vm2138_vm11 = vcmask 195584  }
 0x4d0   :  { %v1041_v52 = vmul.f32 %v2744_v34, %v1040_v60  ;;  %v1038_v8 = vsel %vm1037_vm7, %v2742_v56, %v1034_v6  ;;  %vm1374_vm7 = vcmask 64512  }
 0x4d1   :  { %v1069_v45 = vmul.f32 %v1038_v8, %v3988_v30 }
 0x4d2   :  { %v1042_v9 = vmul.f32 0.5, %v1041_v52  ;;  %v1020_v41 = vpop.xlane.xlu2 %1019 }
 0x4d3   :  { %v1024_v10 = vmul.f32 %v1020_v41, %v3651_v20  ;;  %v1076_v35 = vmul.f32 %v2713_v47, %v1069_v45 }
 0x4d4   :  { %v1043_v51 = vsub.f32 1.5, %v1042_v9 }
 0x4d5   :  { %v2746_v43 = vpop.eup %2745  ;;  %v1028_v39 = vadd.f32 1e-05, %v1024_v10  ;;  %v1083_v42 = vadd.f32 %v2714_v29, %v1076_v35 }
 0x4d6   :  { %v1044_v48 = vmul.f32 %v2744_v34, %v1043_v51  ;;  %v1050_v44 = vmul.f32 %v2746_v43, %v1027_v38  ;;  %vm1056_vm0 = vweird.f32 %v2746_v43 }
 0x4d7   :  { %2747 = vrsqrt.f32 %v1028_v39  ;;  %vm1057_vm9 = vmor %vm1055_vm8, %vm1056_vm0  ;;  %vm1065_vm5 = vweird.f32 %v1028_v39 }
 0x4d8   :  { %v1048_v50 = vsel %vm1047_vm13, %v2744_v34, %v1044_v48  ;;  %v1051_v11 = vmul.f32 %v2746_v43, %v1050_v44  ;;  %vm4439_vm13 = vmmov %vm4438_vm1 }
 0x4d9   :  { %v1070_v53 = vmul.f32 %v1048_v50, %v3995_v57  ;;  %vm4440_vm0 = vmmov %vm4438_vm1 }
 0x4da   :  { %v1052_v40 = vmul.f32 0.5, %v1051_v11  ;;  %vm4441_vm8 = vmmov %vm4440_vm0 }
 0x4db   :  { %v1077_v58 = vmul.f32 %v2713_v47, %v1070_v53 }
 0x4dc   :  { %v1053_v59 = vsub.f32 1.5, %v1052_v40 }
 0x4dd   :  { %v2748_v32 = vpop.eup %2747  ;;  %v1084_v62 = vadd.f32 %v2714_v29, %v1077_v58 }
 0x4de   :  { %v1054_v30 = vmul.f32 %v2746_v43, %v1053_v59  ;;  %v1060_v63 = vmul.f32 %v2748_v32, %v1028_v39  ;;  %vm1066_vm4 = vweird.f32 %v2748_v32 }
 0x4df   :  { %v1091_v46 = vpack.c.bf16 %v1084_v62, %v1083_v42  ;;  %vm1067_vm6 = vmor %vm1065_vm5, %vm1066_vm4 }
 0x4e0   :  { %v1061_v4 = vmul.f32 %v2748_v32, %v1060_v63  ;;  %v1058_v57 = vsel %vm1057_vm9, %v2746_v43, %v1054_v30  ;;  %vm4442_vm9 = vmmov %vm4440_vm0 }
 0x4e1   :  { %2466 = vmatmul.msk.bf16.vlgmr.msra.gmra.mxu2 %vm4434_vm12, %v1091_v46  ;;  %2476 = vmatmul.msk.bf16.vlgmr.msra.gmra.mxu3 %vm4428_vm2, %v1091_v46  ;;  %v1071_v13 = vmul.f32 %v1058_v57, %v4002_v5  ;;  %vm4443_vm12 = vmmov %vm4440_vm0 }
 0x4e2   :  { %v1062_v7 = vmul.f32 0.5, %v1061_v4  ;;  %2486 = vmatmul.msk.bf16.vlgmr.msrb.gmra.mxu0 %vm4435_vm3, %v1091_v46  ;;  %vm4444_vm2 = vmmov %vm4440_vm0 }
 0x4e3   :  { %v1078_v37 = vmul.f32 %v2713_v47, %v1071_v13  ;;  %vm4445_vm3 = vmmov %vm4440_vm0 }
 0x4e4   :  { %v1063_v26 = vsub.f32 1.5, %v1062_v7  ;;  %vm4446_vm4 = vmmov %vm4440_vm0 }
 0x4e5   :  { %v1085_v24 = vadd.f32 %v2714_v29, %v1078_v37  ;;  %vm4447_vm5 = vmmov %vm4440_vm0 }
 0x4e6   :  { %v1064_v14 = vmul.f32 %v2748_v32, %v1063_v26 }
 0x4e8   :  { %v1068_v15 = vsel %vm1067_vm6, %v2748_v32, %v1064_v14  ;;  %vm4448_vm6 = vmmov %vm4440_vm0 }
 0x4e9   :  { %v1072_v61 = vmul.f32 %v1068_v15, %v4009_v54 }
 0x4eb   :  { %v1079_v1 = vmul.f32 %v2713_v47, %v1072_v61 }
 0x4ed   :  { %v1086_v16 = vadd.f32 %v2714_v29, %v1079_v1 }
 0x4ef   :  { %v1092_v17 = vpack.c.bf16 %v1086_v16, %v1085_v24 }
 0x4f1   :  { %2467 = vmatmul.msk.bf16.gmra.mxu2 %vm4436_vm14, %v1092_v17  ;;  %2477 = vmatmul.msk.bf16.gmra.mxu3 %vm4437_vm15, %v1092_v17 }
 0x4f2   :  { %2487 = vmatmul.msk.bf16.gmra.mxu0 %vm4438_vm1, %v1092_v17 }
 0x55f   :  { %v1202_v18 = vpop.f32.mrf.mxu0 }
 0x560   :  { %v1203_v5 = vadd.f32 %v2715_v19, %v1202_v18 }
 0x562   :  { %v1842_v36 = vpack.c.bf16 %v1203_v5, %v1203_v5 }
 0x564   :  { %v1124_v22 = vpop.f32.mrf.mxu2  ;;  %v1163_v56 = vpop.f32.mrf.mxu3  ;;  %v4030_v12 = vunpack.c.l.b16 %v1842_v36 }
 0x565   :  { %v1164_v0 = vadd.f32 %v2717_v2, %v1163_v56  ;;  %v1125_v38 = vadd.f32 %v2716_v55, %v1124_v22 }
 0x567   :  { %v1204_v23 = vpop.f32.mrf.mxu0  ;;  %v1348_v52 = vpack.c.bf16 %v1164_v0, %v1164_v0  ;;  %v1332_v50 = vpack.c.bf16 %v1125_v38, %v1125_v38 }
 0x568   :  { %v1205_v54 = vadd.f32 %v2715_v19, %v1204_v23 }
 0x569   :  { %v1371_v43 = vunpack.c.l.b16 %v1348_v52  ;;  %v1366_v59 = vunpack.c.l.b16 %v1332_v50 }
 0x56a   :  { %v1843_v27 = vpack.c.bf16 %v1205_v54, %v1205_v54  ;;  %v4028_v28 = vpack.i.bf16 %v1205_v54, %v1203_v5 }
 0x56c   :  { %v4032_v31 = vunpack.c.l.b16 %v1843_v27  ;;  %v1126_v25 = vpop.f32.mrf.mxu2  ;;  %v1165_v34 = vpop.f32.mrf.mxu3 }
 0x56d   :  { %v1127_v6 = vadd.f32 %v2716_v55, %v1126_v25  ;;  %v1166_v60 = vadd.f32 %v2717_v2, %v1165_v34 }
 0x56e   :  { %v1867_v8 = vpack.c.b16 %v4032_v31, %v4030_v12 }
 0x56f   :  { %v1207_v9 = vpop.f32.mrf.mxu0  ;;  %v2595_v41 = vpack.i.bf16 %v1166_v60, %v1164_v0  ;;  %v2590_v10 = vpack.i.bf16 %v1127_v6, %v1125_v38  ;;  %v1349_v51 = vpack.c.bf16 %v1166_v60, %v1166_v60  ;;  %v1333_v39 = vpack.c.bf16 %v1127_v6, %v1127_v6 }
 0x570   :  { %v4040_v29 = vadd.f32 %v2715_v19, %v1207_v9 }
 0x571   :  { %2596 = vrot.lane.b32.xlu2 %v2595_v41, %s3401_s27  ;;  %2586 = vrot.lane.b32.xlu0 %v2595_v41, %s3402_s14  ;;  %v1372_v45 = vunpack.c.l.b16 %v1349_v51  ;;  %v1367_v35 = vunpack.c.l.b16 %v1333_v39 }
 0x572   :  { %2591 = vrot.lane.b32.xlu1 %v2590_v10, %s3402_s14 }
 0x573   :  { %v1373_v44 = vpack.c.b16 %v1372_v45, %v1371_v43  ;;  %v1368_v42 = vpack.c.b16 %v1367_v35, %v1366_v59 }
 0x574   :  { %v1129_v47 = vpop.f32.mrf.mxu2  ;;  %v1168_v48 = vpop.f32.mrf.mxu3 }
 0x575   :  { %v1379_v11 = vsel %vm1374_vm7, %v1373_v44, 0  ;;  %v1169_v58 = vadd.f32 %v2717_v2, %v1168_v48  ;;  %v1130_v26 = vadd.f32 %v2716_v55, %v1129_v47 }
 0x576   :  { %1388 = vmatpush.bf16.xpose.msra.mxu1 %v1379_v11 }
 0x577   :  { %v1209_v53 = vpop.f32.mrf.mxu0  ;;  %v1350_v46 = vpack.c.bf16 %v1169_v58, %v1169_v58  ;;  %v1334_v37 = vpack.c.bf16 %v1130_v26, %v1130_v26 }
 0x578   :  { %v4042_v40 = vadd.f32 %v2715_v19, %v1209_v53 }
 0x579   :  { %2601 = vrot.lane.b32.xlu0 %v2590_v10, %s3401_s27  ;;  %v1402_v13 = vunpack.c.l.b16 %v1350_v46  ;;  %v1397_v17 = vunpack.c.l.b16 %v1334_v37 }
 0x57a   :  { %2606 = vrot.lane.b32.xlu1 %v2595_v41, %s3403_s21  ;;  %v4048_v32 = vpack.i.bf16 %v4042_v40, %v4040_v29 }
 0x57c   :  { %v1131_v62 = vpop.f32.mrf.mxu2  ;;  %v1170_v30 = vpop.f32.mrf.mxu3 }
 0x57d   :  { %v1171_v63 = vadd.f32 %v2717_v2, %v1170_v30  ;;  %2488 = vmatmul.msk.bf16.vlgmr.msra.gmra.mxu1 %vm1374_vm7, %v1368_v42  ;;  %v1132_v4 = vadd.f32 %v2716_v55, %v1131_v62 }
 0x57f   :  { %v2615_v57 = vpack.i.bf16 %v1171_v63, %v1169_v58  ;;  %v1351_v7 = vpack.c.bf16 %v1171_v63, %v1171_v63  ;;  %v1335_v15 = vpack.c.bf16 %v1132_v4, %v1132_v4  ;;  %v2625_v16 = vpack.i.bf16 %v1132_v4, %v1130_v26 }
 0x581   :  { %2616 = vrot.lane.b32.xlu2 %v2615_v57, %s3402_s14  ;;  %2621 = vrot.lane.b32.xlu0 %v2615_v57, %s3401_s27  ;;  %v1403_v14 = vunpack.c.l.b16 %v1351_v7  ;;  %v1398_v24 = vunpack.c.l.b16 %v1335_v15 }
 0x582   :  { %2611 = vrot.lane.b32.xlu1 %v2590_v10, %s3403_s21 }
 0x583   :  { %v1404_v61 = vpack.c.b16 %v1403_v14, %v1402_v13  ;;  %v1399_v18 = vpack.c.b16 %v1398_v24, %v1397_v17 }
 0x585   :  { %v1409_v1 = vsel %vm1374_vm7, %v1404_v61, 0 }
 0x586   :  { %1418 = vmatpush.bf16.xpose.msrb.mxu2 %v1409_v1 }
 0x589   :  { %2626 = vrot.lane.b32.xlu2 %v2625_v16, %s3402_s14  ;;  %2631 = vrot.lane.b32.xlu0 %v2625_v16, %s3401_s27 }
 0x58a   :  { %2641 = vrot.lane.b32.xlu1 %v2625_v16, %s3403_s21 }
 0x58d   :  { %2489 = vmatmul.msk.bf16.vlgmr.msrb.gmra.mxu2 %vm1374_vm7, %v1399_v18 }
 0x591   :  { %2636 = vrot.lane.b32.xlu2 %v2615_v57, %s3403_s21  ;;  %2651 = vrot.lane.b32.xlu0 %v4028_v28, %s3401_s27 }
 0x592   :  { %2646 = vrot.lane.b32.xlu1 %v4028_v28, %s3402_s14 }
 0x5cb   :  { %v2597_v19 = vpop.permute.xlu2 %2596 }
 0x5cc   :  { %v2599_v5 = vunpack.i.h.bf16 %v2597_v19  ;;  %v2598_v22 = vunpack.i.l.bf16 %v2597_v19 }
 0x5ce   :  { %v1357_v56 = vpack.c.bf16 %v2599_v5, %v2599_v5  ;;  %v1356_v2 = vpack.c.bf16 %v2598_v22, %v2598_v22  ;;  %v1621_v22 = vld [vmem:[#allocation5] sm:$0x1] }
 0x5d0   :  { %v1493_v23 = vunpack.c.l.b16 %v1357_v56  ;;  %v1492_v36 = vunpack.c.l.b16 %v1356_v2 }
 0x5d2   :  { %v1494_v54 = vpack.c.b16 %v1493_v23, %v1492_v36 }
 0x5d4   :  { %v1499_v55 = vsel %vm1374_vm7, %v1494_v54, 0 }
 0x5d5   :  { %1508 = vmatpush.bf16.xpose.msra.mxu2 %v1499_v55 }
 0x5db   :  { %v2617_v0 = vpop.permute.xlu2 %2616 }
 0x5dc   :  { %v2619_v27 = vunpack.i.h.bf16 %v2617_v0  ;;  %v2618_v25 = vunpack.i.l.bf16 %v2617_v0 }
 0x5dd   :  { %1879 = vmatpush.bf16.msrb.mxu2 %v1867_v8 }
 0x5de   :  { %v1355_v34 = vpack.c.bf16 %v2619_v27, %v2619_v27  ;;  %v1354_v38 = vpack.c.bf16 %v2618_v25, %v2618_v25  ;;  %v1623_v25 = vsub.f32 1.0, %v1621_v22 }
 0x5e0   :  { %v1463_v6 = vunpack.c.l.b16 %v1355_v34  ;;  %v1462_v60 = vunpack.c.l.b16 %v1354_v38  ;;  %v1845_v34 = vpack.c.bf16 %v4042_v40, %v4042_v40 }
 0x5e2   :  { %v1464_v52 = vpack.c.b16 %v1463_v6, %v1462_v60 }
 0x5e3   :  { %v2587_v9 = vpop.permute.xlu0 %2586  ;;  %v2627_v41 = vpop.permute.xlu2 %2626 }
 0x5e4   :  { %v2589_v10 = vunpack.i.h.bf16 %v2587_v9  ;;  %v2588_v51 = vunpack.i.l.bf16 %v2587_v9  ;;  %v2629_v43 = vunpack.i.h.bf16 %v2627_v41  ;;  %v2628_v45 = vunpack.i.l.bf16 %v2627_v41  ;;  %v2592_v39 = vpop.permute.xlu1 %2591 }
 0x5e5   :  { %v1469_v47 = vsel %vm1374_vm7, %v1464_v52, 0  ;;  %v2594_v44 = vunpack.i.h.bf16 %v2592_v39  ;;  %v2593_v50 = vunpack.i.l.bf16 %v2592_v39 }
 0x5e6   :  { %v1353_v48 = vpack.c.bf16 %v2589_v10, %v2589_v10  ;;  %v1352_v12 = vpack.c.bf16 %v2588_v51, %v2588_v51  ;;  %v1339_v31 = vpack.c.bf16 %v2629_v43, %v2629_v43  ;;  %v1338_v8 = vpack.c.bf16 %v2628_v45, %v2628_v45  ;;  %1478 = vmatpush.bf16.xpose.msrb.mxu1 %v1469_v47 }
 0x5e7   :  { %v1337_v62 = vpack.c.bf16 %v2594_v44, %v2594_v44  ;;  %v1336_v30 = vpack.c.bf16 %v2593_v50, %v2593_v50  ;;  %v1844_v51 = vpack.c.bf16 %v4040_v29, %v4040_v29 }
 0x5e8   :  { %v1433_v11 = vunpack.c.l.b16 %v1353_v48  ;;  %v1432_v53 = vunpack.c.l.b16 %v1352_v12  ;;  %v1458_v35 = vunpack.c.l.b16 %v1339_v31  ;;  %v1457_v58 = vunpack.c.l.b16 %v1338_v8 }
 0x5e9   :  { %v1428_v17 = vunpack.c.l.b16 %v1337_v62  ;;  %v1427_v18 = vunpack.c.l.b16 %v1336_v30  ;;  %v1625_v48 = vmul.f32 -1e+30, %v1623_v25  ;;  %v1894_v12 = vunpack.c.l.b16 %v1845_v34 }
 0x5ea   :  { %v1459_v59 = vpack.c.b16 %v1458_v35, %v1457_v58  ;;  %v1434_v42 = vpack.c.b16 %v1433_v11, %v1432_v53  ;;  %v1893_v11 = vunpack.c.l.b16 %v1844_v51 }
 0x5eb   :  { %v2637_v63 = vpop.permute.xlu2 %2636  ;;  %v2602_v46 = vpop.permute.xlu0 %2601  ;;  %v1429_v38 = vpack.c.b16 %v1428_v17, %v1427_v18  ;;  %v4079_v58 = vperm.slane %v1625_v48, 0 }
 0x5ec   :  { %v2639_v4 = vunpack.i.h.bf16 %v2637_v63  ;;  %v2638_v57 = vunpack.i.l.bf16 %v2637_v63  ;;  %v2604_v7 = vunpack.i.h.bf16 %v2602_v46  ;;  %v2603_v26 = vunpack.i.l.bf16 %v2602_v46  ;;  %v2607_v13 = vpop.permute.xlu1 %2606 }
 0x5ed   :  { %v2609_v14 = vunpack.i.h.bf16 %v2607_v13  ;;  %v2608_v15 = vunpack.i.l.bf16 %v2607_v13  ;;  %2491 = vmatmul.msk.bf16.vlgmr.msrb.gmra.mxu1 %vm1374_vm7, %v1459_v59  ;;  %v1439_v61 = vsel %vm1374_vm7, %v1434_v42, 0  ;;  %v1895_v30 = vpack.c.b16 %v1894_v12, %v1893_v11 }
 0x5ee   :  { %v1363_v37 = vpack.c.bf16 %v2639_v4, %v2639_v4  ;;  %v1362_v1 = vpack.c.bf16 %v2638_v57, %v2638_v57  ;;  %v1341_v24 = vpack.c.bf16 %v2604_v7, %v2604_v7  ;;  %v1340_v16 = vpack.c.bf16 %v2603_v26, %v2603_v26  ;;  %1448 = vmatpush.bf16.xpose.msrb.mxu3 %v1439_v61 }
 0x5ef   :  { %v1361_v19 = vpack.c.bf16 %v2609_v14, %v2609_v14  ;;  %v1360_v5 = vpack.c.bf16 %v2608_v15, %v2608_v15 }
 0x5f0   :  { %v1583_v56 = vunpack.c.l.b16 %v1363_v37  ;;  %v1582_v2 = vunpack.c.l.b16 %v1362_v1  ;;  %v1488_v23 = vunpack.c.l.b16 %v1341_v24  ;;  %v1487_v36 = vunpack.c.l.b16 %v1340_v16 }
 0x5f1   :  { %v1553_v54 = vunpack.c.l.b16 %v1361_v19  ;;  %v1552_v55 = vunpack.c.l.b16 %v1360_v5 }
 0x5f2   :  { %v1584_v0 = vpack.c.b16 %v1583_v56, %v1582_v2  ;;  %v1489_v27 = vpack.c.b16 %v1488_v23, %v1487_v36 }
 0x5f3   :  { %v1554_v6 = vpack.c.b16 %v1553_v54, %v1552_v55  ;;  %v2622_v60 = vpop.permute.xlu0 %2621 }
 0x5f4   :  { %v2624_v52 = vunpack.i.h.bf16 %v2622_v60  ;;  %v2623_v9 = vunpack.i.l.bf16 %v2622_v60  ;;  %v2612_v41 = vpop.permute.xlu1 %2611  ;;  %2492 = vmatmul.msk.bf16.vlgmr.msra.gmra.mxu2 %vm1374_vm7, %v1489_v27  ;;  %v1589_v10 = vsel %vm1374_vm7, %v1584_v0, 0  ;;  %v1622_v0 = vld [vmem:[#allocation5 + $0x1] sm:$0x1] }
 0x5f5   :  { %v2614_v43 = vunpack.i.h.bf16 %v2612_v41  ;;  %v2613_v45 = vunpack.i.l.bf16 %v2612_v41  ;;  %2490 = vmatmul.msk.bf16.vlgmr.msrb.gmra.mxu3 %vm1374_vm7, %v1429_v38  ;;  %v1559_v39 = vsel %vm1374_vm7, %v1554_v6, 0  ;;  %1598 = vmatpush.bf16.xpose.msra.mxu1 %v1589_v10 }
 0x5f6   :  { %v1359_v40 = vpack.c.bf16 %v2624_v52, %v2624_v52  ;;  %v1358_v47 = vpack.c.bf16 %v2623_v9, %v2623_v9  ;;  %1568 = vmatpush.bf16.xpose.msra.mxu0 %v1559_v39  ;;  %v1624_v9 = vsub.f32 1.0, %v1622_v0 }
 0x5f7   :  { %v1345_v31 = vpack.c.bf16 %v2614_v43, %v2614_v43  ;;  %v1344_v8 = vpack.c.bf16 %v2613_v45, %v2613_v45 }
 0x5f8   :  { %v1523_v44 = vunpack.c.l.b16 %v1359_v40  ;;  %v1522_v50 = vunpack.c.l.b16 %v1358_v47  ;;  %v1626_v47 = vmul.f32 -1e+30, %v1624_v9 }
 0x5f9   :  { %v1548_v53 = vunpack.c.l.b16 %v1345_v31  ;;  %v1547_v35 = vunpack.c.l.b16 %v1344_v8 }
 0x5fa   :  { %v1524_v29 = vpack.c.b16 %v1523_v44, %v1522_v50  ;;  %v1390_v42 = vpop.f32.mrf.mxu1  ;;  %v4092_v48 = vperm.slane %v1626_v47, 0 }
 0x5fb   :  { %v1549_v59 = vpack.c.b16 %v1548_v53, %v1547_v35  ;;  %v2632_v62 = vpop.permute.xlu0 %2631  ;;  %v1605_v63 = vmul.f32 0.35355338, %v1390_v42 }
 0x5fc   :  { %v2634_v46 = vunpack.i.h.bf16 %v2632_v62  ;;  %v2633_v4 = vunpack.i.l.bf16 %v2632_v62  ;;  %v2642_v57 = vpop.permute.xlu1 %2641  ;;  %v1529_v7 = vsel %vm1374_vm7, %v1524_v29, 0 }
 0x5fd   :  { %v2644_v26 = vunpack.i.h.bf16 %v2642_v57  ;;  %v2643_v13 = vunpack.i.l.bf16 %v2642_v57  ;;  %2494 = vmatmul.msk.bf16.vlgmr.msra.gmra.mxu0 %vm1374_vm7, %v1549_v59  ;;  %1538 = vmatpush.bf16.xpose.msra.mxu3 %v1529_v7  ;;  %v1633_v61 = vadd.f32 %v4079_v58, %v1605_v63 }
 0x5fe   :  { %v1343_v14 = vpack.c.bf16 %v2634_v46, %v2634_v46  ;;  %v1342_v15 = vpack.c.bf16 %v2633_v4, %v2633_v4 }
 0x5ff   :  { %v1347_v37 = vpack.c.bf16 %v2644_v26, %v2644_v26  ;;  %v1346_v1 = vpack.c.bf16 %v2643_v13, %v2643_v13  ;;  %v1650_v17 = vsel %vm1649_vm10, %v1633_v61, -inf }
 0x600   :  { %v1518_v24 = vunpack.c.l.b16 %v1343_v14  ;;  %v1517_v16 = vunpack.c.l.b16 %v1342_v15  ;;  %1651 = vmax.xlane.f32.xlu0 %v1650_v17 }
 0x601   :  { %v1578_v18 = vunpack.c.l.b16 %v1347_v37  ;;  %v1577_v19 = vunpack.c.l.b16 %v1346_v1 }
 0x602   :  { %v1519_v5 = vpack.c.b16 %v1518_v24, %v1517_v16  ;;  %v1392_v56 = vpop.f32.mrf.mxu1 }
 0x603   :  { %v1579_v22 = vpack.c.b16 %v1578_v18, %v1577_v19  ;;  %v2652_v2 = vpop.permute.xlu0 %2651  ;;  %v1606_v23 = vmul.f32 0.35355338, %v1392_v56 }
 0x604   :  { %v2654_v36 = vunpack.i.h.bf16 %v2652_v2  ;;  %v2653_v54 = vunpack.i.l.bf16 %v2652_v2  ;;  %v2647_v55 = vpop.permute.xlu1 %2646 }
 0x605   :  { %1907 = vmatpush.bf16.msrb.mxu3 %v1895_v30  ;;  %v2649_v27 = vunpack.i.h.bf16 %v2647_v55  ;;  %v2648_v25 = vunpack.i.l.bf16 %v2647_v55  ;;  %2495 = vmatmul.msk.bf16.vlgmr.msra.gmra.mxu1 %vm1374_vm7, %v1579_v22  ;;  %v4088_v6 = vadd.f32 %v4079_v58, %v1606_v23 }
 0x606   :  { %2493 = vmatmul.msk.bf16.vlgmr.msra.gmra.mxu3 %vm1374_vm7, %v1519_v5  ;;  %v1851_v34 = vpack.c.bf16 %v2654_v36, %v2654_v36  ;;  %v1850_v38 = vpack.c.bf16 %v2653_v54, %v2653_v54 }
 0x607   :  { %v1847_v60 = vpack.c.bf16 %v2649_v27, %v2649_v27  ;;  %v1846_v52 = vpack.c.bf16 %v2648_v25, %v2648_v25  ;;  %v1653_v51 = vsel %vm1649_vm10, %v4088_v6, -inf }
 0x608   :  { %v1978_v41 = vunpack.c.l.b16 %v1851_v34  ;;  %v1977_v10 = vunpack.c.l.b16 %v1850_v38  ;;  %1654 = vmax.xlane.f32.xlu2 %v1653_v51 }
 0x609   :  { %v1922_v43 = vunpack.c.l.b16 %v1847_v60  ;;  %v1921_v45 = vunpack.c.l.b16 %v1846_v52 }
 0x60a   :  { %v1979_v39 = vpack.c.b16 %v1978_v41, %v1977_v10 }
 0x60b   :  { %v1923_v40 = vpack.c.b16 %v1922_v43, %v1921_v45 }
 0x60c   :  { %1991 = vmatpush.bf16.msra.mxu2 %v1979_v39 }
 0x60d   :  { %1935 = vmatpush.bf16.msrb.mxu0 %v1923_v40 }
 0x610   :  { %v1420_v12 = vpop.f32.mrf.mxu2 }
 0x611   :  { %v1607_v31 = vmul.f32 0.35355338, %v1420_v12 }
 0x613   :  { %v1635_v8 = vadd.f32 %v4092_v48, %v1607_v31 }
 0x615   :  { %v1656_v44 = vsel %vm1649_vm10, %v1635_v8, -inf }
 0x616   :  { %1657 = vmax.xlane.f32.xlu2 %v1656_v44 }
 0x618   :  { %v1422_v50 = vpop.f32.mrf.mxu2 }
 0x619   :  { %v1608_v11 = vmul.f32 0.35355338, %v1422_v50 }
 0x61b   :  { %v4097_v53 = vadd.f32 %v4092_v48, %v1608_v11 }
 0x61d   :  { %v1659_v35 = vsel %vm1649_vm10, %v4097_v53, -inf }
 0x61e   :  { %1660 = vmax.xlane.f32.xlu1 %v1659_v35 }
 0x673   :  { %v1652_v29 = vpop.xlane.xlu0 %1651 }
 0x674   :  { %v1698_v59 = vsub.f32 %v1633_v61, %v1652_v29  ;;  %v1480_v61 = vpop.f32.mrf.mxu1 }
 0x675   :  { %v1611_v36 = vmul.f32 0.35355338, %v1480_v61 }
 0x676   :  { %v1714_v46 = vmul.f32 1.442695, %v1698_v59 }
 0x677   :  { %v1510_v42 = vpop.f32.mrf.mxu2  ;;  %v4138_v9 = vadd.f32 %v4092_v48, %v1611_v36 }
 0x678   :  { %v1450_v62 = vpop.f32.mrf.mxu3  ;;  %v1613_v30 = vmul.f32 0.35355338, %v1510_v42  ;;  %2749 = vpow2.f32 %v1714_v46 }
 0x679   :  { %v1609_v63 = vmul.f32 0.35355338, %v1450_v62  ;;  %v1668_v45 = vsel %vm1649_vm10, %v4138_v9, -inf }
 0x67a   :  { %v1570_v4 = vpop.f32.mrf.mxu0  ;;  %v4102_v57 = vadd.f32 %v4079_v58, %v1613_v30 }
 0x67b   :  { %v1617_v7 = vmul.f32 0.35355338, %v1570_v4  ;;  %v4105_v26 = vadd.f32 %v4079_v58, %v1609_v63  ;;  %v1655_v24 = vpop.xlane.xlu2 %1654 }
 0x67c   :  { %v1674_v13 = vsel %vm1649_vm10, %v4102_v57, -inf  ;;  %v1699_v23 = vsub.f32 %v4088_v6, %v1655_v24  ;;  %v1482_v27 = vpop.f32.mrf.mxu1 }
 0x67d   :  { %v1662_v14 = vsel %vm1649_vm10, %v4105_v26, -inf  ;;  %1675 = vmax.xlane.f32.xlu0 %v1674_v13  ;;  %v4112_v15 = vadd.f32 %v4079_v58, %v1617_v7  ;;  %v1612_v10 = vmul.f32 0.35355338, %v1482_v27 }
 0x67e   :  { %1663 = vmax.xlane.f32.xlu1 %v1662_v14  ;;  %v4119_v5 = vpop.eup %2749  ;;  %v1716_v60 = vmul.f32 1.442695, %v1699_v23 }
 0x67f   :  { %v1686_v37 = vsel %vm1649_vm10, %v4112_v15, -inf  ;;  %v1512_v22 = vpop.f32.mrf.mxu2  ;;  %v1746_v0 = vsel %vm1649_vm10, %v4119_v5, 0.0  ;;  %v1640_v31 = vadd.f32 %v4092_v48, %v1612_v10 }
 0x680   :  { %v1452_v1 = vpop.f32.mrf.mxu3  ;;  %1687 = vmax.xlane.f32.xlu2 %v1686_v37  ;;  %v1614_v54 = vmul.f32 0.35355338, %v1512_v22  ;;  %2751 = vpow2.f32 %v1716_v60 }
 0x681   :  { %v1610_v16 = vmul.f32 0.35355338, %v1452_v1  ;;  %v1671_v35 = vsel %vm1649_vm10, %v1640_v31, -inf }
 0x682   :  { %v1572_v17 = vpop.f32.mrf.mxu0  ;;  %v4135_v6 = vadd.f32 %v4079_v58, %v1614_v54 }
 0x683   :  { %v1618_v18 = vmul.f32 0.35355338, %v1572_v17  ;;  %v4117_v19 = vadd.f32 %v4079_v58, %v1610_v16 }
 0x684   :  { %v1677_v43 = vsel %vm1649_vm10, %v4135_v6, -inf  ;;  %v1600_v39 = vpop.f32.mrf.mxu1 }
 0x685   :  { %v1665_v56 = vsel %vm1649_vm10, %v4117_v19, -inf  ;;  %v4124_v2 = vadd.f32 %v4079_v58, %v1618_v18  ;;  %v1619_v29 = vmul.f32 0.35355338, %v1600_v39 }
 0x686   :  { %1666 = vmax.xlane.f32.xlu0 %v1665_v56  ;;  %v4151_v50 = vpop.eup %2751 }
 0x687   :  { %v1689_v55 = vsel %vm1649_vm10, %v4124_v2, -inf  ;;  %v1749_v42 = vsel %vm1649_vm10, %v4151_v50, 0.0  ;;  %v4161_v30 = vadd.f32 %v4092_v48, %v1619_v29 }
 0x688   :  { %1690 = vmax.xlane.f32.xlu1 %v1689_v55  ;;  %1747 = vadd.xlane.f32.xlu2 %v1746_v0 }
 0x689   :  { %v1540_v25 = vpop.f32.mrf.mxu3  ;;  %v1658_v38 = vpop.xlane.xlu2 %1657  ;;  %v1692_v13 = vsel %vm1649_vm10, %v4161_v30, -inf }
 0x68a   :  { %v1615_v34 = vmul.f32 0.35355338, %v1540_v25  ;;  %v1700_v41 = vsub.f32 %v1635_v8, %v1658_v38 }
 0x68c   :  { %v4132_v52 = vadd.f32 %v4092_v48, %v1615_v34  ;;  %v1718_v40 = vmul.f32 1.442695, %v1700_v41  ;;  %v1602_v62 = vpop.f32.mrf.mxu1 }
 0x68d   :  { %v1620_v46 = vmul.f32 0.35355338, %v1602_v62 }
 0x68e   :  { %v1680_v51 = vsel %vm1649_vm10, %v4132_v52, -inf  ;;  %2753 = vpow2.f32 %v1718_v40 }
 0x68f   :  { %1681 = vmax.xlane.f32.xlu0 %v1680_v51  ;;  %v4172_v14 = vadd.f32 %v4092_v48, %v1620_v46 }
 0x690   :  { %1678 = vmax.xlane.f32.xlu2 %v1677_v43  ;;  %1669 = vmax.xlane.f32.xlu1 %v1668_v45 }
 0x691   :  { %v1542_v58 = vpop.f32.mrf.mxu3  ;;  %v1661_v12 = vpop.xlane.xlu1 %1660  ;;  %v1695_v61 = vsel %vm1649_vm10, %v4172_v14, -inf }
 0x692   :  { %v1616_v47 = vmul.f32 0.35355338, %v1542_v58  ;;  %v1701_v8 = vsub.f32 %v4097_v53, %v1661_v12 }
 0x694   :  { %v4149_v44 = vadd.f32 %v4092_v48, %v1616_v47  ;;  %v1720_v11 = vmul.f32 1.442695, %v1701_v8  ;;  %v4158_v53 = vpop.eup %2753 }
 0x695   :  { %v1752_v4 = vsel %vm1649_vm10, %v4158_v53, 0.0 }
 0x696   :  { %2755 = vpow2.f32 %v1720_v11  ;;  %v1683_v59 = vsel %vm1649_vm10, %v4149_v44, -inf }
 0x697   :  { %1672 = vmax.xlane.f32.xlu0 %v1671_v35 }
 0x698   :  { %1684 = vmax.xlane.f32.xlu2 %v1683_v59  ;;  %1750 = vadd.xlane.f32.xlu1 %v1749_v42 }
 0x69c   :  { %v4163_v63 = vpop.eup %2755 }
 0x69d   :  { %v1755_v7 = vsel %vm1649_vm10, %v4163_v63, 0.0 }
 0x69f   :  { %1753 = vadd.xlane.f32.xlu0 %v1752_v4 }
 0x6a0   :  { %1756 = vadd.xlane.f32.xlu2 %v1755_v7  ;;  %1693 = vmax.xlane.f32.xlu1 %v1692_v13 }
 0x6a7   :  { %1696 = vmax.xlane.f32.xlu0 %v1695_v61 }
 0x6f0   :  { %v1676_v37 = vpop.xlane.xlu0 %1675 }
 0x6f1   :  { %v1664_v1 = vpop.xlane.xlu1 %1663  ;;  %v1706_v18 = vsub.f32 %v4102_v57, %v1676_v37 }
 0x6f2   :  { %v1702_v24 = vsub.f32 %v4105_v26, %v1664_v1 }
 0x6f3   :  { %v1688_v16 = vpop.xlane.xlu2 %1687  ;;  %v1730_v23 = vmul.f32 1.442695, %v1706_v18 }
 0x6f4   :  { %v1722_v17 = vmul.f32 1.442695, %v1702_v24  ;;  %v1710_v22 = vsub.f32 %v4112_v15, %v1688_v16 }
 0x6f6   :  { %2757 = vpow2.f32 %v1722_v17  ;;  %v1738_v56 = vmul.f32 1.442695, %v1710_v22 }
 0x6f8   :  { %2759 = vpow2.f32 %v1738_v56 }
 0x6f9   :  { %v4179_v48 = vpop.xlane.xlu0 %1666  ;;  %2761 = vpow2.f32 %v1730_v23 }
 0x6fb   :  { %v4181_v36 = vpop.xlane.xlu1 %1690  ;;  %v1748_v54 = vpop.xlane.xlu2 %1747 }
 0x6fc   :  { %v4183_v55 = vpop.eup %2757  ;;  %2763 = vrcp.f32 %v1748_v54  ;;  %v1703_v54 = vsub.f32 %v4117_v19, %v4179_v48 }
 0x6fd   :  { %v1758_v26 = vsel %vm1649_vm10, %v4183_v55, 0.0 }
 0x6fe   :  { %v4187_v0 = vpop.eup %2759  ;;  %1759 = vadd.xlane.f32.xlu0 %v1758_v26  ;;  %v1724_v26 = vmul.f32 1.442695, %v1703_v54 }
 0x6ff   :  { %v1782_v57 = vsel %vm1649_vm10, %v4187_v0, 0.0  ;;  %v4191_v27 = vpop.eup %2761 }
 0x700   :  { %1783 = vadd.xlane.f32.xlu2 %v1782_v57  ;;  %v1770_v38 = vsel %vm1649_vm10, %v4191_v27, 0.0 }
 0x702   :  { %v1682_v15 = vpop.xlane.xlu0 %1681  ;;  %v2764_v43 = vpop.eup %2763 }
 0x703   :  { %v4193_v25 = vpop.xlane.xlu2 %1678  ;;  %v4195_v34 = vpop.xlane.xlu1 %1669  ;;  %v1810_v40 = vmul.f32 %v2764_v43, %v4119_v5  ;;  %v1708_v22 = vsub.f32 %v4132_v52, %v1682_v15 }
 0x705   :  { %v1826_v8 = vpack.c.bf16 %v1810_v40, %v1810_v40  ;;  %v1734_v23 = vmul.f32 1.442695, %v1708_v22 }
 0x706   :  { %1771 = vadd.xlane.f32.xlu0 %v1770_v38  ;;  %v1707_v38 = vsub.f32 %v4135_v6, %v4193_v25  ;;  %v1704_v6 = vsub.f32 %v4138_v9, %v4195_v34 }
 0x707   :  { %v1860_v5 = vunpack.c.l.b16 %v1826_v8 }
 0x708   :  { %v1726_v25 = vmul.f32 1.442695, %v1704_v6 }
 0x70a   :  { %v1673_v60 = vpop.xlane.xlu0 %1672 }
 0x70b   :  { %v1705_v41 = vsub.f32 %v1640_v31, %v1673_v60  ;;  %v1685_v10 = vpop.xlane.xlu2 %1684  ;;  %v1751_v51 = vpop.xlane.xlu1 %1750 }
 0x70c   :  { %v1709_v39 = vsub.f32 %v4149_v44, %v1685_v10  ;;  %2765 = vrcp.f32 %v1751_v51 }
 0x70d   :  { %v1728_v45 = vmul.f32 1.442695, %v1705_v41 }
 0x70e   :  { %v1736_v58 = vmul.f32 1.442695, %v1709_v39 }
 0x70f   :  { %2767 = vpow2.f32 %v1728_v45 }
 0x712   :  { %v1754_v47 = vpop.xlane.xlu0 %1753  ;;  %v2766_v12 = vpop.eup %2765 }
 0x713   :  { %2769 = vrcp.f32 %v1754_v47  ;;  %v1811_v11 = vmul.f32 %v2766_v12, %v4151_v50  ;;  %v1757_v35 = vpop.xlane.xlu2 %1756  ;;  %v1694_v31 = vpop.xlane.xlu1 %1693 }
 0x714   :  { %2771 = vpow2.f32 %v1736_v58  ;;  %v1712_v59 = vsub.f32 %v4161_v30, %v1694_v31 }
 0x715   :  { %v4202_v29 = vpop.eup %2767  ;;  %2773 = vrcp.f32 %v1757_v35  ;;  %v1827_v44 = vpack.c.bf16 %v1811_v11, %v1811_v11 }
 0x716   :  { %v1767_v42 = vsel %vm1649_vm10, %v4202_v29, 0.0  ;;  %v1742_v4 = vmul.f32 1.442695, %v1712_v59 }
 0x717   :  { %1768 = vadd.xlane.f32.xlu1 %v1767_v42  ;;  %v1861_v62 = vunpack.c.l.b16 %v1827_v44 }
 0x718   :  { %2661 = vrot.lane.b32.xlu2 %v4028_v28, %s3403_s21  ;;  %2775 = vpow2.f32 %v1742_v4 }
 0x719   :  { %v2770_v46 = vpop.eup %2769  ;;  %v1862_v7 = vpack.c.b16 %v1861_v62, %v1860_v5 }
 0x71a   :  { %v4209_v50 = vpop.eup %2771  ;;  %v1812_v13 = vmul.f32 %v2770_v46, %v4158_v53  ;;  %2656 = vrot.lane.b32.xlu0 %v4048_v32, %s3402_s14  ;;  %v1697_v9 = vpop.xlane.xlu0 %1696 }
 0x71b   :  { %v2774_v61 = vpop.eup %2773  ;;  %2496 = vmatmul.msk.bf16.vlgmr.msrb.gmra.mxu2 %vm1649_vm10, %v1862_v7  ;;  %v1779_v24 = vsel %vm1649_vm10, %v4209_v50, 0.0  ;;  %v1713_v31 = vsub.f32 %v4172_v14, %v1697_v9 }
 0x71c   :  { %v1828_v30 = vpack.c.bf16 %v1812_v13, %v1812_v13  ;;  %v1813_v37 = vmul.f32 %v2774_v61, %v4163_v63  ;;  %v1711_v63 = vsub.f32 %v4124_v2, %v4181_v36  ;;  %v1732_v36 = vmul.f32 1.442695, %v1707_v38 }
 0x71d   :  { %v1744_v59 = vmul.f32 1.442695, %v1713_v31 }
 0x71e   :  { %v1829_v1 = vpack.c.bf16 %v1813_v37, %v1813_v37  ;;  %v1888_v28 = vunpack.c.l.b16 %v1828_v30  ;;  %v4218_v18 = vpop.eup %2775  ;;  %v1740_v56 = vmul.f32 1.442695, %v1711_v63 }
 0x71f   :  { %1780 = vadd.xlane.f32.xlu1 %v1779_v24  ;;  %v1788_v53 = vsel %vm1649_vm10, %v4218_v18, 0.0 }
 0x720   :  { %v1889_v16 = vunpack.c.l.b16 %v1829_v1  ;;  %2777 = vpow2.f32 %v1740_v56 }
 0x721   :  { %2779 = vpow2.f32 %v1734_v23 }
 0x722   :  { %v1890_v17 = vpack.c.b16 %v1889_v16, %v1888_v28  ;;  %2781 = vpow2.f32 %v1724_v26 }
 0x723   :  { %2783 = vpow2.f32 %v1732_v36 }
 0x724   :  { %2497 = vmatmul.msk.bf16.vlgmr.msrb.gmra.mxu3 %vm1649_vm10, %v1890_v17  ;;  %2785 = vpow2.f32 %v1726_v25 }
 0x725   :  { %2787 = vpow2.f32 %v1744_v59 }
 0x726   :  { %v4228_v57 = vpop.eup %2777 }
 0x727   :  { %1789 = vadd.xlane.f32.xlu1 %v1788_v53  ;;  %v4234_v2 = vpop.eup %2779  ;;  %v1785_v52 = vsel %vm1649_vm10, %v4228_v57, 0.0 }
 0x728   :  { %v1776_v19 = vsel %vm1649_vm10, %v4234_v2, 0.0  ;;  %v4240_v48 = vpop.eup %2781 }
 0x729   :  { %v1761_v15 = vsel %vm1649_vm10, %v4240_v48, 0.0  ;;  %v4246_v60 = vpop.eup %2783 }
 0x72a   :  { %v1773_v41 = vsel %vm1649_vm10, %v4246_v60, 0.0  ;;  %v4250_v10 = vpop.eup %2785 }
 0x72b   :  { %v1764_v51 = vsel %vm1649_vm10, %v4250_v10, 0.0  ;;  %v4257_v61 = vpop.eup %2787 }
 0x72c   :  { %v1791_v30 = vsel %vm1649_vm10, %v4257_v61, 0.0 }
 0x740   :  { %2671 = vrot.lane.b32.xlu1 %v4048_v32, %s3403_s21 }
 0x741   :  { %1786 = vadd.xlane.f32.xlu2 %v1785_v52 }
 0x744   :  { %1777 = vadd.xlane.f32.xlu0 %v1776_v19 }
 0x749   :  { %1762 = vadd.xlane.f32.xlu2 %v1761_v15 }
 0x751   :  { %1774 = vadd.xlane.f32.xlu2 %v1773_v41 }
 0x759   :  { %1765 = vadd.xlane.f32.xlu2 %v1764_v51 }
 0x771   :  { %2666 = vrot.lane.b32.xlu2 %v4048_v32, %s3401_s27  ;;  %v1760_v43 = vpop.xlane.xlu0 %1759 }
 0x772   :  { %2789 = vrcp.f32 %v1760_v43 }
 0x773   :  { %v1784_v34 = vpop.xlane.xlu2 %1783 }
 0x778   :  { %v2790_v54 = vpop.eup %2789 }
 0x779   :  { %v1772_v35 = vpop.xlane.xlu0 %1771  ;;  %v1814_v26 = vmul.f32 %v2790_v54, %v4183_v55 }
 0x77b   :  { %v2662_v45 = vpop.permute.xlu2 %2661  ;;  %v1830_v52 = vpack.c.bf16 %v1814_v26, %v1814_v26 }
 0x77c   :  { %v2664_v39 = vunpack.i.h.bf16 %v2662_v45  ;;  %v2663_v40 = vunpack.i.l.bf16 %v2662_v45 }
 0x77d   :  { %v1916_v41 = vunpack.c.l.b16 %v1830_v52 }
 0x77e   :  { %v1855_v58 = vpack.c.bf16 %v2664_v39, %v2664_v39  ;;  %v1854_v47 = vpack.c.bf16 %v2663_v40, %v2663_v40 }
 0x780   :  { %v2034_v12 = vunpack.c.l.b16 %v1855_v58  ;;  %v2033_v8 = vunpack.c.l.b16 %v1854_v47 }
 0x782   :  { %v2035_v11 = vpack.c.b16 %v2034_v12, %v2033_v8 }
 0x784   :  { %2047 = vmatpush.bf16.msra.mxu0 %v2035_v11 }
 0x78a   :  { %v1769_v13 = vpop.xlane.xlu1 %1768 }
 0x78c   :  { %v2657_v44 = vpop.permute.xlu0 %2656 }
 0x78d   :  { %v2659_v42 = vunpack.i.h.bf16 %v2657_v44  ;;  %v2658_v5 = vunpack.i.l.bf16 %v2657_v44 }
 0x78f   :  { %v1849_v32 = vpack.c.bf16 %v2659_v42, %v2659_v42  ;;  %v1848_v62 = vpack.c.bf16 %v2658_v5, %v2658_v5 }
 0x791   :  { %v1950_v46 = vunpack.c.l.b16 %v1849_v32  ;;  %v1949_v4 = vunpack.c.l.b16 %v1848_v62 }
 0x792   :  { %v1781_v37 = vpop.xlane.xlu1 %1780 }
 0x793   :  { %v1951_v7 = vpack.c.b16 %v1950_v46, %v1949_v4 }
 0x795   :  { %1963 = vmatpush.bf16.msrb.mxu1 %v1951_v7 }
 0x79a   :  { %1792 = vadd.xlane.f32.xlu2 %v1791_v30  ;;  %v4261_v14 = vpop.xlane.xlu1 %1789 }
 0x7b2   :  { %v2672_v1 = vpop.permute.xlu1 %2671 }
 0x7b3   :  { %v2674_v24 = vunpack.i.h.bf16 %v2672_v1  ;;  %v2673_v28 = vunpack.i.l.bf16 %v2672_v1 }
 0x7b4   :  { %v1787_v53 = vpop.xlane.xlu2 %1786 }
 0x7b5   :  { %v1857_v16 = vpack.c.bf16 %v2674_v24, %v2674_v24  ;;  %v1856_v17 = vpack.c.bf16 %v2673_v28, %v2673_v28 }
 0x7b7   :  { %v2062_v63 = vunpack.c.l.b16 %v1857_v16  ;;  %v2061_v22 = vunpack.c.l.b16 %v1856_v17  ;;  %v1778_v15 = vpop.xlane.xlu0 %1777 }
 0x7b9   :  { %v2063_v56 = vpack.c.b16 %v2062_v63, %v2061_v22 }
 0x7bb   :  { %2075 = vmatpush.bf16.msra.mxu1 %v2063_v56 }
 0x7bc   :  { %v1763_v23 = vpop.xlane.xlu2 %1762 }
 0x7bd   :  { %2791 = vrcp.f32 %v1763_v23 }
 0x7be   :  { %2793 = vrcp.f32 %v1772_v35 }
 0x7bf   :  { %2795 = vrcp.f32 %v1787_v53 }
 0x7c3   :  { %v2792_v38 = vpop.eup %2791 }
 0x7c4   :  { %v1815_v36 = vmul.f32 %v2792_v38, %v4240_v48  ;;  %v1775_v19 = vpop.xlane.xlu2 %1774  ;;  %v2794_v6 = vpop.eup %2793 }
 0x7c5   :  { %2797 = vrcp.f32 %v1775_v19  ;;  %v1818_v51 = vmul.f32 %v2794_v6, %v4191_v27  ;;  %v2796_v43 = vpop.eup %2795 }
 0x7c6   :  { %2799 = vrcp.f32 %v1784_v34  ;;  %v1831_v25 = vpack.c.bf16 %v1815_v36, %v1815_v36  ;;  %v1823_v47 = vmul.f32 %v2796_v43, %v4228_v57 }
 0x7c7   :  { %2801 = vrcp.f32 %v1769_v13  ;;  %v1834_v40 = vpack.c.bf16 %v1818_v51, %v1818_v51  ;;  %v1881_v51 = vpop.f32.mrf.mxu2 }
 0x7c8   :  { %v1917_v9 = vunpack.c.l.b16 %v1831_v25  ;;  %2803 = vrcp.f32 %v1778_v15  ;;  %v1839_v44 = vpack.c.bf16 %v1823_v47, %v1823_v47 }
 0x7c9   :  { %2805 = vrcp.f32 %v1781_v37  ;;  %v1972_v11 = vunpack.c.l.b16 %v1834_v40 }
 0x7ca   :  { %v1918_v45 = vpack.c.b16 %v1917_v9, %v1916_v41  ;;  %v2029_v13 = vunpack.c.l.b16 %v1839_v44 }
 0x7cb   :  { %v2798_v55 = vpop.eup %2797 }
 0x7cc   :  { %v2800_v39 = vpop.eup %2799  ;;  %v1819_v48 = vmul.f32 %v2798_v55, %v4246_v60  ;;  %v1766_v58 = vpop.xlane.xlu2 %1765  ;;  %2498 = vmatmul.msk.bf16.vlgmr.msrb.gmra.mxu0 %vm1649_vm10, %v1918_v45 }
 0x7cd   :  { %v2802_v34 = vpop.eup %2801  ;;  %2807 = vrcp.f32 %v1766_v58  ;;  %v1822_v27 = vmul.f32 %v2800_v39, %v4187_v0  ;;  %v1909_v45 = vpop.f32.mrf.mxu3 }
 0x7ce   :  { %v1835_v12 = vpack.c.bf16 %v1819_v48, %v1819_v48  ;;  %v2804_v8 = vpop.eup %2803  ;;  %v1817_v35 = vmul.f32 %v2802_v34, %v4202_v29  ;;  %2809 = vrcp.f32 %v4261_v14 }
 0x7cf   :  { %v2806_v59 = vpop.eup %2805  ;;  %v1820_v42 = vmul.f32 %v2804_v8, %v4234_v2  ;;  %v1838_v32 = vpack.c.bf16 %v1822_v27, %v1822_v27  ;;  %v1883_v43 = vpop.f32.mrf.mxu2 }
 0x7d0   :  { %v1973_v31 = vunpack.c.l.b16 %v1835_v12  ;;  %v1833_v62 = vpack.c.bf16 %v1817_v35, %v1817_v35  ;;  %v1821_v46 = vmul.f32 %v2806_v59, %v4209_v50 }
 0x7d1   :  { %v1836_v29 = vpack.c.bf16 %v1820_v42, %v1820_v42  ;;  %v2028_v24 = vunpack.c.l.b16 %v1838_v32  ;;  %v2545_v42 = vld [vmem:[#allocation26 + $0x8] sm:$0xff] }
 0x7d2   :  { %v1974_v60 = vpack.c.b16 %v1973_v31, %v1972_v11  ;;  %v1945_v2 = vunpack.c.l.b16 %v1833_v62  ;;  %v1837_v28 = vpack.c.bf16 %v1821_v46, %v1821_v46  ;;  %2177 = vmatpush.bf16.msrb.mxu2 %v2545_v42 }
 0x7d3   :  { %v2808_v5 = vpop.eup %2807  ;;  %v2030_v63 = vpack.c.b16 %v2029_v13, %v2028_v24  ;;  %v2000_v50 = vunpack.c.l.b16 %v1836_v29 }
 0x7d4   :  { %v1816_v57 = vmul.f32 %v2808_v5, %v4250_v10  ;;  %v2667_v4 = vpop.permute.xlu2 %2666  ;;  %2500 = vmatmul.msk.bf16.vlgmr.msra.gmra.mxu2 %vm1649_vm10, %v1974_v60  ;;  %v2001_v56 = vunpack.c.l.b16 %v1837_v28  ;;  %v2810_v26 = vpop.eup %2809  ;;  %v2544_v60 = vld [vmem:[#allocation26] sm:$0xff] }
 0x7d5   :  { %v2669_v0 = vunpack.i.h.bf16 %v2667_v4  ;;  %v2668_v7 = vunpack.i.l.bf16 %v2667_v4  ;;  %v1824_v38 = vmul.f32 %v2810_v26, %v4218_v18  ;;  %v1911_v40 = vpop.f32.mrf.mxu3 }
 0x7d6   :  { %v1832_v30 = vpack.c.bf16 %v1816_v57, %v1816_v57  ;;  %v2002_v23 = vpack.c.b16 %v2001_v56, %v2000_v50  ;;  %2178 = vmatpush.bf16.msrb.mxu2 %v2544_v60 }
 0x7d7   :  { %v1853_v37 = vpack.c.bf16 %v2669_v0, %v2669_v0  ;;  %v1852_v1 = vpack.c.bf16 %v2668_v7, %v2668_v7  ;;  %v1840_v36 = vpack.c.bf16 %v1824_v38, %v1824_v38 }
 0x7d8   :  { %v1944_v16 = vunpack.c.l.b16 %v1832_v30 }
 0x7d9   :  { %v2006_v17 = vunpack.c.l.b16 %v1853_v37  ;;  %v2005_v53 = vunpack.c.l.b16 %v1852_v1  ;;  %v2056_v15 = vunpack.c.l.b16 %v1840_v36 }
 0x7da   :  { %v1946_v22 = vpack.c.b16 %v1945_v2, %v1944_v16 }
 0x7db   :  { %v2007_v10 = vpack.c.b16 %v2006_v17, %v2005_v53 }
 0x7dc   :  { %2499 = vmatmul.msk.bf16.vlgmr.msrb.gmra.mxu1 %vm1649_vm10, %v1946_v22  ;;  %2502 = vmatmul.msk.bf16.vlgmr.msra.gmra.mxu0 %vm1649_vm10, %v2030_v63 }
 0x7dd   :  { %2019 = vmatpush.bf16.msra.mxu3 %v2007_v10 }
 0x7e0   :  { %2501 = vmatmul.msk.bf16.vlgmr.msra.gmra.mxu3 %vm1649_vm10, %v2002_v23 }
 0x80d   :  { %v1793_v54 = vpop.xlane.xlu2 %1792 }
 0x80e   :  { %2811 = vrcp.f32 %v1793_v54 }
 0x814   :  { %v2812_v52 = vpop.eup %2811 }
 0x815   :  { %v1825_v19 = vmul.f32 %v2812_v52, %v4257_v61 }
 0x817   :  { %v1841_v6 = vpack.c.bf16 %v1825_v19, %v1825_v19 }
 0x819   :  { %v2057_v25 = vunpack.c.l.b16 %v1841_v6 }
 0x81b   :  { %v2058_v41 = vpack.c.b16 %v2057_v25, %v2056_v15  ;;  %v2718_v15 = vld [vmem:[#allocation28] ss:$0 sm:$0xff] }
 0x81d   :  { %2503 = vmatmul.msk.bf16.vlgmr.msra.gmra.mxu1 %vm1649_vm10, %v2058_v41 }
 0x849   :  { %v1937_v9 = vpop.f32.mrf.mxu0 }
 0x851   :  { %v1939_v14 = vpop.f32.mrf.mxu0 }
 0x852   :  { %v2675_v55 = vpack.i.bf16 %v1939_v14, %v1937_v9 }
 0x854   :  { %2676 = vrot.lane.b32.xlu0 %v2675_v55, %s3389_s25 }
 0x857   :  { %v1993_v39 = vpop.f32.mrf.mxu2 }
 0x859   :  { %v2049_v18 = vpop.f32.mrf.mxu0  ;;  %v1965_v48 = vpop.f32.mrf.mxu1 }
 0x85f   :  { %v1995_v58 = vpop.f32.mrf.mxu2 }
 0x860   :  { %v2680_v61 = vpack.i.bf16 %v1995_v58, %v1993_v39 }
 0x861   :  { %v2051_v34 = vpop.f32.mrf.mxu0  ;;  %v1967_v8 = vpop.f32.mrf.mxu1 }
 0x862   :  { %v2685_v47 = vpack.i.bf16 %v2051_v34, %v2049_v18  ;;  %2681 = vrot.lane.b32.xlu1 %v2680_v61, %s3374_s4  ;;  %v2690_v27 = vpack.i.bf16 %v1967_v8, %v1965_v48 }
 0x863   :  { %v2021_v12 = vpop.f32.mrf.mxu3 }
 0x864   :  { %2686 = vrot.lane.b32.xlu0 %v2685_v47, %s3404_s29 }
 0x86a   :  { %2691 = vrot.lane.b32.xlu1 %v2690_v27, %s3389_s25 }
 0x86b   :  { %v2023_v11 = vpop.f32.mrf.mxu3 }
 0x86c   :  { %v2695_v35 = vpack.i.bf16 %v2023_v11, %v2021_v12 }
 0x86e   :  { %2696 = vrot.lane.b32.xlu0 %v2695_v35, %s3374_s4 }
 0x89a   :  { %v2077_v31 = vpop.f32.mrf.mxu1 }
 0x8a2   :  { %v2079_v59 = vpop.f32.mrf.mxu1 }
 0x8a3   :  { %v2700_v44 = vpack.i.bf16 %v2079_v59, %v2077_v31 }
 0x8a5   :  { %2701 = vrot.lane.b32.xlu2 %v2700_v44, %s3404_s29 }
 0x8c6   :  { %v2677_v5 = vpop.permute.xlu0 %2676 }
 0x8c7   :  { %v2679_v32 = vunpack.i.h.bf16 %v2677_v5  ;;  %v2678_v62 = vunpack.i.l.bf16 %v2677_v5 }
 0x8c9   :  { %v2131_v0 = vsel %vm1374_vm7, %v1883_v43, %v2679_v32  ;;  %v2130_v7 = vsel %vm1374_vm7, %v1881_v51, %v2678_v62 }
 0x8d4   :  { %v2682_v46 = vpop.permute.xlu1 %2681 }
 0x8d5   :  { %v2684_v57 = vunpack.i.h.bf16 %v2682_v46  ;;  %v2683_v4 = vunpack.i.l.bf16 %v2682_v46 }
 0x8d6   :  { %v2687_v13 = vpop.permute.xlu0 %2686 }
 0x8d7   :  { %v2134_v29 = vsel %vm1649_vm10, %v2130_v7, %v2683_v4  ;;  %v2135_v30 = vsel %vm1649_vm10, %v2131_v0, %v2684_v57  ;;  %v2689_v37 = vunpack.i.h.bf16 %v2687_v13  ;;  %v2688_v1 = vunpack.i.l.bf16 %v2687_v13 }
 0x8d9   :  { %v2139_v24 = vsel %vm2138_vm11, %v2134_v29, %v2688_v1  ;;  %v2140_v2 = vsel %vm2138_vm11, %v2135_v30, %v2689_v37  ;;  %v2547_v29 = vld [vmem:[#allocation32 + $0x8] sm:$0xff]  ;;  %v2546_v30 = vld [vmem:[#allocation32] sm:$0xff] }
 0x8da   :  { %v2147_v28 = vpack.c.bf16 %v2140_v2, %v2139_v24  ;;  %2332 = vmatpush.bf16.msrb.mxu3 %v2547_v29 }
 0x8dc   :  { %2512 = vmatmul.msk.bf16.vlgmr.msrb.gmra.mxu2 %vm4439_vm13, %v2147_v28  ;;  %v2692_v16 = vpop.permute.xlu1 %2691  ;;  %vm4449_vm13 = vmmov %vm4440_vm0 }
 0x8dd   :  { %v2694_v53 = vunpack.i.h.bf16 %v2692_v16  ;;  %v2693_v63 = vunpack.i.l.bf16 %v2692_v16 }
 0x8de   :  { %2333 = vmatpush.bf16.msrb.mxu3 %v2546_v30 }
 0x8df   :  { %v2133_v56 = vsel %vm1374_vm7, %v1911_v40, %v2694_v53  ;;  %v2132_v23 = vsel %vm1374_vm7, %v1909_v45, %v2693_v63 }
 0x8e0   :  { %v2697_v17 = vpop.permute.xlu0 %2696 }
 0x8e1   :  { %v2699_v50 = vunpack.i.h.bf16 %v2697_v17  ;;  %v2698_v22 = vunpack.i.l.bf16 %v2697_v17 }
 0x8e3   :  { %v2136_v38 = vsel %vm1649_vm10, %v2132_v23, %v2698_v22  ;;  %v2137_v52 = vsel %vm1649_vm10, %v2133_v56, %v2699_v50 }
 0x8ff   :  { %v2702_v10 = vpop.permute.xlu2 %2701 }
 0x900   :  { %v2704_v54 = vunpack.i.h.bf16 %v2702_v10  ;;  %v2703_v26 = vunpack.i.l.bf16 %v2702_v10 }
 0x902   :  { %v2141_v36 = vsel %vm2138_vm11, %v2136_v38, %v2703_v26  ;;  %v2142_v19 = vsel %vm2138_vm11, %v2137_v52, %v2704_v54  ;;  %v2719_v26 = vld [vmem:[#allocation29] ss:$0 sm:$0xff] }
 0x903   :  { %v2148_v6 = vpack.c.bf16 %v2142_v19, %v2141_v36  ;;  %v2720_v19 = vld [vmem:[#allocation31] ss:$0 sm:$0xff] }
 0x905   :  { %2513 = vmatmul.msk.bf16.gmra.mxu2 %vm4440_vm0, %v2148_v6 }
 0x95f   :  { %v2180_v25 = vpop.f32.mrf.mxu2 }
 0x960   :  { %v2181_v41 = vadd.f32 %v2718_v15, %v2180_v25 }
 0x962   :  { %v4301_v51 = vadd.f32 %v2181_v41, %v3967_v49 }
 0x964   :  { %v2196_v9 = vsel %vm4441_vm8, %v4301_v51, 0.0 }
 0x965   :  { %2197 = vadd.xlane.f32.xlu1 %v2196_v9 }
 0x967   :  { %v2182_v43 = vpop.f32.mrf.mxu2 }
 0x968   :  { %v2183_v45 = vadd.f32 %v2718_v15, %v2182_v43 }
 0x96a   :  { %v4306_v14 = vadd.f32 %v2183_v45, %v3972_v3 }
 0x96c   :  { %v2199_v55 = vsel %vm4442_vm9, %v4306_v14, 0.0 }
 0x96d   :  { %2200 = vadd.xlane.f32.xlu0 %v2199_v55 }
 0x988   :  { %v2185_v39 = vpop.f32.mrf.mxu2 }
 0x989   :  { %v2186_v18 = vadd.f32 %v2718_v15, %v2185_v39 }
 0x98b   :  { %v4311_v40 = vadd.f32 %v2186_v18, %v3977_v21 }
 0x98d   :  { %v2202_v49 = vsel %vm4443_vm12, %v4311_v40, 0.0 }
 0x98e   :  { %2203 = vadd.xlane.f32.xlu2 %v2202_v49 }
 0x990   :  { %v2187_v48 = vpop.f32.mrf.mxu2 }
 0x991   :  { %v2188_v58 = vadd.f32 %v2718_v15, %v2187_v48 }
 0x993   :  { %v4316_v61 = vadd.f32 %v2188_v58, %v3982_v33 }
 0x995   :  { %v2205_v3 = vsel %vm4444_vm2, %v4316_v61, 0.0 }
 0x996   :  { %2206 = vadd.xlane.f32.xlu1 %v2205_v3 }
 0x9d8   :  { %v2198_v34 = vpop.xlane.xlu1 %2197 }
 0x9d9   :  { %v2208_v47 = vmul.f32 %v2198_v34, %v3651_v20 }
 0x9db   :  { %v2212_v12 = vsub.f32 %v4301_v51, %v2208_v47 }
 0x9dd   :  { %v2216_v21 = vmul.f32 %v2212_v12, %v2212_v12 }
 0x9df   :  { %v2220_v8 = vsel %vm4445_vm3, %v2216_v21, 0.0 }
 0x9e0   :  { %v2201_v27 = vpop.xlane.xlu0 %2200  ;;  %2221 = vadd.xlane.f32.xlu0 %v2220_v8 }
 0x9e1   :  { %v2209_v11 = vmul.f32 %v2201_v27, %v3651_v20 }
 0x9e3   :  { %v2213_v35 = vsub.f32 %v4306_v14, %v2209_v11 }
 0x9e5   :  { %v2217_v33 = vmul.f32 %v2213_v35, %v2213_v35 }
 0x9e7   :  { %v2223_v31 = vsel %vm4446_vm4, %v2217_v33, 0.0 }
 0x9e8   :  { %2224 = vadd.xlane.f32.xlu1 %v2223_v31 }
 0xa01   :  { %v2204_v59 = vpop.xlane.xlu2 %2203 }
 0xa02   :  { %v2210_v44 = vmul.f32 %v2204_v59, %v3651_v20 }
 0xa04   :  { %v4328_v42 = vsub.f32 %v4311_v40, %v2210_v44 }
 0xa06   :  { %v2218_v60 = vmul.f32 %v4328_v42, %v4328_v42 }
 0xa08   :  { %v2226_v5 = vsel %vm4447_vm5, %v2218_v60, 0.0  ;;  %vm4450_vm5 = vmmov %vm4446_vm4 }
 0xa09   :  { %v2207_v32 = vpop.xlane.xlu1 %2206  ;;  %2227 = vadd.xlane.f32.xlu0 %v2226_v5 }
 0xa0a   :  { %v2211_v62 = vmul.f32 %v2207_v32, %v3651_v20 }
 0xa0c   :  { %v4335_v46 = vsub.f32 %v4316_v61, %v2211_v62 }
 0xa0e   :  { %v2219_v57 = vmul.f32 %v4335_v46, %v4335_v46 }
 0xa10   :  { %v2229_v4 = vsel %vm4448_vm6, %v2219_v57, 0.0  ;;  %vm4451_vm6 = vmmov %vm4446_vm4 }
 0xa11   :  { %2230 = vadd.xlane.f32.xlu1 %v2229_v4 }
 0xa53   :  { %v2222_v0 = vpop.xlane.xlu0 %2221 }
 0xa54   :  { %v2232_v7 = vmul.f32 %v2222_v0, %v3651_v20  ;;  %v2549_v0 = vld [vmem:[%s4396_s23 + $0x8] sm:$0xff] }
 0xa55   :  { %2383 = vmatpush.bf16.msrb.mxu0 %v2549_v0 }
 0xa56   :  { %v2236_v13 = vadd.f32 1e-05, %v2232_v7 }
 0xa58   :  { %2813 = vrsqrt.f32 %v2236_v13  ;;  %vm2246_vm15 = vweird.f32 %v2236_v13 }
 0xa5b   :  { %v2225_v37 = vpop.xlane.xlu1 %2224 }
 0xa5c   :  { %v2233_v1 = vmul.f32 %v2225_v37, %v3651_v20 }
 0xa5e   :  { %v2814_v24 = vpop.eup %2813  ;;  %v2237_v2 = vadd.f32 1e-05, %v2233_v1 }
 0xa5f   :  { %v2241_v28 = vmul.f32 %v2814_v24, %v2236_v13  ;;  %vm2247_vm14 = vweird.f32 %v2814_v24  ;;  %v2721_v13 = vld [vmem:[#allocation34] ss:$0 sm:$0xff] }
 0xa60   :  { %2815 = vrsqrt.f32 %v2237_v2  ;;  %vm2248_vm1 = vmor %vm2246_vm15, %vm2247_vm14  ;;  %vm2256_vm10 = vweird.f32 %v2237_v2 }
 0xa61   :  { %v2242_v16 = vmul.f32 %v2814_v24, %v2241_v28  ;;  %vm4453_vm14 = vmmov %vm4446_vm4 }
 0xa62   :  { %vm4454_vm15 = vmmov %vm4446_vm4 }
 0xa63   :  { %v2243_v17 = vmul.f32 0.5, %v2242_v16 }
 0xa65   :  { %v2244_v53 = vsub.f32 1.5, %v2243_v17 }
 0xa66   :  { %v2816_v63 = vpop.eup %2815 }
 0xa67   :  { %v2245_v50 = vmul.f32 %v2814_v24, %v2244_v53  ;;  %v2251_v22 = vmul.f32 %v2816_v63, %v2237_v2  ;;  %vm2257_vm7 = vweird.f32 %v2816_v63 }
 0xa68   :  { %vm2258_vm11 = vmor %vm2256_vm10, %vm2257_vm7 }
 0xa69   :  { %v2252_v10 = vmul.f32 %v2816_v63, %v2251_v22  ;;  %v2249_v56 = vsel %vm2248_vm1, %v2814_v24, %v2245_v50  ;;  %v2722_v22 = vld [vmem:[%s4452_s7] ss:$0 sm:$0xff]  ;;  %vm4455_vm1 = vmmov %vm4446_vm4 }
 0xa6a   :  { %v2280_v38 = vmul.f32 %v2249_v56, %v2212_v12  ;;  %vm4457_vm7 = vmmov %vm4455_vm1 }
 0xa6b   :  { %v2253_v23 = vmul.f32 0.5, %v2252_v10 }
 0xa6c   :  { %v2287_v6 = vmul.f32 %v2719_v26, %v2280_v38 }
 0xa6d   :  { %v2254_v54 = vsub.f32 1.5, %v2253_v23 }
 0xa6e   :  { %v2294_v41 = vadd.f32 %v2720_v19, %v2287_v6 }
 0xa6f   :  { %v2255_v52 = vmul.f32 %v2816_v63, %v2254_v54 }
 0xa71   :  { %v2259_v36 = vsel %vm2258_vm11, %v2816_v63, %v2255_v52 }
 0xa72   :  { %v2281_v15 = vmul.f32 %v2259_v36, %v2213_v35 }
 0xa74   :  { %v2288_v25 = vmul.f32 %v2719_v26, %v2281_v15 }
 0xa76   :  { %v2295_v9 = vadd.f32 %v2720_v19, %v2288_v25 }
 0xa78   :  { %v2302_v43 = vpack.c.bf16 %v2295_v9, %v2294_v41 }
 0xa7a   :  { %2522 = vmatmul.msk.bf16.vlgmr.msrb.gmra.mxu3 %vm4449_vm13, %v2302_v43 }
 0xa7c   :  { %v2228_v45 = vpop.xlane.xlu0 %2227 }
 0xa7d   :  { %v2234_v55 = vmul.f32 %v2228_v45, %v3651_v20 }
 0xa7f   :  { %v2238_v39 = vadd.f32 1e-05, %v2234_v55 }
 0xa81   :  { %2817 = vrsqrt.f32 %v2238_v39  ;;  %vm2266_vm8 = vweird.f32 %v2238_v39 }
 0xa84   :  { %v2231_v18 = vpop.xlane.xlu1 %2230 }
 0xa85   :  { %v2235_v49 = vmul.f32 %v2231_v18, %v3651_v20 }
 0xa87   :  { %v2818_v48 = vpop.eup %2817  ;;  %v2239_v58 = vadd.f32 1e-05, %v2235_v49 }
 0xa88   :  { %v2261_v3 = vmul.f32 %v2818_v48, %v2238_v39  ;;  %vm2267_vm0 = vweird.f32 %v2818_v48 }
 0xa89   :  { %2819 = vrsqrt.f32 %v2239_v58  ;;  %vm2268_vm9 = vmor %vm2266_vm8, %vm2267_vm0  ;;  %vm2276_vm2 = vweird.f32 %v2239_v58 }
 0xa8a   :  { %v2262_v34 = vmul.f32 %v2818_v48, %v2261_v3 }
 0xa8c   :  { %v2263_v47 = vmul.f32 0.5, %v2262_v34 }
 0xa8e   :  { %v2264_v12 = vsub.f32 1.5, %v2263_v47 }
 0xa8f   :  { %v2820_v21 = vpop.eup %2819 }
 0xa90   :  { %v2265_v8 = vmul.f32 %v2818_v48, %v2264_v12  ;;  %v2271_v27 = vmul.f32 %v2820_v21, %v2239_v58  ;;  %vm2277_vm12 = vweird.f32 %v2820_v21 }
 0xa91   :  { %vm2278_vm3 = vmor %vm2276_vm2, %vm2277_vm12 }
 0xa92   :  { %v2272_v11 = vmul.f32 %v2820_v21, %v2271_v27  ;;  %v2269_v35 = vsel %vm2268_vm9, %v2818_v48, %v2265_v8 }
 0xa93   :  { %v2282_v20 = vmul.f32 %v2269_v35, %v4328_v42  ;;  %v2548_v42 = vld [vmem:[%s4396_s23] sm:$0xff] }
 0xa94   :  { %v2273_v33 = vmul.f32 0.5, %v2272_v11  ;;  %2384 = vmatpush.bf16.msrb.mxu0 %v2548_v42 }
 0xa95   :  { %v2289_v5 = vmul.f32 %v2719_v26, %v2282_v20 }
 0xa96   :  { %v2274_v31 = vsub.f32 1.5, %v2273_v33 }
 0xa97   :  { %v2296_v62 = vadd.f32 %v2720_v19, %v2289_v5 }
 0xa98   :  { %v2275_v59 = vmul.f32 %v2820_v21, %v2274_v31 }
 0xa9a   :  { %v2279_v44 = vsel %vm2278_vm3, %v2820_v21, %v2275_v59 }
 0xa9b   :  { %v2283_v60 = vmul.f32 %v2279_v44, %v4335_v46 }
 0xa9d   :  { %v2290_v32 = vmul.f32 %v2719_v26, %v2283_v60 }
 0xa9f   :  { %v2297_v57 = vadd.f32 %v2720_v19, %v2290_v32 }
 0xaa1   :  { %v2303_v4 = vpack.c.bf16 %v2297_v57, %v2296_v62 }
 0xaa3   :  { %2523 = vmatmul.msk.bf16.gmra.mxu3 %vm4446_vm4, %v2303_v4 }
 0xafd   :  { %v2335_v7 = vpop.f32.mrf.mxu3 }
 0xafe   :  { %v2336_v46 = vadd.f32 %v2721_v13, %v2335_v7 }
 0xb00   :  { %v2345_v37 = vmax.f32 %v2336_v46, 0.0 }
 0xb05   :  { %v2337_v29 = vpop.f32.mrf.mxu3 }
 0xb06   :  { %v2338_v30 = vadd.f32 %v2721_v13, %v2337_v29 }
 0xb08   :  { %v2346_v1 = vmax.f32 %v2338_v30, 0.0 }
 0xb0a   :  { %v2353_v24 = vpack.c.bf16 %v2346_v1, %v2345_v37 }
 0xb0c   :  { %2532 = vmatmul.msk.bf16.vlgmr.msrb.gmra.mxu0 %vm4450_vm5, %v2353_v24 }
 0xb26   :  { %v2340_v2 = vpop.f32.mrf.mxu3 }
 0xb27   :  { %v2341_v28 = vadd.f32 %v2721_v13, %v2340_v2 }
 0xb29   :  { %v2347_v53 = vmax.f32 %v2341_v28, 0.0 }
 0xb2e   :  { %v2342_v16 = vpop.f32.mrf.mxu3 }
 0xb2f   :  { %v2343_v17 = vadd.f32 %v2721_v13, %v2342_v16 }
 0xb31   :  { %v2348_v63 = vmax.f32 %v2343_v17, 0.0 }
 0xb33   :  { %v2354_v50 = vpack.c.bf16 %v2348_v63, %v2347_v53 }
 0xb35   :  { %2533 = vmatmul.msk.bf16.gmra.mxu0 %vm4451_vm6, %v2354_v50 }
 0xb89   :  { %v2386_v10 = vpop.f32.mrf.mxu0 }
 0xb8a   :  { %v2387_v56 = vadd.f32 %v2722_v22, %v2386_v10 }
 0xb8c   :  { %v2396_v23 = vadd.f32 %v2387_v56, %v4301_v51 }
 0xb8e   :  { %2400 = vst.msk [vmem:[#allocation35] sm:$0xff] %vm4453_vm14, %v2396_v23 }
 0xb91   :  { %v2388_v54 = vpop.f32.mrf.mxu0 }
 0xb92   :  { %v2389_v26 = vadd.f32 %v2722_v22, %v2388_v54 }
 0xb94   :  { %v2397_v38 = vadd.f32 %v2389_v26, %v4306_v14 }
 0xb96   :  { %2401 = vst.msk [vmem:[#allocation35 + $0x8] sm:$0xff] %vm4454_vm15, %v2397_v38 }
 0xbb2   :  { %v2391_v52 = vpop.f32.mrf.mxu0 }
 0xbb3   :  { %v2392_v36 = vadd.f32 %v2722_v22, %v2391_v52 }
 0xbb5   :  { %v2398_v19 = vadd.f32 %v2392_v36, %v4311_v40 }
 0xbb7   :  { %2402 = vst.msk [vmem:[#allocation35 + $0x10] sm:$0xff] %vm4455_vm1, %v2398_v19 }
 0xbba   :  { %v2393_v6 = vpop.f32.mrf.mxu0 }
 0xbbb   :  { %v2394_v51 = vadd.f32 %v2722_v22, %v2393_v6 }
 0xbbd   :  { %v2399_v15 = vadd.f32 %v2394_v51, %v4316_v61 }
 0xbbf   :  { %2403 = vst.msk [vmem:[#allocation35 + $0x18] sm:$0xff] %vm4457_vm7, %v2399_v15 }
 0xbc0   :  { %2416 = dma.vmem_to_hbm [thread:$0]  %s2409_s11, 512, %s2411_s22, [#allocation4], %s3388_s2, %s3388_s2, %s3389_s25  }
 0xbc1   :  { %3371 = dma.done.wait [#allocation4], 512  }
 0xbc2   :  { %3372 = vsyncadd [#allocation4], 4294966784 }
 0xbc3   :  { %2421 = vsyncpa [#allocation3], 1 }
 0xbc4   :  { %2422 = vsyncpa [#allocation6], 1 }
 0xbc5   :  { %2423 = vsyncpa [#allocation9], 1 }
 0xbc6   :  { %2424 = vsyncpa [#allocation12], 1 }
 0xbc7   :  { %2425 = vsyncpa [#allocation15], 1 }
 0xbc8   :  { %2426 = vsyncpa [#allocation18], 1 }
 0xbc9   :  { %2427 = vsyncpa [#allocation21], 1 }
 0xbca   :  { %2428 = vsyncpa [#allocation24], 1 }
 0xbcb   :  { %2429 = vsyncpa [#allocation27], 1 }
 0xbcc   :  { %2430 = vsyncpa [#allocation30], 1 }
 0xbcd   :  { %2431 = vsyncpa [#allocation33], 1 }
 0xbce   :  { %2432 = vsyncpa [#allocation4], 1 }

</bundles_post_ra>
